<compile_context>
chip_gen: v5e
topology: v5e:2x2
jax: 0.10.0
libtpu: 0.0.40
codegen_flags: <defaults>
</compile_context>

<pallas_src>
import functools

import jax
import jax.numpy as jnp
from jax.experimental import pallas as pl
from jax.experimental.pallas import tpu as pltpu

KH, KW = 3, 3
BN_EPS = 1e-5


def dsconv_kernel(x_mid_ref, x_top_ref, x_bot_ref, dw_w_ref, dw_b_ref,
                  pw_w_ref, pw_b_ref, o_ref):
    # x_mid_ref: (1, TH, W, Cin)  bf16   rows t*TH .. t*TH+TH-1
    # x_top_ref: (1, 1,  W, Cin)  bf16   row clamp(t*TH-1)   (masked to 0 when t == 0)
    # x_bot_ref: (1, 1,  W, Cin)  bf16   row clamp(t*TH+TH)  (masked to 0 when t == last)
    # dw_w_ref : (9, W, Cin) compute-dtype  depthwise weights, BN scale folded, row = dh*3+dw
    # dw_b_ref : (1, Cin)  f32              folded depthwise-BN bias
    # pw_w_ref : (Cin, Cout) bf16           pointwise weights, BN scale folded
    # pw_b_ref : (1, Cout) f32              folded pointwise-BN bias
    # o_ref    : (1, TH, W, Cout) bf16
    th = o_ref.shape[1]
    w_dim = o_ref.shape[2]
    cin = x_mid_ref.shape[3]
    cout = o_ref.shape[3]
    cdt = dw_w_ref.dtype          # depthwise FMA dtype: bf16 on v6e/v7x, f32 on v5e

    t = pl.program_id(1)
    n_t = pl.num_programs(1)

    mid = x_mid_ref[0].astype(cdt)                       # (TH, W, Cin)
    top = x_top_ref[0].astype(cdt)                       # (1,  W, Cin)
    bot = x_bot_ref[0].astype(cdt)

    # Only the two 1-row halos ever need zeroing (image top / bottom edge); scalar mask.
    top = top * (t > 0).astype(cdt)
    bot = bot * (t < n_t - 1).astype(cdt)

    # Assemble the (TH+2, W, Cin) row slab once (outer-dim concat; whole-tile copies only).
    slab = jnp.concatenate([top, mid, bot], axis=0)

    # Depthwise weights loaded once per grid step, already broadcast along W host-side.
    w_all = dw_w_ref[...]                                # (9, W, Cin)

    def col_sum(dw):
        # 3 row taps of one kernel column; FMAs in the compute dtype (bf16 on v6e/v7x).
        r = slab[0:th] * w_all[dw]
        r = r + slab[1:1 + th] * w_all[KW + dw]
        r = r + slab[2:2 + th] * w_all[2 * KW + dw]
        return r.astype(jnp.float32)

    # Cross-column combine in f32: shift each column's partial sum by +-1 along W (zero at the
    # image edge) and add.  Only one shifted (TH, W, Cin) array is live at any time.
    zcol = jnp.zeros((th, 1, cin), jnp.float32)
    c_left = col_sum(0)                                  # input col j-1 -> output col j
    acc = jnp.concatenate([zcol, c_left[:, :w_dim - 1, :]], axis=1)
    acc = acc + col_sum(1)                               # centre column, no shift
    c_right = col_sum(2)                                 # input col j+1 -> output col j
    acc = acc + jnp.concatenate([c_right[:, 1:, :], zcol], axis=1)

    # Folded depthwise-BN bias + ReLU6 (f32), then bf16 for the MXU.
    y = jnp.clip(acc + dw_b_ref[...], 0.0, 6.0)

    # Pointwise 1x1 conv as a (TH*W, Cin) x (Cin, Cout) bf16 matmul, f32 accumulation.
    ym = y.reshape(th * w_dim, cin).astype(jnp.bfloat16)
    z = jnp.dot(ym, pw_w_ref[...], preferred_element_type=jnp.float32)
    z = z + pw_b_ref[...]

    o_ref[...] = z.reshape(1, th, w_dim, cout).astype(o_ref.dtype)


def _choose_tile_h(h, w, cin, cout, requested=None):
    """Pick TH: largest divisor of H whose working set fits a generation-aware VMEM budget."""
    if requested is not None:
        assert h % requested == 0, f"tile_h={requested} must divide H={h}"
        return requested
    try:
        vmem_cap = pltpu.get_tpu_info().vmem_capacity_bytes
    except Exception:                       # conservative fallback (v7x: 64 MiB per TC)
        vmem_cap = 64 << 20
    budget = max(8 << 20, min(vmem_cap // 5, 32 << 20))
    per_row = (2 * w * cin * 2              # input rows, bf16, double-buffered
               + 3 * w * cin * 2            # slab + one column partial sum (bf16)
               + 2 * w * cin * 4            # f32 accumulator / shifted partial
               + w * cout * 4               # pointwise f32 result
               + 2 * w * cout * 2)          # output rows, bf16, double-buffered
    cap = max(1, budget // per_row)
    th = 1
    for d in range(1, h + 1):
        if h % d == 0 and d <= cap:
            th = d                          # largest divisor <= cap; maximizes MXU M = TH*W
    return th


@functools.partial(jax.jit, static_argnames=("tile_h", "compute_dtype"))
def dsconv_forward(x, dw_w, dw_gamma, dw_beta, dw_mean, dw_var,
                   pw_w, pw_gamma, pw_beta, pw_mean, pw_var,
                   *, tile_h=None, compute_dtype=jnp.bfloat16):
    # x: (N, H, W, Cin) NHWC.  Activations stored in bf16 (inference-grade precision).
    # compute_dtype: depthwise FMA dtype -- bf16 on v6e/v7x (bf16 VALUs), f32 on v5e.
    n, h, w, cin = x.shape
    cout = pw_w.shape[1]
    th = _choose_tile_h(h, w, cin, cout, tile_h)
    n_h = h // th

    # Fold BatchNorm into the conv weights / biases (tiny tensors, wrapper side).
    dw_scale = dw_gamma / jnp.sqrt(dw_var + BN_EPS)
    dw_bias = dw_beta - dw_mean * dw_scale
    pw_scale = pw_gamma / jnp.sqrt(pw_var + BN_EPS)
    pw_bias = pw_beta - pw_mean * pw_scale

    dw_wf = (dw_w * dw_scale).reshape(KH * KW, 1, cin)
    dw_wf = jnp.broadcast_to(dw_wf, (KH * KW, w, cin)).astype(compute_dtype)  # (9, W, Cin)
    dw_b2 = dw_bias.reshape(1, cin).astype(jnp.float32)
    pw_wf = (pw_w * pw_scale[None, :]).astype(jnp.bfloat16)                   # (Cin, Cout)
    pw_b2 = pw_bias.reshape(1, cout).astype(jnp.float32)

    xb = x.astype(jnp.bfloat16)

    # The same input array is passed three times: centre rows (auto-pipelined, 1x traffic)
    # plus the two single-row halos whose (clamped) row index is computed in the index_map.
    # Total input traffic = (1 + 2/TH)x; no wrapper-side gather or pad copy.
    return pl.pallas_call(
        dsconv_kernel,
        out_shape=jax.ShapeDtypeStruct((n, h, w, cout), jnp.bfloat16),
        grid_spec=pltpu.PrefetchScalarGridSpec(
            num_scalar_prefetch=0,
            grid=(n, n_h),
            in_specs=[
                pl.BlockSpec((1, th, w, cin), lambda i, t: (i, t, 0, 0)),
                pl.BlockSpec((1, 1, w, cin),
                             lambda i, t: (i, jnp.maximum(t * th - 1, 0), 0, 0)),
                pl.BlockSpec((1, 1, w, cin),
                             lambda i, t: (i, jnp.minimum((t + 1) * th, h - 1), 0, 0)),
                pl.BlockSpec((KH * KW, w, cin), lambda i, t: (0, 0, 0)),
                pl.BlockSpec((1, cin), lambda i, t: (0, 0)),
                pl.BlockSpec((cin, cout), lambda i, t: (0, 0)),
                pl.BlockSpec((1, cout), lambda i, t: (0, 0)),
            ],
            out_specs=pl.BlockSpec((1, th, w, cout), lambda i, t: (i, t, 0, 0)),
        ),
        compiler_params=pltpu.CompilerParams(
            dimension_semantics=("parallel", "parallel"),   # batch x row tiles (v7x: 2 TCs)
            vmem_limit_bytes=48 * 1024 * 1024),              # below v7x's 64 MiB/TC physical
    )(xb, xb, xb, dw_wf, dw_b2, pw_wf, pw_b2)


def reference_dsconv(x, dw_w, dw_g, dw_b, dw_m, dw_v, pw_w, pw_g, pw_b, pw_m, pw_v):
    """Pure-JAX f32 reference (same NHWC layout) for correctness checking."""
    xf = x.astype(jnp.float32)
    cin = xf.shape[-1]
    cout = pw_w.shape[1]
    y = jax.lax.conv_general_dilated(
        xf, dw_w.reshape(KH, KW, 1, cin),
        window_strides=(1, 1), padding=((1, 1), (1, 1)),
        dimension_numbers=("NHWC", "HWIO", "NHWC"),
        feature_group_count=cin)
    y = (y - dw_m) / jnp.sqrt(dw_v + BN_EPS) * dw_g + dw_b
    y = jnp.clip(y, 0.0, 6.0)
    z = jax.lax.conv_general_dilated(
        y, pw_w.reshape(1, 1, cin, cout),
        window_strides=(1, 1), padding="VALID",
        dimension_numbers=("NHWC", "HWIO", "NHWC"))
    z = (z - pw_m) / jnp.sqrt(pw_v + BN_EPS) * pw_g + pw_b
    return z


if __name__ == "__main__":
    # Small but aligned shapes: Cin/Cout multiples of 128 (lane-dense stores, full MXU K/N),
    # W multiple of 8, TH*W = 256 (fills the 256x256 MXU M dim on v6e/v7x), grid = (2, 2) so
    # both v7x TensorCores stay busy and interior + edge halo paths are all exercised.
    N, H, W = 2, 32, 16
    Cin, Cout = 128, 128

    key = jax.random.PRNGKey(0)
    keys = jax.random.split(key, 11)

    x = jax.random.normal(keys[0], (N, H, W, Cin), jnp.float32).astype(jnp.bfloat16)

    # Depthwise 3x3 conv weights (bias=False, BN present).
    dw_w = jax.random.normal(keys[1], (KH, KW, Cin), jnp.float32) * 0.2
    dw_gamma = 1.0 + 0.1 * jax.random.normal(keys[2], (Cin,), jnp.float32)
    dw_beta = 0.1 * jax.random.normal(keys[3], (Cin,), jnp.float32)
    dw_mean = 0.05 * jax.random.normal(keys[4], (Cin,), jnp.float32)
    dw_var = jnp.abs(1.0 + 0.1 * jax.random.normal(keys[5], (Cin,), jnp.float32))

    # Pointwise 1x1 conv weights (bias=False, BN present).
    pw_w = jax.random.normal(keys[6], (Cin, Cout), jnp.float32) * 0.1
    pw_gamma = 1.0 + 0.1 * jax.random.normal(keys[7], (Cout,), jnp.float32)
    pw_beta = 0.1 * jax.random.normal(keys[8], (Cout,), jnp.float32)
    pw_mean = 0.05 * jax.random.normal(keys[9], (Cout,), jnp.float32)
    pw_var = jnp.abs(1.0 + 0.1 * jax.random.normal(keys[10], (Cout,), jnp.float32))

    out = dsconv_forward(x, dw_w, dw_gamma, dw_beta, dw_mean, dw_var,
                         pw_w, pw_gamma, pw_beta, pw_mean, pw_var, tile_h=16)
    out = jax.block_until_ready(out)

    ref = reference_dsconv(x, dw_w, dw_gamma, dw_beta, dw_mean, dw_var,
                           pw_w, pw_gamma, pw_beta, pw_mean, pw_var)
    ref = jax.block_until_ready(ref)

    assert out.shape == (N, H, W, Cout), out.shape
    err = float(jnp.max(jnp.abs(out.astype(jnp.float32) - ref)))
    # bf16 activations / weights vs f32 reference -> inference-grade tolerance.
    assert jnp.allclose(out.astype(jnp.float32), ref, atol=0.1, rtol=0.05), err

    print("KERNEL_OK")
</pallas_src>

<mosaic_0001>
module attributes {stable_mosaic.version = 11 : i64} {
  func.func @dsconv_kernel(%arg0: i32, %arg1: i32, %arg2: memref<1x16x16x128xbf16, #tpu.memory_space<vmem>>, %arg3: memref<1x1x16x128xbf16, #tpu.memory_space<vmem>>, %arg4: memref<1x1x16x128xbf16, #tpu.memory_space<vmem>>, %arg5: memref<9x16x128xbf16, #tpu.memory_space<vmem>>, %arg6: memref<1x128xf32, #tpu.memory_space<vmem>>, %arg7: memref<128x128xbf16, #tpu.memory_space<vmem>>, %arg8: memref<1x128xf32, #tpu.memory_space<vmem>>, %arg9: memref<1x16x16x128xbf16, #tpu.memory_space<vmem>>) attributes {dimension_semantics = [#tpu.dimension_semantics<parallel>, #tpu.dimension_semantics<parallel>], iteration_bounds = array<i64: 2, 2>, scalar_prefetch = 0 : i64, scratch_operands = 0 : i64, tpu.core_type = #tpu.core_type<tc>, window_params = [{transform_indices = @transform_0, window_bounds = array<i64: 1, 16, 16, 128>}, {transform_indices = @transform_1, window_bounds = array<i64: 1, 1, 16, 128>}, {transform_indices = @transform_2, window_bounds = array<i64: 1, 1, 16, 128>}, {pipeline_mode = #tpu.pipeline_mode<synchronous>, transform_indices = @transform_3, window_bounds = array<i64: 9, 16, 128>}, {pipeline_mode = #tpu.pipeline_mode<synchronous>, transform_indices = @transform_4, window_bounds = array<i64: 1, 128>}, {pipeline_mode = #tpu.pipeline_mode<synchronous>, transform_indices = @transform_5, window_bounds = array<i64: 128, 128>}, {pipeline_mode = #tpu.pipeline_mode<synchronous>, transform_indices = @transform_6, window_bounds = array<i64: 1, 128>}, {transform_indices = @transform_7, window_bounds = array<i64: 1, 16, 16, 128>}]} {
    %c0 = arith.constant 0 : index
    %c0_0 = arith.constant 0 : index
    %c0_1 = arith.constant 0 : index
    %c0_2 = arith.constant 0 : index
    %0 = vector.load %arg2[%c0, %c0_0, %c0_1, %c0_2] : memref<1x16x16x128xbf16, #tpu.memory_space<vmem>>, vector<1x16x16x128xbf16>
    %1 = vector.shape_cast %0 : vector<1x16x16x128xbf16> to vector<16x16x128xbf16>
    %c0_3 = arith.constant 0 : index
    %c0_4 = arith.constant 0 : index
    %c0_5 = arith.constant 0 : index
    %c0_6 = arith.constant 0 : index
    %2 = vector.load %arg3[%c0_3, %c0_4, %c0_5, %c0_6] : memref<1x1x16x128xbf16, #tpu.memory_space<vmem>>, vector<1x1x16x128xbf16>
    %3 = vector.shape_cast %2 : vector<1x1x16x128xbf16> to vector<1x16x128xbf16>
    %c0_7 = arith.constant 0 : index
    %c0_8 = arith.constant 0 : index
    %c0_9 = arith.constant 0 : index
    %c0_10 = arith.constant 0 : index
    %4 = vector.load %arg4[%c0_7, %c0_8, %c0_9, %c0_10] : memref<1x1x16x128xbf16, #tpu.memory_space<vmem>>, vector<1x1x16x128xbf16>
    %5 = vector.shape_cast %4 : vector<1x1x16x128xbf16> to vector<1x16x128xbf16>
    %c0_i32 = arith.constant 0 : i32
    %6 = arith.cmpi sgt, %arg1, %c0_i32 : i32
    %7 = arith.extui %6 : i1 to i32
    %8 = arith.sitofp %7 : i32 to f32
    %9 = arith.truncf %8 : f32 to bf16
    %10 = vector.broadcast %9 : bf16 to vector<1x16x128xbf16>
    %11 = arith.mulf %3, %10 : vector<1x16x128xbf16>
    %c1_i32 = arith.constant 1 : i32
    %12 = arith.cmpi slt, %arg1, %c1_i32 : i32
    %13 = arith.extui %12 : i1 to i32
    %14 = arith.sitofp %13 : i32 to f32
    %15 = arith.truncf %14 : f32 to bf16
    %16 = vector.broadcast %15 : bf16 to vector<1x16x128xbf16>
    %17 = arith.mulf %5, %16 : vector<1x16x128xbf16>
    %18 = tpu.concatenate %11, %1, %17 in 0 : vector<1x16x128xbf16>, vector<16x16x128xbf16>, vector<1x16x128xbf16> -> vector<18x16x128xbf16>
    %c0_11 = arith.constant 0 : index
    %c0_12 = arith.constant 0 : index
    %c0_13 = arith.constant 0 : index
    %19 = vector.load %arg5[%c0_11, %c0_12, %c0_13] : memref<9x16x128xbf16, #tpu.memory_space<vmem>>, vector<9x16x128xbf16>
    %cst = arith.constant 0.000000e+00 : f32
    %20 = vector.broadcast %cst : f32 to vector<16x1x128xf32>
    %21 = vector.extract_strided_slice %18 {offsets = [0, 0, 0], sizes = [16, 16, 128], strides = [1, 1, 1]} : vector<18x16x128xbf16> to vector<16x16x128xbf16>
    %22 = vector.extract_strided_slice %19 {offsets = [0, 0, 0], sizes = [1, 16, 128], strides = [1, 1, 1]} : vector<9x16x128xbf16> to vector<1x16x128xbf16>
    %23 = vector.shape_cast %22 : vector<1x16x128xbf16> to vector<16x128xbf16>
    %24 = vector.shape_cast %23 : vector<16x128xbf16> to vector<1x16x128xbf16>
    %25 = vector.broadcast %24 : vector<1x16x128xbf16> to vector<16x16x128xbf16>
    %26 = arith.mulf %21, %25 : vector<16x16x128xbf16>
    %27 = vector.extract_strided_slice %18 {offsets = [1, 0, 0], sizes = [16, 16, 128], strides = [1, 1, 1]} : vector<18x16x128xbf16> to vector<16x16x128xbf16>
    %28 = vector.extract_strided_slice %19 {offsets = [3, 0, 0], sizes = [1, 16, 128], strides = [1, 1, 1]} : vector<9x16x128xbf16> to vector<1x16x128xbf16>
    %29 = vector.shape_cast %28 : vector<1x16x128xbf16> to vector<16x128xbf16>
    %30 = vector.shape_cast %29 : vector<16x128xbf16> to vector<1x16x128xbf16>
    %31 = vector.broadcast %30 : vector<1x16x128xbf16> to vector<16x16x128xbf16>
    %32 = arith.mulf %27, %31 : vector<16x16x128xbf16>
    %33 = arith.addf %26, %32 : vector<16x16x128xbf16>
    %34 = vector.extract_strided_slice %18 {offsets = [2, 0, 0], sizes = [16, 16, 128], strides = [1, 1, 1]} : vector<18x16x128xbf16> to vector<16x16x128xbf16>
    %35 = vector.extract_strided_slice %19 {offsets = [6, 0, 0], sizes = [1, 16, 128], strides = [1, 1, 1]} : vector<9x16x128xbf16> to vector<1x16x128xbf16>
    %36 = vector.shape_cast %35 : vector<1x16x128xbf16> to vector<16x128xbf16>
    %37 = vector.shape_cast %36 : vector<16x128xbf16> to vector<1x16x128xbf16>
    %38 = vector.broadcast %37 : vector<1x16x128xbf16> to vector<16x16x128xbf16>
    %39 = arith.mulf %34, %38 : vector<16x16x128xbf16>
    %40 = arith.addf %33, %39 : vector<16x16x128xbf16>
    %41 = arith.extf %40 : vector<16x16x128xbf16> to vector<16x16x128xf32>
    %42 = vector.extract_strided_slice %41 {offsets = [0, 0, 0], sizes = [16, 15, 128], strides = [1, 1, 1]} : vector<16x16x128xf32> to vector<16x15x128xf32>
    %43 = tpu.concatenate %20, %42 in 1 : vector<16x1x128xf32>, vector<16x15x128xf32> -> vector<16x16x128xf32>
    %44 = vector.extract_strided_slice %18 {offsets = [0, 0, 0], sizes = [16, 16, 128], strides = [1, 1, 1]} : vector<18x16x128xbf16> to vector<16x16x128xbf16>
    %45 = vector.extract_strided_slice %19 {offsets = [1, 0, 0], sizes = [1, 16, 128], strides = [1, 1, 1]} : vector<9x16x128xbf16> to vector<1x16x128xbf16>
    %46 = vector.shape_cast %45 : vector<1x16x128xbf16> to vector<16x128xbf16>
    %47 = vector.shape_cast %46 : vector<16x128xbf16> to vector<1x16x128xbf16>
    %48 = vector.broadcast %47 : vector<1x16x128xbf16> to vector<16x16x128xbf16>
    %49 = arith.mulf %44, %48 : vector<16x16x128xbf16>
    %50 = vector.extract_strided_slice %18 {offsets = [1, 0, 0], sizes = [16, 16, 128], strides = [1, 1, 1]} : vector<18x16x128xbf16> to vector<16x16x128xbf16>
    %51 = vector.extract_strided_slice %19 {offsets = [4, 0, 0], sizes = [1, 16, 128], strides = [1, 1, 1]} : vector<9x16x128xbf16> to vector<1x16x128xbf16>
    %52 = vector.shape_cast %51 : vector<1x16x128xbf16> to vector<16x128xbf16>
    %53 = vector.shape_cast %52 : vector<16x128xbf16> to vector<1x16x128xbf16>
    %54 = vector.broadcast %53 : vector<1x16x128xbf16> to vector<16x16x128xbf16>
    %55 = arith.mulf %50, %54 : vector<16x16x128xbf16>
    %56 = arith.addf %49, %55 : vector<16x16x128xbf16>
    %57 = vector.extract_strided_slice %18 {offsets = [2, 0, 0], sizes = [16, 16, 128], strides = [1, 1, 1]} : vector<18x16x128xbf16> to vector<16x16x128xbf16>
    %58 = vector.extract_strided_slice %19 {offsets = [7, 0, 0], sizes = [1, 16, 128], strides = [1, 1, 1]} : vector<9x16x128xbf16> to vector<1x16x128xbf16>
    %59 = vector.shape_cast %58 : vector<1x16x128xbf16> to vector<16x128xbf16>
    %60 = vector.shape_cast %59 : vector<16x128xbf16> to vector<1x16x128xbf16>
    %61 = vector.broadcast %60 : vector<1x16x128xbf16> to vector<16x16x128xbf16>
    %62 = arith.mulf %57, %61 : vector<16x16x128xbf16>
    %63 = arith.addf %56, %62 : vector<16x16x128xbf16>
    %64 = arith.extf %63 : vector<16x16x128xbf16> to vector<16x16x128xf32>
    %65 = arith.addf %43, %64 : vector<16x16x128xf32>
    %66 = vector.extract_strided_slice %18 {offsets = [0, 0, 0], sizes = [16, 16, 128], strides = [1, 1, 1]} : vector<18x16x128xbf16> to vector<16x16x128xbf16>
    %67 = vector.extract_strided_slice %19 {offsets = [2, 0, 0], sizes = [1, 16, 128], strides = [1, 1, 1]} : vector<9x16x128xbf16> to vector<1x16x128xbf16>
    %68 = vector.shape_cast %67 : vector<1x16x128xbf16> to vector<16x128xbf16>
    %69 = vector.shape_cast %68 : vector<16x128xbf16> to vector<1x16x128xbf16>
    %70 = vector.broadcast %69 : vector<1x16x128xbf16> to vector<16x16x128xbf16>
    %71 = arith.mulf %66, %70 : vector<16x16x128xbf16>
    %72 = vector.extract_strided_slice %18 {offsets = [1, 0, 0], sizes = [16, 16, 128], strides = [1, 1, 1]} : vector<18x16x128xbf16> to vector<16x16x128xbf16>
    %73 = vector.extract_strided_slice %19 {offsets = [5, 0, 0], sizes = [1, 16, 128], strides = [1, 1, 1]} : vector<9x16x128xbf16> to vector<1x16x128xbf16>
    %74 = vector.shape_cast %73 : vector<1x16x128xbf16> to vector<16x128xbf16>
    %75 = vector.shape_cast %74 : vector<16x128xbf16> to vector<1x16x128xbf16>
    %76 = vector.broadcast %75 : vector<1x16x128xbf16> to vector<16x16x128xbf16>
    %77 = arith.mulf %72, %76 : vector<16x16x128xbf16>
    %78 = arith.addf %71, %77 : vector<16x16x128xbf16>
    %79 = vector.extract_strided_slice %18 {offsets = [2, 0, 0], sizes = [16, 16, 128], strides = [1, 1, 1]} : vector<18x16x128xbf16> to vector<16x16x128xbf16>
    %80 = vector.extract_strided_slice %19 {offsets = [8, 0, 0], sizes = [1, 16, 128], strides = [1, 1, 1]} : vector<9x16x128xbf16> to vector<1x16x128xbf16>
    %81 = vector.shape_cast %80 : vector<1x16x128xbf16> to vector<16x128xbf16>
    %82 = vector.shape_cast %81 : vector<16x128xbf16> to vector<1x16x128xbf16>
    %83 = vector.broadcast %82 : vector<1x16x128xbf16> to vector<16x16x128xbf16>
    %84 = arith.mulf %79, %83 : vector<16x16x128xbf16>
    %85 = arith.addf %78, %84 : vector<16x16x128xbf16>
    %86 = arith.extf %85 : vector<16x16x128xbf16> to vector<16x16x128xf32>
    %87 = vector.extract_strided_slice %86 {offsets = [0, 1, 0], sizes = [16, 15, 128], strides = [1, 1, 1]} : vector<16x16x128xf32> to vector<16x15x128xf32>
    %88 = tpu.concatenate %87, %20 in 1 : vector<16x15x128xf32>, vector<16x1x128xf32> -> vector<16x16x128xf32>
    %89 = arith.addf %65, %88 : vector<16x16x128xf32>
    %c0_14 = arith.constant 0 : index
    %c0_15 = arith.constant 0 : index
    %90 = vector.load %arg6[%c0_14, %c0_15] : memref<1x128xf32, #tpu.memory_space<vmem>>, vector<1x128xf32>
    %91 = vector.shape_cast %90 : vector<1x128xf32> to vector<1x1x128xf32>
    %92 = vector.broadcast %91 : vector<1x1x128xf32> to vector<16x16x128xf32>
    %93 = arith.addf %89, %92 : vector<16x16x128xf32>
    %cst_16 = arith.constant 0.000000e+00 : f32
    %cst_17 = arith.constant 6.000000e+00 : f32
    %94 = vector.broadcast %cst_16 : f32 to vector<16x16x128xf32>
    %95 = arith.maximumf %94, %93 : vector<16x16x128xf32>
    %96 = vector.broadcast %cst_17 : f32 to vector<16x16x128xf32>
    %97 = arith.minimumf %96, %95 : vector<16x16x128xf32>
    %98 = vector.shape_cast %97 : vector<16x16x128xf32> to vector<256x128xf32>
    %99 = arith.truncf %98 : vector<256x128xf32> to vector<256x128xbf16>
    %c0_18 = arith.constant 0 : index
    %c0_19 = arith.constant 0 : index
    %100 = vector.load %arg7[%c0_18, %c0_19] : memref<128x128xbf16, #tpu.memory_space<vmem>>, vector<128x128xbf16>
    %cst_20 = arith.constant dense<0.000000e+00> : vector<256x128xf32>
    %101 = tpu.matmul %99, %100, %cst_20 {dimension_numbers = #tpu.dot_dimension_numbers<[1], [0], [0], [1], [0, 0, 1, 1], [], []>} : vector<256x128xbf16>, vector<128x128xbf16>, vector<256x128xf32> -> vector<256x128xf32>
    %c0_21 = arith.constant 0 : index
    %c0_22 = arith.constant 0 : index
    %102 = vector.load %arg8[%c0_21, %c0_22] : memref<1x128xf32, #tpu.memory_space<vmem>>, vector<1x128xf32>
    %103 = vector.broadcast %102 : vector<1x128xf32> to vector<256x128xf32>
    %104 = arith.addf %101, %103 : vector<256x128xf32>
    %105 = vector.shape_cast %104 : vector<256x128xf32> to vector<1x16x16x128xf32>
    %106 = arith.truncf %105 : vector<1x16x16x128xf32> to vector<1x16x16x128xbf16>
    %c0_23 = arith.constant 0 : index
    %c0_24 = arith.constant 0 : index
    %c0_25 = arith.constant 0 : index
    %c0_26 = arith.constant 0 : index
    %107 = vector.load %arg9[%c0_23, %c0_24, %c0_25, %c0_26] : memref<1x16x16x128xbf16, #tpu.memory_space<vmem>>, vector<1x16x16x128xbf16>
    tpu.vector_store %arg9[%c0_23, %c0_24, %c0_25, %c0_26], %106 {strides = array<i32>} : memref<1x16x16x128xbf16, #tpu.memory_space<vmem>>, vector<1x16x16x128xbf16>,
    return
  }
  func.func @transform_0(%arg0: i32, %arg1: i32) -> (i32, i32, i32, i32) {
    %c0_i32 = arith.constant 0 : i32
    %c0_i32_0 = arith.constant 0 : i32
    %c0_i32_1 = arith.constant 0 : i32
    return %arg0, %arg1, %c0_i32, %c0_i32_0 : i32, i32, i32, i32
  }
  func.func @transform_1(%arg0: i32, %arg1: i32) -> (i32, i32, i32, i32) {
    %c16_i32 = arith.constant 16 : i32
    %0 = arith.muli %arg1, %c16_i32 : i32
    %c1_i32 = arith.constant 1 : i32
    %1 = arith.subi %0, %c1_i32 : i32
    %c0_i32 = arith.constant 0 : i32
    %2 = arith.maxsi %1, %c0_i32 : i32
    %c0_i32_0 = arith.constant 0 : i32
    %c0_i32_1 = arith.constant 0 : i32
    %c0_i32_2 = arith.constant 0 : i32
    return %arg0, %2, %c0_i32_0, %c0_i32_1 : i32, i32, i32, i32
  }
  func.func @transform_2(%arg0: i32, %arg1: i32) -> (i32, i32, i32, i32) {
    %c1_i32 = arith.constant 1 : i32
    %0 = arith.addi %arg1, %c1_i32 : i32
    %c16_i32 = arith.constant 16 : i32
    %1 = arith.muli %0, %c16_i32 : i32
    %c31_i32 = arith.constant 31 : i32
    %2 = arith.minsi %1, %c31_i32 : i32
    %c0_i32 = arith.constant 0 : i32
    %c0_i32_0 = arith.constant 0 : i32
    %c0_i32_1 = arith.constant 0 : i32
    return %arg0, %2, %c0_i32, %c0_i32_0 : i32, i32, i32, i32
  }
  func.func @transform_3(%arg0: i32, %arg1: i32) -> (i32, i32, i32) {
    %c0_i32 = arith.constant 0 : i32
    %c0_i32_0 = arith.constant 0 : i32
    %c0_i32_1 = arith.constant 0 : i32
    %c0_i32_2 = arith.constant 0 : i32
    return %c0_i32, %c0_i32_0, %c0_i32_1 : i32, i32, i32
  }
  func.func @transform_4(%arg0: i32, %arg1: i32) -> (i32, i32) {
    %c0_i32 = arith.constant 0 : i32
    %c0_i32_0 = arith.constant 0 : i32
    %c0_i32_1 = arith.constant 0 : i32
    return %c0_i32, %c0_i32_0 : i32, i32
  }
  func.func @transform_5(%arg0: i32, %arg1: i32) -> (i32, i32) {
    %c0_i32 = arith.constant 0 : i32
    %c0_i32_0 = arith.constant 0 : i32
    %c0_i32_1 = arith.constant 0 : i32
    return %c0_i32, %c0_i32_0 : i32, i32
  }
  func.func @transform_6(%arg0: i32, %arg1: i32) -> (i32, i32) {
    %c0_i32 = arith.constant 0 : i32
    %c0_i32_0 = arith.constant 0 : i32
    %c0_i32_1 = arith.constant 0 : i32
    return %c0_i32, %c0_i32_0 : i32, i32
  }
  func.func @transform_7(%arg0: i32, %arg1: i32) -> (i32, i32, i32, i32) {
    %c0_i32 = arith.constant 0 : i32
    %c0_i32_0 = arith.constant 0 : i32
    %c0_i32_1 = arith.constant 0 : i32
    return %arg0, %arg1, %c0_i32, %c0_i32_0 : i32, i32, i32, i32
  }
}

</mosaic_0001>

<bundles_post_ra>
// kernel: dsconv_forward.1
= control target key start
LH: loop header
LB: loop body
LE: loop exit
PB: predicated region body
PF: predicated region fallthrough
CT: control target
= control target key end

     0   :  { %s4986_s0 = inlined_call_operand.hbm [shape: bf16[2,32,16,128], index: 0, kind: input, shape index: {}, may-alias: {0,1,2}]   ;;  %s4987_s1 = inlined_call_operand.hbm [shape: bf16[2,32,16,128], index: 1, kind: input, shape index: {}, may-alias: {0,1,2}]   ;;  %s4988_s2 = inlined_call_operand.hbm [shape: bf16[2,32,16,128], index: 2, kind: input, shape index: {}, may-alias: {0,1,2}]   ;;  %s4989_s3 = inlined_call_operand.vmem [shape: bf16[9,16,128], index: 3, kind: input, shape index: {}]   ;;  %s4990_s4 = inlined_call_operand.vmem [shape: f32[1,128], index: 4, kind: input, shape index: {}]   ;;  %s4991_s5 = inlined_call_operand.vmem [shape: bf16[128,128], index: 5, kind: input, shape index: {}]   ;;  %s4992_s6 = inlined_call_operand.vmem [shape: f32[1,128], index: 6, kind: input, shape index: {}]   ;;  %s4993_s7 = inlined_call_operand.hbm [shape: bf16[2,32,16,128], index: 7, kind: output, shape index: {}]  }
   0x1   :  { %5057 = sst [smem:[#allocation43_spill]] %s4986_s0 }
   0x2   :  { %5058 = sst [smem:[#allocation44_spill]] %s4987_s1 }
   0x3   :  { %5059 = sst [smem:[#allocation45_spill]] %s4989_s3 }
   0x4   :  { %5060 = sst [smem:[#allocation46_spill]] %s4990_s4 }
   0x5   :  { %5061 = sst [smem:[#allocation47_spill]] %s4991_s5 }
   0x6   :  { %5062 = sst [smem:[#allocation48_spill]] %s4992_s6 }
   0x7   :  { %5063 = sst [smem:[#allocation49_spill]] %s4993_s7 }
   0x8   :  { %12 = vsyncpa [#allocation3], 0 }
   0x9   :  { %14 = vsyncpa [#allocation3 + $0x1], 0 }
   0xa   :  { %15 = vsyncpa [#allocation6], 0 }
   0xb   :  { %17 = vsyncpa [#allocation6 + $0x1], 0 }
   0xc   :  { %18 = vsyncpa [#allocation4], 0 }
   0xd   :  { %20 = vsyncpa [#allocation4 + $0x1], 0  ;;  %s3625_s24 = smov 0   ;;  %s3627_s25 = smov 0  }
   0xe   :  { %s3629_s26 = smov 0   ;;  %s3631_s27 = smov 0  }
   0xf   :  { %s3633_s28 = smov 0   ;;  %s3635_s29 = smov 0  }
  0x10   :  { %s3637_s30 = smov 0   ;;  %s3639_s8 = smov 0  }
  0x11   :  { %s3641_s9 = smov 0   ;;  %s3643_s10 = smov 0  }
  0x12   :  { %s3645_s11 = smov 0   ;;  %s3647_s12 = smov 0  }
  0x13   :  { %s3649_s13 = smov 0   ;;  %s3651_s14 = smov 0  }
  0x14 LB: > { %5064 = sst [smem:[#allocation13_spill]] %s3547_s29  ;;  %s3696_s15 = sadd.s32 4294967295, %s3579_s14   ;;  %s3579_s14 = sphi %s3651_s14, %s26_s14   ;;  %s3575_s13 = sphi %s3649_s13, %s5158_s13   ;;  %s3571_s12 = sphi %s3647_s12, %s5157_s12   ;;  %s3567_s11 = sphi %s3645_s11, %s5156_s11   ;;  %s3563_s10 = sphi %s3643_s10, %s5155_s10   ;;  %s3559_s9 = sphi %s3641_s9, %s5167_s9   ;;  %s3555_s8 = sphi %s3639_s8, %s5166_s8   ;;  %s3551_s30 = sphi %s3637_s30, %s5165_s30   ;;  %s3547_s29 = sphi %s3635_s29, %s5152_s29   ;;  %s3543_s28 = sphi %s3633_s28, %s5164_s28   ;;  %s3539_s27 = sphi %s3631_s27, %s5163_s27   ;;  %s3535_s26 = sphi %s3629_s26, %s5162_s26   ;;  %s3531_s25 = sphi %s3627_s25, %s5161_s25   ;;  %s3527_s24 = sphi %s3625_s24, %s5160_s24  }
  0x15   : > { %5065 = sst [smem:[#allocation14_spill]] %s3551_s30  ;;  %s35_s16 = sadd.s32 1, %s3571_s12 }
  0x16   : > { %5066 = sst [smem:[#allocation15_spill]] %s3559_s9  ;;  %p36_p0 = scmp.ge.s32.totalorder %s35_s16, 2 }
  0x17   : > { %5067 = sst [smem:[#allocation16_spill]] %s3563_s10  ;;  %s38_s17 = sadd.s32 1, %s3575_s13 }
  0x18   : > { %5068 = sst [smem:[#allocation17_spill]] %s3567_s11  ;;  %p55_p1 = scmp.eq.s32.totalorder %s3579_s14, 0 }
  0x19   : > { %5069 = sst [smem:[#allocation18_spill]] %s3571_s12  ;;  %p61_p2 = scmp.eq.s32.totalorder %s3696_s15, 0 }
  0x1a   : > { %5070 = sst [smem:[#allocation19_spill]] %s3575_s13  ;;  %s5169_s16 = smov (%p36_p0, %s35_s16), 0 }
  0x1b   : > { %5071 = sst [smem:[#allocation20_spill]] %s5169_s16  ;;  %s5171_s17 = smov (!%p36_p0, %s38_s17), %s3575_s13 }
  0x1c   : > { %s43_s18 = ssub.s32 %s3571_s12, %s5169_s16  ;;  %s2856_s19 = sshll.u32 %s3571_s12, 4 }
  0x1d   : > { %p40_p3 = scmp.ge.s32.totalorder %s5171_s17, 2  ;;  %s2857_s20 = sadd.s32 4294967295, %s2856_s19 }
  0x1e   : > { %p72_p4 = scmp.gt.s32.totalorder %s2857_s20, 0  ;;  %s2858_s21 = sshll.u32 %s5169_s16, 4 }
  0x1f   : > { %s5173_s17 = smov (%p40_p3, %s5171_s17), 0  ;;  %s2859_s23 = sadd.s32 4294967295, %s2858_s21 }
  0x20   : > { %5072 = sst [smem:[#allocation21_spill]] %s5173_s17  ;;  %s5175_s20 = smov (!%p72_p4, %s2857_s20), 0 }
  0x21   : > { %s3713_s22 = ssub.s32 %s3575_s13, %s5173_s17  ;;  %p76_p5 = scmp.gt.s32.totalorder %s2859_s23, 0 }
  0x22   : > { %s3716_s7 = sor.u32 %s43_s18, %s3713_s22  ;;  %s83_s11 = sadd.s32 1, %s3547_s29 }
  0x23   : > { %p45_p6 = scmp.eq.s32.totalorder %s3716_s7, 0  ;;  %s5177_s23 = smov (!%p76_p5, %s2859_s23), 0 }
  0x24   : > { %p90_p7 = scmp.ne.s32.totalorder %s3547_s29, %s3543_s28  ;;  %p96_p8 = scmp.ne.s32.totalorder %s3543_s28, %s3539_s27 }
  0x25   : > { %s79_s16 = ssub.s32 %s5175_s20, %s5177_s23  ;;  %s3724_s17 = sadd.s32 16, %s2856_s19 }
  0x26   : > { %s80_s6 = sor.u32 %s79_s16, %s3713_s22  ;;  %p3729_p9 = por %p90_p7, %p55_p1 }
  0x27   : > { %p81_p10 = scmp.eq.s32.totalorder %s80_s6, 0  ;;  %p3735_p11 = por %p96_p8, %p61_p2 }
  0x28   : > { %s3740_s27 = sadd.s32 16, %s2858_s21  ;;  %p5012_p0 = scmp.lt.s32.totalorder %s3579_s14, 4 }
  0x29   : > { %s5074_s10 = scalar_select %p3735_p11, 1, 0 }
  0x2a   : > { %s3743_s19 = scalar_select %p81_p10, %s3547_s29, %s83_s11  }
  0x2b   : > { %5075 = sst [smem:[#allocation22_spill]] %s5074_s10  ;;  %s3748_s16 = sshll.u32 %s3575_s13, 6 }
  0x2c   : > { %5076 = sst [smem:[#allocation23_spill]] %s3743_s19  ;;  %s305_s6 = sand.u32 1, %s3579_s14  }
  0x2d   : > { %s307_s23 = sand.u32 1, %s3547_s29   ;;  %s2872_s3 = sshll.u32 %s5175_s20, 1 }
  0x2e   : > { %s2869_s4 = sshll.u32 %s307_s23, 3  ;;  %s318_s5 = sadd.s32 %s2872_s3, %s3748_s16 }
  0x2f   : > { %s309_s10 = scalar_lea.vmem [#allocation5], %s2869_s4  ;;  %s2874_s11 = sshll.u32 %s318_s5, 2 }
  0x30   : > { %s323_s21 = sshll.u32 %s309_s10, 4  ;;  %s5077_s1 = sld [smem:[#allocation44_spill]]  ;;  %s324_s21 = int_to_ptr.vmem [resolvable:$true] %s323_s21 }
  0x31   : > { %p3202_p3 = pnand %p5012_p0, %p3729_p9  ;;  %p2880_p4 = scmp.ge.s32.totalorder %s3579_s14, 1 }
  0x32   : > { %s3761_s4 = scalar_lea.sflag [#allocation6], %s305_s6  ;;  %s5005_s5 = smov 64  }
  0x33   : > { %s5007_s10 = smov 4   ;;  %p359_p5 = scmp.lt.s32.totalorder %s3579_s14, 5 }
  0x34   : > { %s47_s20 = sadd.s32 1, %s3559_s9  ;;  %p54_p8 = scmp.ne.s32.totalorder %s3559_s9, %s3555_s8 }
  0x35   : > { %p3768_p7 = pnand %p2880_p4, %p359_p5  ;;  %p60_p9 = scmp.ne.s32.totalorder %s3555_s8, %s3551_s30 }
  0x36   : > { %s320_s29 = scalar_lea.hbm %s5077_s1, %s2874_s11  ;;  %p242_p10 = scmp.eq.s32.totalorder %s3696_s15, 3 }
  0x37   : > { %s321_s3 = sshll.u32 %s320_s29, 4  ;;  %s2855_s29 = sadd.s32 4294967294, %s3579_s14   ;;  %s322_s3 = int_to_ptr.hbm [resolvable:$true] %s321_s3 }
  0x38   : > { %3204 = dma.hbm_to_vmem [thread:$0]  (!%p3202_p3), %s322_s3, 128, %s324_s21, %s3761_s4, %s5005_s5, %s5005_s5, %s5007_s10  }
  0x39   : > { %s3777_s18 = scalar_select %p45_p6, %s3559_s9, %s47_s20  }
  0x3a   : > { %p248_p13 = scmp.eq.s32.totalorder %s2855_s29, 3  ;;  %p3786_p12 = por %p55_p1, %p54_p8 }
  0x3b   : > { %5079 = sst [smem:[#allocation24_spill]] %s3777_s18  ;;  %p3792_p3 = por %p61_p2, %p60_p9 }
  0x3c   : > { %p3796_p4 = por %p242_p10, %p54_p8  ;;  %p3800_p6 = por %p248_p13, %p60_p9 }
  0x3d   : > { %s280_s21 = sand.u32 1, %s3559_s9   ;;  %s2928_s11 = sshll.u32 %s3571_s12, 5 }
  0x3e   : > { %s5083_s23 = scalar_select %p3800_p6, 1, 0 }
  0x3f   : > { %s2864_s3 = sshll.u32 %s280_s21, 7  ;;  %s290_s29 = sadd.s32 %s2928_s11, %s3748_s16 }
  0x40   : > { %5084 = sst [smem:[#allocation25_spill]] %s5083_s23  ;;  %s2868_s20 = sshll.u32 %s290_s29, 2 }
  0x41   : > { %s284_s5 = scalar_lea.vmem [#allocation2], %s2864_s3  ;;  %s5085_s0 = sld [smem:[#allocation43_spill]] }
  0x42   : > { %s295_s10 = sshll.u32 %s284_s5, 4  ;;  %p3199_p13 = pnand %p5012_p0, %p3786_p12  ;;  %s296_s10 = int_to_ptr.vmem [resolvable:$true] %s295_s10 }
  0x43   : > { %s281_s11 = scalar_lea.sflag [#allocation3], %s280_s21  ;;  %s5086_s12 = smov 4  }
  0x44   : > { %s5087_s29 = smov 64   ;;  %p5088_p5 = scmp.lt.s32.totalorder %s3724_s17, 31 }
  0x45   : > { %p5089_p8 = scmp.lt.s32.totalorder %s3740_s27, 31  ;;  %s119_s1 = sadd.s32 1, %s3535_s26 }
  0x46   : > { %s5179_s17 = smov (!%p5088_p5, %s3724_s17), 31  ;;  %p126_p9 = scmp.ne.s32.totalorder %s3535_s26, %s3531_s25 }
  0x47   : > { %s292_s23 = scalar_lea.hbm %s5085_s0, %s2868_s20  ;;  %s5181_s27 = smov (!%p5089_p8, %s3740_s27), 31 }
  0x48   : > { %s293_s9 = sshll.u32 %s292_s23, 4  ;;  %s115_s5 = ssub.s32 %s5179_s17, %s5181_s27  ;;  %s294_s9 = int_to_ptr.hbm [resolvable:$true] %s293_s9 }
  0x49   : > { %3201 = dma.hbm_to_vmem [thread:$0]  (!%p3199_p13), %s294_s9, 2048, %s296_s10, %s281_s11, %s5087_s29, %s5087_s29, %s5086_s12  }
  0x4a   : > { %p132_p10 = scmp.ne.s32.totalorder %s3531_s25, %s3527_s24  ;;  %s116_s18 = sor.u32 %s115_s5, %s3713_s22 }
  0x4b   : > { %p3831_p12 = por %p126_p9, %p55_p1  ;;  %p117_p0 = scmp.eq.s32.totalorder %s116_s18, 0 }
  0x4c   : > { %p3837_p13 = por %p132_p10, %p61_p2  ;;  %s335_s10 = sand.u32 1, %s3535_s26  }
  0x4d   : > { %s2877_s23 = sshll.u32 %s5179_s17, 1  ;;  %s2875_s24 = sshll.u32 %s335_s10, 3 }
  0x4e   : > { %s3843_s21 = scalar_select %p117_p0, %s3535_s26, %s119_s1  }
  0x4f   : > { %s346_s22 = sadd.s32 %s2877_s23, %s3748_s16  ;;  %s337_s5 = scalar_lea.vmem [#allocation7], %s2875_s24 }
  0x50   : > { %s2879_s27 = sshll.u32 %s346_s22, 2  ;;  %s351_s0 = sshll.u32 %s337_s5, 4  ;;  %s352_s0 = int_to_ptr.vmem [resolvable:$true] %s351_s0 }
  0x51   : > { %s348_s11 = scalar_lea.hbm %s4988_s2, %s2879_s27  ;;  %p5092_p1 = scmp.lt.s32.totalorder %s3579_s14, 4 }
  0x52   : > { %s349_s30 = sshll.u32 %s348_s11, 4  ;;  %363 = sbr.rel (%p3768_p7) target bundleno = 718 (0x2ce), region = 48  ;;  %s350_s30 = int_to_ptr.hbm [resolvable:$true] %s349_s30 }
  0x53   : > { %p3205_p2 = pnand %p5092_p1, %p3831_p12 }
  0x55   : > { %3207 = dma.hbm_to_vmem [thread:$0]  (!%p3205_p2), %s350_s30, 128, %s352_s0, %s3761_s4, %s5087_s29, %s5087_s29, %s5086_s12  }
  0x57   : > { %s3860_s17 = sand.u32 1, %s3555_s8  }
  0x58   : > { %s2881_s16 = sshll.u32 %s3860_s17, 7  ;;  %s366_s1 = scalar_lea.sflag [#allocation3], %s3860_s17 }
  0x59   : > { %s3866_s18 = scalar_lea.vmem [#allocation2], %s2881_s16 }
  0x5a   : > { %3510 = dma.done.wait (%p3792_p3), %s366_s1, 2048  }
  0x5b   : > { %3512 = vsyncadd (%p3792_p3), %s366_s1, 4294965248  ;;  %s375_s30 = sand.u32 1, %s3696_s15   ;;  %s377_s12 = sand.u32 1, %s3543_s28  }
  0x5c   : > { %s3874_s4 = sshll.u32 %s377_s12, 3  ;;  %s376_s13 = scalar_lea.sflag [#allocation6], %s375_s30 }
  0x5d   : > { %s379_s29 = scalar_lea.vmem [#allocation5], %s3874_s4 }
  0x5e   : > { %3514 = dma.done.wait (%p3735_p11), %s376_s13, 128  }
  0x5f   : > { %3516 = vsyncadd (%p3735_p11), %s376_s13, 4294967168  ;;  %s387_s19 = sand.u32 1, %s3531_s25  }
  0x60   : > { %s3882_s6 = sshll.u32 %s387_s19, 3 }
  0x61   : > { %s389_s10 = scalar_lea.vmem [#allocation7], %s3882_s6 }
  0x62   : > { %3518 = dma.done.wait (%p3837_p13), %s376_s13, 128  }
  0x63   : > { %3520 = vsyncadd (%p3837_p13), %s376_s13, 4294967168  ;;  %s5094_s24 = sld [smem:[#allocation47_spill]]  ;;  %v3134_v2 = vld [vmem:[%s3866_s18 + $0x38] sm:$0xff]   ;;  %v3135_v4 = vld [vmem:[%s3866_s18 + $0x40] sm:$0xff]   ;;  %vm1097_vm0 = vcmask 1040384   ;;  %vm2230_vm1 = vcmask 1046528  }
  0x64   : > { %v3896_v3 = vunpack.c.l.bf16 %v3134_v2  ;;  %v3136_v5 = vld [vmem:[%s3866_s18 + $0x48] sm:$0xff]   ;;  %s5097_s11 = sld [smem:[#allocation45_spill]]  ;;  %v3906_v8 = vunpack.c.h.bf16 %v3134_v2  ;;  %v3908_v9 = vunpack.c.l.bf16 %v3135_v4  ;;  %v3910_v10 = vunpack.c.h.bf16 %v3135_v4  ;;  %v3138_v36 = vld [vmem:[%s3866_s18 + $0x58] sm:$0xff]  }
  0x65   : > { %v3912_v11 = vunpack.c.l.bf16 %v3136_v5  ;;  %v3923_v15 = vunpack.c.h.bf16 %v3136_v5  ;;  %v3992_v49 = vunpack.c.l.bf16 %v3138_v36  ;;  %s5108_s30 = sld [smem:[#allocation46_spill]] }
  0x66   : > { %5096 = vst [vmem:[#allocation26_spill] sm:$0xff] %v3896_v3  ;;  %s5110_s12 = sld [smem:[#allocation16_spill]] }
  0x67   : > { %5099 = vst [vmem:[#allocation27_spill] sm:$0xff] %v3906_v8 }
  0x68   : > { %5100 = vst [vmem:[#allocation28_spill] sm:$0xff] %v3908_v9 }
  0x69   : > { %s5095_s22 = smov %s5094_s24  ;;  %v2938_v0 = vld [vmem:[%s5094_s24 + $0x38] sm:$0xff]  ;;  %5101 = vst [vmem:[#allocation29_spill] sm:$0xff] %v3910_v10 }
  0x6a   : > { %3167 = vmatpush.bf16.msra.mxu2 %v2938_v0  ;;  %3168 = vmatpush.bf16.msra.mxu3 %v2938_v0  ;;  %v2937_v1 = vld [vmem:[%s5095_s22 + $0x30] sm:$0xff]  ;;  %s5098_s5 = smov %s5097_s11  ;;  %v3013_v6 = vld [vmem:[%s5097_s11] sm:$0xff]   ;;  %v2936_v7 = vld [vmem:[%s5095_s22 + $0x28] sm:$0xff]  ;;  %5102 = vst [vmem:[#allocation30_spill] sm:$0xff] %v3992_v49 }
  0x6b   : > { %3166 = vmatpush.bf16.msra.mxu1 %v2938_v0  ;;  %2543 = vmatpush.bf16.msra.mxu0 %v2938_v0  ;;  %v3143_v12 = vld [vmem:[%s5098_s5 + $0x8] sm:$0xff]   ;;  %v3144_v13 = vld [vmem:[%s5098_s5 + $0x10] sm:$0xff]   ;;  %v3145_v14 = vld [vmem:[%s5098_s5 + $0x18] sm:$0xff]   ;;  %v3925_v16 = vunpack.c.l.bf16 %v3013_v6  ;;  %v3927_v17 = vunpack.c.h.bf16 %v3013_v6  ;;  %s5109_s19 = smov %s5108_s30 }
  0x6c   : > { %v3929_v18 = vunpack.c.l.bf16 %v3143_v12  ;;  %v3146_v19 = vld [vmem:[%s5098_s5 + $0x20] sm:$0xff]   ;;  %v3147_v20 = vld [vmem:[%s5098_s5 + $0x28] sm:$0xff]   ;;  %v3148_v21 = vld [vmem:[%s5098_s5 + $0x30] sm:$0xff]   ;;  %v3940_v22 = vunpack.c.h.bf16 %v3143_v12  ;;  %v3942_v23 = vunpack.c.l.bf16 %v3144_v13  ;;  %v3944_v24 = vunpack.c.l.bf16 %v3145_v14  ;;  %p477_p11 = scmp.gt.s32.totalorder %s5110_s12, 0  ;;  %p501_p7 = scmp.lt.s32.totalorder %s5110_s12, 1 }
  0x6d   : > { %v3946_v25 = vunpack.c.h.bf16 %v3145_v14  ;;  %v3149_v26 = vld [vmem:[%s5098_s5 + $0x38] sm:$0xff]   ;;  %v3150_v27 = vld [vmem:[%s5098_s5 + $0x40] sm:$0xff]   ;;  %v3954_v28 = vunpack.c.h.bf16 %v3144_v13  ;;  %v3956_v29 = vunpack.c.l.bf16 %v3146_v19  ;;  %v3958_v30 = vunpack.c.h.bf16 %v3146_v19  ;;  %s2939_s0 = sshll.u32 %s5110_s12, 5  ;;  %s2697_s12 = scalar_lea.sflag [#allocation4], %s3860_s17 }
  0x6e   : > { %3170 = vmatpush.bf16.msra.mxu2 %v2937_v1  ;;  %3171 = vmatpush.bf16.msra.mxu3 %v2937_v1  ;;  %v3960_v31 = vunpack.c.l.bf16 %v3147_v20  ;;  %v3962_v32 = vunpack.c.h.bf16 %v3147_v20  ;;  %v3964_v33 = vunpack.c.l.bf16 %v3148_v21  ;;  %v3966_v34 = vunpack.c.h.bf16 %v3148_v21  ;;  %v2935_v41 = vld [vmem:[%s5095_s22 + $0x20] sm:$0xff]  ;;  %v2934_v58 = vld [vmem:[%s5095_s22 + $0x18] sm:$0xff]  ;;  %v2933_v20 = vld [vmem:[%s5095_s22 + $0x10] sm:$0xff]  ;;  %s478_s13 = scalar_select %p477_p11, 1, 0 }
  0x6f   : > { %3169 = vmatpush.bf16.msra.mxu1 %v2937_v1  ;;  %2544 = vmatpush.bf16.msra.mxu0 %v2937_v1  ;;  %v3968_v35 = vunpack.c.l.bf16 %v3149_v26  ;;  %v3971_v37 = vunpack.c.h.bf16 %v3149_v26  ;;  %v3973_v38 = vunpack.c.l.bf16 %v3150_v27  ;;  %v593_v39 = vmul.f32 %v3925_v16, %v3896_v3 }
  0x70   : > { %v594_v40 = vmul.f32 %v3927_v17, %v3906_v8  ;;  %v3982_v42 = vunpack.c.h.bf16 %v3150_v27  ;;  %v661_v43 = vmul.f32 %v3944_v24, %v3908_v9  ;;  %v662_v44 = vmul.f32 %v3946_v25, %v3910_v10  ;;  %s4105_s15 = scvt.s32.f32 %s478_s13 }
  0x71   : > { %v857_v45 = vmul.f32 %v3964_v33, %v3912_v11  ;;  %v625_v46 = vpack.c.bf16 %v593_v39, %v593_v39  ;;  %v858_v48 = vmul.f32 %v3966_v34, %v3923_v15  ;;  %v1212_v53 = vmul.f32 %v3929_v18, %v3896_v3 }
  0x72   : > { %3173 = vmatpush.bf16.msra.mxu2 %v2936_v7  ;;  %3174 = vmatpush.bf16.msra.mxu3 %v2936_v7  ;;  %v626_v47 = vpack.c.bf16 %v594_v40, %v594_v40  ;;  %v693_v50 = vpack.c.bf16 %v661_v43, %v661_v43  ;;  %v694_v51 = vpack.c.bf16 %v662_v44, %v662_v44  ;;  %v4012_v39 = vunpack.c.h.bf16 %v3138_v36  ;;  %s482_s23 = sshrl.u32 %s4105_s15, 16  ;;  %p481_p0 = scmp.ne.f32.partialorder %s4105_s15, %s4105_s15 }
  0x73   : > { %3172 = vmatpush.bf16.msra.mxu1 %v2936_v7  ;;  %2545 = vmatpush.bf16.msra.mxu0 %v2936_v7  ;;  %v889_v52 = vpack.c.bf16 %v857_v45, %v857_v45  ;;  %v725_v54 = vunpack.c.l.bf16 %v625_v46  ;;  %v890_v56 = vpack.c.bf16 %v858_v48, %v858_v48  ;;  %v1213_v57 = vmul.f32 %v3940_v22, %v3906_v8  ;;  %v4017_v45 = vld [vmem:[%s3866_s18 + $0x60] sm:$0xff]   ;;  %s483_s24 = sand.u32 1, %s482_s23 }
  0x74   : > { %v726_v55 = vunpack.c.l.bf16 %v626_v47  ;;  %v757_v59 = vunpack.c.l.bf16 %v693_v50  ;;  %v758_v60 = vunpack.c.l.bf16 %v694_v51  ;;  %v1244_v62 = vpack.c.bf16 %v1212_v53, %v1212_v53  ;;  %5103 = vst [vmem:[#allocation31_spill] sm:$0xff] %v4012_v39  ;;  %s484_s27 = sadd.s32 32767, %s483_s24 }
  0x75   : > { %v953_v61 = vunpack.c.l.bf16 %v889_v52  ;;  %v954_v63 = vunpack.c.l.bf16 %v890_v56  ;;  %v1245_v0 = vpack.c.bf16 %v1213_v57, %v1213_v57  ;;  %v1278_v1 = vmul.f32 %v3956_v29, %v3908_v9  ;;  %s485_s3 = sadd.s32 %s484_s27, %s4105_s15 }
  0x76   : > { %3176 = vmatpush.bf16.msra.mxu2 %v2935_v41  ;;  %3177 = vmatpush.bf16.msra.mxu3 %v2935_v41  ;;  %v1279_v2 = vmul.f32 %v3958_v30, %v3910_v10  ;;  %v789_v4 = vadd.f32 %v757_v59, %v725_v54  ;;  %v790_v5 = vadd.f32 %v758_v60, %v726_v55  ;;  %v1342_v6 = vunpack.c.l.bf16 %v1244_v62  ;;  %v2932_v54 = vld [vmem:[%s5095_s22 + $0x8] sm:$0xff]  ;;  %s486_s9 = sand.u32 4294901760, %s485_s3 }
  0x77   : > { %3175 = vmatpush.bf16.msra.mxu1 %v2935_v41  ;;  %2546 = vmatpush.bf16.msra.mxu0 %v2935_v41  ;;  %v1472_v7 = vmul.f32 %v3968_v35, %v3912_v11  ;;  %v1310_v12 = vpack.c.bf16 %v1278_v1, %v1278_v1  ;;  %v1343_v14 = vunpack.c.l.bf16 %v1245_v0  ;;  %v1473_v19 = vmul.f32 %v3971_v37, %v3923_v15  ;;  %s5183_s9 = smov (%p481_p0, %s486_s9), 2143289344 }
  0x78   : > { %v1311_v13 = vpack.c.bf16 %v1279_v2, %v1279_v2  ;;  %v821_v21 = vpack.c.bf16 %v789_v4, %v789_v4  ;;  %v822_v26 = vpack.c.bf16 %v790_v5, %v790_v5  ;;  %v1730_v44 = vmul.f32 %v3942_v23, %v3896_v3  ;;  %s489_s20 = sshrl.u32 %s5183_s9, 16 }
  0x79   : > { %v1504_v27 = vpack.c.bf16 %v1472_v7, %v1472_v7  ;;  %v1374_v40 = vunpack.c.l.bf16 %v1310_v12  ;;  %v1505_v43 = vpack.c.bf16 %v1473_v19, %v1473_v19  ;;  %v1731_v50 = vmul.f32 %v3954_v28, %v3906_v8  ;;  %v2931_v12 = vld [vmem:[%s5095_s22] sm:$0xff]  ;;  %s490_s11 = sshll.u32 %s489_s20, 16 }
  0x7a   : > { %3179 = vmatpush.bf16.msra.mxu2 %v2934_v58  ;;  %3180 = vmatpush.bf16.msra.mxu3 %v2934_v58  ;;  %v1375_v41 = vunpack.c.l.bf16 %v1311_v13  ;;  %v921_v46 = vunpack.c.l.bf16 %v821_v21  ;;  %v922_v47 = vunpack.c.l.bf16 %v822_v26  ;;  %v1762_v53 = vpack.c.bf16 %v1730_v44, %v1730_v44  ;;  %s491_s1 = sor.u32 %s490_s11, %s489_s20 }
  0x7b   : > { %3178 = vmatpush.bf16.msra.mxu1 %v2934_v58  ;;  %2547 = vmatpush.bf16.msra.mxu0 %v2934_v58  ;;  %v1568_v48 = vunpack.c.l.bf16 %v1504_v27  ;;  %v1406_v51 = vadd.f32 %v1374_v40, %v1342_v6  ;;  %v1569_v52 = vunpack.c.l.bf16 %v1505_v43  ;;  %v1763_v57 = vpack.c.bf16 %v1731_v50, %v1731_v50 }
  0x7c   : > { %v1407_v36 = vadd.f32 %v1375_v41, %v1343_v14  ;;  %v985_v55 = vadd.f32 %v953_v61, %v921_v46  ;;  %v986_v56 = vadd.f32 %v954_v63, %v922_v47  ;;  %v4025_v58 = vunpack.c.l.bf16 %v4017_v45 }
  0x7d   : > { %v1438_v59 = vpack.c.bf16 %v1406_v51, %v1406_v51  ;;  %v1796_v62 = vmul.f32 %v3960_v31, %v3908_v9  ;;  %v1797_v0 = vmul.f32 %v3962_v32, %v3910_v10  ;;  %v1860_v4 = vunpack.c.l.bf16 %v1762_v53  ;;  %v3140_v53 = vld [vmem:[%s3866_s18 + $0x68] sm:$0xff]  }
  0x7e   : > { %3182 = vmatpush.bf16.msra.mxu2 %v2933_v20  ;;  %3183 = vmatpush.bf16.msra.mxu3 %v2933_v20  ;;  %5104 = vst [vmem:[#allocation32_spill] sm:$0xff] %v4025_v58  ;;  %v1439_v60 = vpack.c.bf16 %v1407_v36, %v1407_v36  ;;  %v1017_v1 = vpack.c.bf16 %v985_v55, %v985_v55  ;;  %v1861_v5 = vunpack.c.l.bf16 %v1763_v57 }
  0x7f   : > { %3181 = vmatpush.bf16.msra.mxu1 %v2933_v20  ;;  %v1018_v2 = vpack.c.bf16 %v986_v56, %v986_v56  ;;  %2548 = vmatpush.bf16.msra.mxu0 %v2933_v20  ;;  %v1536_v61 = vunpack.c.l.bf16 %v1438_v59  ;;  %v1828_v6 = vpack.c.bf16 %v1796_v62, %v1796_v62  ;;  %v1829_v7 = vpack.c.bf16 %v1797_v0, %v1797_v0 }
  0x80   : > { %v1537_v63 = vunpack.c.l.bf16 %v1439_v60  ;;  %v1049_v13 = vunpack.c.l.bf16 %v1017_v1  ;;  %v1990_v19 = vmul.f32 %v3973_v38, %v3912_v11  ;;  %v1991_v21 = vmul.f32 %v3982_v42, %v3923_v15 }
  0x81   : > { %v1050_v14 = vunpack.c.l.bf16 %v1018_v2  ;;  %v1600_v20 = vadd.f32 %v1568_v48, %v1536_v61  ;;  %v1892_v27 = vunpack.c.l.bf16 %v1828_v6  ;;  %v1893_v40 = vunpack.c.l.bf16 %v1829_v7 }
  0x82   : > { %3185 = vmatpush.bf16.msra.mxu2 %v2932_v54  ;;  %3186 = vmatpush.bf16.msra.mxu3 %v2932_v54  ;;  %v1601_v26 = vadd.f32 %v1569_v52, %v1537_v63  ;;  %v1122_v41 = vrot.slane %v1049_v13, 7  ;;  %v2022_v44 = vpack.c.bf16 %v1990_v19, %v1990_v19  ;;  %v2023_v46 = vpack.c.bf16 %v1991_v21, %v1991_v21 }
  0x83   : > { %3184 = vmatpush.bf16.msra.mxu1 %v2932_v54  ;;  %v1123_v43 = vrot.slane %v1050_v14, 7  ;;  %2549 = vmatpush.bf16.msra.mxu0 %v2932_v54  ;;  %v1632_v47 = vpack.c.bf16 %v1600_v20, %v1600_v20  ;;  %v1924_v51 = vadd.f32 %v1892_v27, %v1860_v4  ;;  %v1925_v36 = vadd.f32 %v1893_v40, %v1861_v5 }
  0x84   : > { %v1633_v50 = vpack.c.bf16 %v1601_v26, %v1601_v26  ;;  %v1186_v56 = vsel %vm1097_vm0, 0.0, %v1122_v41  ;;  %v2086_v48 = vunpack.c.l.bf16 %v2022_v44  ;;  %v2087_v52 = vunpack.c.l.bf16 %v2023_v46 }
  0x85   : > { %v1124_v55 = vsel %vm1097_vm0, %v1122_v41, %v1123_v43  ;;  %v1664_v57 = vunpack.c.l.bf16 %v1632_v47  ;;  %v1956_v60 = vpack.c.bf16 %v1924_v51, %v1924_v51  ;;  %v1957_v62 = vpack.c.bf16 %v1925_v36, %v1925_v36 }
  0x86   : > { %3188 = vmatpush.bf16.msra.mxu2 %v2931_v12  ;;  %3189 = vmatpush.bf16.msra.mxu3 %v2931_v12  ;;  %v1665_v59 = vunpack.c.l.bf16 %v1633_v50  ;;  %v4042_v54 = vunpack.c.h.bf16 %v4017_v45  ;;  %v4044_v0 = vunpack.c.l.bf16 %v3140_v53  ;;  %v4046_v1 = vunpack.c.h.bf16 %v3140_v53 }
  0x87   : > { %3187 = vmatpush.bf16.msra.mxu1 %v2931_v12  ;;  %v601_v2 = vmul.f32 %v3925_v16, %v3992_v49  ;;  %2550 = vmatpush.bf16.msra.mxu0 %v2931_v12  ;;  %v1696_v4 = vadd.f32 %v1664_v57, %v1186_v56  ;;  %v2054_v61 = vunpack.c.l.bf16 %v1956_v60  ;;  %v2055_v63 = vunpack.c.l.bf16 %v1957_v62 }
  0x88   : > { %5105 = vst [vmem:[#allocation33_spill] sm:$0xff] %v4042_v54  ;;  %v1697_v5 = vadd.f32 %v1665_v59, %v1124_v55  ;;  %v602_v6 = vmul.f32 %v3927_v17, %v4012_v39  ;;  %v669_v45 = vmul.f32 %v3944_v24, %v4025_v58  ;;  %v670_v13 = vmul.f32 %v3946_v25, %v4042_v54 }
  0x89   : > { %5106 = vst [vmem:[#allocation34_spill] sm:$0xff] %v4044_v0  ;;  %v633_v7 = vpack.c.bf16 %v601_v2, %v601_v2  ;;  %v2118_v14 = vadd.f32 %v2086_v48, %v2054_v61  ;;  %v2119_v19 = vadd.f32 %v2087_v52, %v2055_v63  ;;  %v865_v21 = vmul.f32 %v3964_v33, %v4044_v0 }
  0x8a   : > { %5107 = vst [vmem:[#allocation35_spill] sm:$0xff] %v4046_v1  ;;  %v866_v12 = vmul.f32 %v3966_v34, %v4046_v1  ;;  %v634_v20 = vpack.c.bf16 %v602_v6, %v602_v6  ;;  %v701_v26 = vpack.c.bf16 %v669_v45, %v669_v45  ;;  %v702_v27 = vpack.c.bf16 %v670_v13, %v670_v13  ;;  %v4071_v6 = vld [vmem:[%s5108_s30] ss:$0 sm:$0xff]  ;;  %s502_s30 = scalar_select %p501_p7, 1, 0 }
  0x8b   : > { %v733_v40 = vunpack.c.l.bf16 %v633_v7  ;;  %v2150_v41 = vpack.c.bf16 %v2118_v14, %v2118_v14  ;;  %v2151_v43 = vpack.c.bf16 %v2119_v19, %v2119_v19  ;;  %v897_v44 = vpack.c.bf16 %v865_v21, %v865_v21 }
  0x8c   : > { %v898_v46 = vpack.c.bf16 %v866_v12, %v866_v12  ;;  %v734_v47 = vunpack.c.l.bf16 %v634_v20  ;;  %v765_v50 = vunpack.c.l.bf16 %v701_v26  ;;  %v766_v51 = vunpack.c.l.bf16 %v702_v27  ;;  %s4645_s13 = scvt.s32.f32 %s502_s30 }
  0x8d   : > { %v1220_v36 = vmul.f32 %v3929_v18, %v3992_v49  ;;  %v2182_v53 = vunpack.c.l.bf16 %v2150_v41  ;;  %v2183_v55 = vunpack.c.l.bf16 %v2151_v43  ;;  %v961_v56 = vunpack.c.l.bf16 %v897_v44 }
  0x8e   : > { %v962_v48 = vunpack.c.l.bf16 %v898_v46  ;;  %v797_v52 = vadd.f32 %v765_v50, %v733_v40  ;;  %v798_v57 = vadd.f32 %v766_v51, %v734_v47  ;;  %v1221_v59 = vmul.f32 %v3940_v22, %v4012_v39  ;;  %s506_s15 = sshrl.u32 %s4645_s13, 16  ;;  %p505_p3 = scmp.ne.f32.partialorder %s4645_s13, %s4645_s13 }
  0x8f   : > { %v1252_v60 = vpack.c.bf16 %v1220_v36, %v1220_v36  ;;  %v2255_v62 = vrot.slane %v2182_v53, 1  ;;  %v2256_v2 = vrot.slane %v2183_v55, 1  ;;  %v1286_v61 = vmul.f32 %v3956_v29, %v4025_v58  ;;  %s507_s23 = sand.u32 1, %s506_s15 }
  0x90   : > { %v1287_v63 = vmul.f32 %v3958_v30, %v4042_v54  ;;  %v829_v7 = vpack.c.bf16 %v797_v52, %v797_v52  ;;  %v830_v45 = vpack.c.bf16 %v798_v57, %v798_v57  ;;  %v1253_v13 = vpack.c.bf16 %v1221_v59, %v1221_v59  ;;  %s508_s24 = sadd.s32 32767, %s507_s23 }
  0x91   : > { %v1350_v14 = vunpack.c.l.bf16 %v1252_v60  ;;  %v2257_v19 = vsel %vm2230_vm1, %v2255_v62, %v2256_v2  ;;  %v2319_v21 = vsel %vm2230_vm1, %v2256_v2, 0.0  ;;  %v1318_v12 = vpack.c.bf16 %v1286_v61, %v1286_v61  ;;  %s509_s27 = sadd.s32 %s508_s24, %s4645_s13 }
  0x92   : > { %v1319_v20 = vpack.c.bf16 %v1287_v63, %v1287_v63  ;;  %v2343_v26 = vadd.f32 %v2257_v19, %v1696_v4  ;;  %v2344_v27 = vadd.f32 %v2319_v21, %v1697_v5  ;;  %v929_v40 = vunpack.c.l.bf16 %v829_v7  ;;  %s510_s3 = sand.u32 4294901760, %s509_s27  ;;  %s5146_s27 = sld [smem:[#allocation49_spill]] }
  0x93   : > { %v930_v41 = vunpack.c.l.bf16 %v830_v45  ;;  %v1351_v43 = vunpack.c.l.bf16 %v1253_v13  ;;  %v1382_v44 = vunpack.c.l.bf16 %v1318_v12  ;;  %v1480_v47 = vmul.f32 %v3968_v35, %v4044_v0  ;;  %s5185_s3 = smov (%p505_p3, %s510_s3), 2143289344 }
  0x94   : > { %v1383_v46 = vunpack.c.l.bf16 %v1319_v20  ;;  %v2379_v50 = vadd.f32 %v4071_v6, %v2343_v26  ;;  %v2380_v51 = vadd.f32 %v4071_v6, %v2344_v27  ;;  %v993_v36 = vadd.f32 %v961_v56, %v929_v40  ;;  %s513_s9 = sshrl.u32 %s5185_s3, 16 }
  0x95   : > { %v994_v53 = vadd.f32 %v962_v48, %v930_v41  ;;  %v1414_v55 = vadd.f32 %v1382_v44, %v1350_v14  ;;  %v1481_v4 = vmul.f32 %v3971_v37, %v4046_v1  ;;  %v1512_v5 = vpack.c.bf16 %v1480_v47, %v1480_v47  ;;  %s514_s20 = sshll.u32 %s513_s9, 16 }
  0x96   : > { %v1415_v52 = vadd.f32 %v1383_v46, %v1351_v43  ;;  %v2411_v57 = vmax.f32 %v2379_v50, 0.0  ;;  %v2412_v59 = vmax.f32 %v2380_v51, 0.0  ;;  %v1025_v60 = vpack.c.bf16 %v993_v36, %v993_v36  ;;  %s515_s11 = sor.u32 %s514_s20, %s513_s9 }
  0x97   : > { %v1026_v62 = vpack.c.bf16 %v994_v53, %v994_v53  ;;  %v1446_v2 = vpack.c.bf16 %v1414_v55, %v1414_v55  ;;  %v1513_v63 = vpack.c.bf16 %v1481_v4, %v1481_v4  ;;  %v1576_v7 = vunpack.c.l.bf16 %v1512_v5  ;;  %v3130_v53 = vld [vmem:[%s3866_s18 + $0x18] sm:$0xff]  }
  0x98   : > { %v1447_v61 = vpack.c.bf16 %v1415_v52, %v1415_v52  ;;  %v2443_v45 = vmin.f32 %v2411_v57, 6.0  ;;  %v2444_v13 = vmin.f32 %v2412_v59, 6.0  ;;  %v1057_v19 = vunpack.c.l.bf16 %v1025_v60  ;;  %s5147_s3 = smov %s5146_s27 }
  0x99   : > { %v1058_v56 = vunpack.c.l.bf16 %v1026_v62  ;;  %v1544_v48 = vunpack.c.l.bf16 %v1446_v2  ;;  %v1577_v21 = vunpack.c.l.bf16 %v1513_v63  ;;  %v1738_v12 = vmul.f32 %v3942_v23, %v3992_v49  ;;  %v3131_v2 = vld [vmem:[%s3866_s18 + $0x20] sm:$0xff]  }
  0x9a   : > { %v1545_v14 = vunpack.c.l.bf16 %v1447_v61  ;;  %v2467_v20 = vpack.c.bf16 %v2444_v13, %v2443_v45  ;;  %v1134_v26 = vrot.slane %v1057_v19, 7  ;;  %v1739_v40 = vmul.f32 %v3954_v28, %v4012_v39 }
  0x9b   : > { %v1135_v27 = vrot.slane %v1058_v56, 7  ;;  %v1608_v41 = vadd.f32 %v1576_v7, %v1544_v48  ;;  %v1770_v44 = vpack.c.bf16 %v1738_v12, %v1738_v12  ;;  %v1804_v46 = vmul.f32 %v3960_v31, %v4025_v58 }
  0x9c   : > { %v1609_v43 = vadd.f32 %v1577_v21, %v1545_v14  ;;  %2591 = vmatmul.bf16.vlgmr.msra.gmra.mxu2 %v2467_v20  ;;  %v1190_v50 = vsel %vm1097_vm0, 0.0, %v1134_v26  ;;  %v1771_v51 = vpack.c.bf16 %v1739_v40, %v1739_v40  ;;  %v1805_v36 = vmul.f32 %v3962_v32, %v4042_v54  ;;  %v3132_v14 = vld [vmem:[%s3866_s18 + $0x28] sm:$0xff]  }
  0x9d   : > { %v1136_v47 = vsel %vm1097_vm0, %v1134_v26, %v1135_v27  ;;  %v1640_v55 = vpack.c.bf16 %v1608_v41, %v1608_v41  ;;  %v1836_v4 = vpack.c.bf16 %v1804_v46, %v1804_v46  ;;  %v1868_v5 = vunpack.c.l.bf16 %v1770_v44 }
  0x9e   : > { %v1641_v52 = vpack.c.bf16 %v1609_v43, %v1609_v43  ;;  %v1837_v57 = vpack.c.bf16 %v1805_v36, %v1805_v36  ;;  %v1869_v59 = vunpack.c.l.bf16 %v1771_v51  ;;  %v1998_v60 = vmul.f32 %v3973_v38, %v4044_v0 }
  0x9f   : > { %v1999_v62 = vmul.f32 %v3982_v42, %v4046_v1  ;;  %v1672_v61 = vunpack.c.l.bf16 %v1640_v55  ;;  %v1900_v7 = vunpack.c.l.bf16 %v1836_v4  ;;  %v4100_v45 = vunpack.c.l.bf16 %v3130_v53 }
  0xa0   : > { %v1673_v63 = vunpack.c.l.bf16 %v1641_v52  ;;  %v1901_v13 = vunpack.c.l.bf16 %v1837_v57  ;;  %v2030_v19 = vpack.c.bf16 %v1998_v60, %v1998_v60  ;;  %v4102_v48 = vunpack.c.h.bf16 %v3130_v53 }
  0xa1   : > { %5111 = vst [vmem:[#allocation36_spill] sm:$0xff] %v4100_v45  ;;  %v2031_v56 = vpack.c.bf16 %v1999_v62, %v1999_v62  ;;  %v4107_v21 = vadd.f32 %v1672_v61, %v1190_v50  ;;  %v1932_v20 = vadd.f32 %v1900_v7, %v1868_v5  ;;  %v4111_v26 = vunpack.c.l.bf16 %v3131_v2 }
  0xa2   : > { %5112 = vst [vmem:[#allocation37_spill] sm:$0xff] %v4102_v48  ;;  %v4109_v12 = vadd.f32 %v1673_v63, %v1136_v47  ;;  %v1933_v27 = vadd.f32 %v1901_v13, %v1869_v59  ;;  %v2094_v40 = vunpack.c.l.bf16 %v2030_v19  ;;  %v4113_v43 = vunpack.c.h.bf16 %v3131_v2 }
  0xa3   : > { %5113 = vst [vmem:[#allocation38_spill] sm:$0xff] %v4111_v26  ;;  %v2095_v41 = vunpack.c.l.bf16 %v2031_v56  ;;  %v1964_v44 = vpack.c.bf16 %v1932_v20, %v1932_v20  ;;  %v4115_v46 = vunpack.c.l.bf16 %v3132_v14  ;;  %v4117_v51 = vunpack.c.h.bf16 %v3132_v14 }
  0xa4   : > { %5114 = vst [vmem:[#allocation39_spill] sm:$0xff] %v4113_v43  ;;  %v585_v50 = vmul.f32 %v3925_v16, %v4100_v45  ;;  %v1965_v36 = vpack.c.bf16 %v1933_v27, %v1933_v27  ;;  %v586_v47 = vmul.f32 %v3927_v17, %v4102_v48  ;;  %v653_v53 = vmul.f32 %v3944_v24, %v4111_v26 }
  0xa5   : > { %5115 = vst [vmem:[#allocation40_spill] sm:$0xff] %v4115_v46  ;;  %v654_v55 = vmul.f32 %v3946_v25, %v4113_v43  ;;  %v2062_v52 = vunpack.c.l.bf16 %v1964_v44  ;;  %v849_v5 = vmul.f32 %v3964_v33, %v4115_v46  ;;  %v850_v57 = vmul.f32 %v3966_v34, %v4117_v51 }
  0xa6   : > { %5116 = vst [vmem:[#allocation41_spill] sm:$0xff] %v4117_v51  ;;  %v617_v4 = vpack.c.bf16 %v585_v50, %v585_v50  ;;  %v2063_v59 = vunpack.c.l.bf16 %v1965_v36  ;;  %v618_v60 = vpack.c.bf16 %v586_v47, %v586_v47  ;;  %v685_v62 = vpack.c.bf16 %v653_v53, %v653_v53 }
  0xa7   : > { %v686_v2 = vpack.c.bf16 %v654_v55, %v654_v55  ;;  %v2126_v61 = vadd.f32 %v2094_v40, %v2062_v52  ;;  %v881_v7 = vpack.c.bf16 %v849_v5, %v849_v5  ;;  %v882_v13 = vpack.c.bf16 %v850_v57, %v850_v57 }
  0xa8   : > { %v717_v63 = vunpack.c.l.bf16 %v617_v4  ;;  %v2127_v19 = vadd.f32 %v2095_v41, %v2063_v59  ;;  %v718_v56 = vunpack.c.l.bf16 %v618_v60  ;;  %v749_v14 = vunpack.c.l.bf16 %v685_v62 }
  0xa9   : > { %v750_v20 = vunpack.c.l.bf16 %v686_v2  ;;  %v2158_v27 = vpack.c.bf16 %v2126_v61, %v2126_v61  ;;  %v945_v44 = vunpack.c.l.bf16 %v881_v7  ;;  %v946_v50 = vunpack.c.l.bf16 %v882_v13 }
  0xaa   : > { %v1204_v8 = vmul.f32 %v3929_v18, %v4100_v45  ;;  %v2159_v3 = vpack.c.bf16 %v2127_v19, %v2127_v19  ;;  %v781_v36 = vadd.f32 %v749_v14, %v717_v63  ;;  %v1205_v40 = vmul.f32 %v3940_v22, %v4102_v48 }
  0xab   : > { %v782_v47 = vadd.f32 %v750_v20, %v718_v56  ;;  %v2190_v53 = vunpack.c.l.bf16 %v2158_v27  ;;  %v1270_v41 = vmul.f32 %v3956_v29, %v4111_v26  ;;  %v1271_v52 = vmul.f32 %v3958_v30, %v4113_v43 }
  0xac   : > { %v1236_v55 = vpack.c.bf16 %v1204_v8, %v1204_v8  ;;  %v2191_v4 = vunpack.c.l.bf16 %v2159_v3  ;;  %v813_v5 = vpack.c.bf16 %v781_v36, %v781_v36  ;;  %v1237_v59 = vpack.c.bf16 %v1205_v40, %v1205_v40 }
  0xad   : > { %v814_v57 = vpack.c.bf16 %v782_v47, %v782_v47  ;;  %v2267_v60 = vrot.slane %v2190_v53, 1  ;;  %v1302_v62 = vpack.c.bf16 %v1270_v41, %v1270_v41  ;;  %v1303_v2 = vpack.c.bf16 %v1271_v52, %v1271_v52 }
  0xae   : > { %v1334_v61 = vunpack.c.l.bf16 %v1236_v55  ;;  %v2268_v63 = vrot.slane %v2191_v4, 1  ;;  %v913_v7 = vunpack.c.l.bf16 %v813_v5  ;;  %v1335_v8 = vunpack.c.l.bf16 %v1237_v59 }
  0xaf   : > { %v914_v13 = vunpack.c.l.bf16 %v814_v57  ;;  %v1366_v19 = vunpack.c.l.bf16 %v1302_v62  ;;  %v1367_v56 = vunpack.c.l.bf16 %v1303_v2  ;;  %v1464_v14 = vmul.f32 %v3968_v35, %v4115_v46 }
  0xb0   : > { %v1465_v3 = vmul.f32 %v3971_v37, %v4117_v51  ;;  %v2269_v20 = vsel %vm2230_vm1, %v2267_v60, %v2268_v63  ;;  %v2323_v27 = vsel %vm2230_vm1, %v2268_v63, 0.0  ;;  %v977_v36 = vadd.f32 %v945_v44, %v913_v7 }
  0xb1   : > { %v978_v47 = vadd.f32 %v946_v50, %v914_v13  ;;  %v2351_v40 = vadd.f32 %v2269_v20, %v4107_v21  ;;  %v2352_v53 = vadd.f32 %v2323_v27, %v4109_v12  ;;  %v1398_v55 = vadd.f32 %v1366_v19, %v1334_v61 }
  0xb2   : > { %v1399_v41 = vadd.f32 %v1367_v56, %v1335_v8  ;;  %v1009_v52 = vpack.c.bf16 %v977_v36, %v977_v36  ;;  %v1496_v5 = vpack.c.bf16 %v1464_v14, %v1464_v14  ;;  %v1497_v57 = vpack.c.bf16 %v1465_v3, %v1465_v3 }
  0xb3   : > { %v1010_v4 = vpack.c.bf16 %v978_v47, %v978_v47  ;;  %v2387_v59 = vadd.f32 %v4071_v6, %v2351_v40  ;;  %v2388_v60 = vadd.f32 %v4071_v6, %v2352_v53  ;;  %v1430_v62 = vpack.c.bf16 %v1398_v55, %v1398_v55 }
  0xb4   : > { %v1431_v2 = vpack.c.bf16 %v1399_v41, %v1399_v41  ;;  %v1041_v44 = vunpack.c.l.bf16 %v1009_v52  ;;  %v1560_v50 = vunpack.c.l.bf16 %v1496_v5  ;;  %v1561_v12 = vunpack.c.l.bf16 %v1497_v57  ;;  %v2941_v57 = vld [vmem:[%s3866_s18] sm:$0xff]  }
  0xb5   : > { %v1042_v21 = vunpack.c.l.bf16 %v1010_v4  ;;  %v2419_v61 = vmax.f32 %v2387_v59, 0.0  ;;  %v2420_v63 = vmax.f32 %v2388_v60, 0.0  ;;  %v1528_v7 = vunpack.c.l.bf16 %v1430_v62 }
  0xb6   : > { %v1529_v13 = vunpack.c.l.bf16 %v1431_v2  ;;  %v1110_v8 = vrot.slane %v1041_v44, 7  ;;  %v1722_v56 = vmul.f32 %v3942_v23, %v4100_v45  ;;  %v1723_v14 = vmul.f32 %v3954_v28, %v4102_v48 }
  0xb7   : > { %v1111_v19 = vrot.slane %v1042_v21, 7  ;;  %v2451_v3 = vmin.f32 %v2419_v61, 6.0  ;;  %v2452_v20 = vmin.f32 %v2420_v63, 6.0  ;;  %v1592_v27 = vadd.f32 %v1560_v50, %v1528_v7  ;;  %v3128_v61 = vld [vmem:[%s3866_s18 + $0x8] sm:$0xff]  }
  0xb8   : > { %v1593_v36 = vadd.f32 %v1561_v12, %v1529_v13  ;;  %v1182_v40 = vsel %vm1097_vm0, 0.0, %v1110_v8  ;;  %v1754_v53 = vpack.c.bf16 %v1722_v56, %v1722_v56  ;;  %v1755_v55 = vpack.c.bf16 %v1723_v14, %v1723_v14 }
  0xb9   : > { %v1112_v47 = vsel %vm1097_vm0, %v1110_v8, %v1111_v19  ;;  %v2471_v41 = vpack.c.bf16 %v2452_v20, %v2451_v3  ;;  %v1624_v52 = vpack.c.bf16 %v1592_v27, %v1592_v27  ;;  %v1788_v5 = vmul.f32 %v3960_v31, %v4111_v26  ;;  %v3005_v19 = vld [vmem:[%s379_s29] sm:$0xff]   ;;  %s5144_s29 = sld [smem:[#allocation48_spill]] }
  0xba   : > { %v1625_v4 = vpack.c.bf16 %v1593_v36, %v1593_v36  ;;  %v1789_v59 = vmul.f32 %v3962_v32, %v4113_v43  ;;  %v1852_v60 = vunpack.c.l.bf16 %v1754_v53  ;;  %v1853_v62 = vunpack.c.l.bf16 %v1755_v55 }
  0xbb   : > { %v1982_v2 = vmul.f32 %v3973_v38, %v4115_v46  ;;  %2611 = vmatmul.bf16.vlgmr.msra.gmra.mxu3 %v2471_v41  ;;  %v1656_v44 = vunpack.c.l.bf16 %v1624_v52  ;;  %v1820_v50 = vpack.c.bf16 %v1788_v5, %v1788_v5  ;;  %v1983_v12 = vmul.f32 %v3982_v42, %v4117_v51 }
  0xbc   : > { %v1657_v21 = vunpack.c.l.bf16 %v1625_v4  ;;  %v1821_v63 = vpack.c.bf16 %v1789_v59, %v1789_v59  ;;  %v4177_v13 = vunpack.c.l.bf16 %v2941_v57  ;;  %v4179_v8 = vunpack.c.h.bf16 %v2941_v57 }
  0xbd   : > { %v2014_v7 = vpack.c.bf16 %v1982_v2, %v1982_v2  ;;  %v4183_v56 = vadd.f32 %v1656_v44, %v1182_v40  ;;  %v1884_v3 = vunpack.c.l.bf16 %v1820_v50  ;;  %v2015_v20 = vpack.c.bf16 %v1983_v12, %v1983_v12 }
  0xbe   : > { %v4185_v14 = vadd.f32 %v1657_v21, %v1112_v47  ;;  %v1885_v27 = vunpack.c.l.bf16 %v1821_v63  ;;  %v4189_v53 = vunpack.c.l.bf16 %v3128_v61  ;;  %v4191_v55 = vunpack.c.h.bf16 %v3128_v61 }
  0xbf   : > { %v2078_v36 = vunpack.c.l.bf16 %v2014_v7  ;;  %v1916_v41 = vadd.f32 %v1884_v3, %v1852_v60  ;;  %v2079_v52 = vunpack.c.l.bf16 %v2015_v20  ;;  %v3006_v4 = vunpack.c.l.bf16 %v3005_v19 }
  0xc0   : > { %v3007_v5 = vunpack.c.h.bf16 %v3005_v19  ;;  %v1917_v57 = vadd.f32 %v1885_v27, %v1853_v62  ;;  %v492_v59 = vstv %s491_s1  ;;  %v645_v47 = vmul.f32 %v3944_v24, %v4177_v13 }
  0xc1   : > { %v646_v40 = vmul.f32 %v3946_v25, %v4179_v8  ;;  %v1948_v2 = vpack.c.bf16 %v1916_v41, %v1916_v41  ;;  %v496_v44 = vunpack.c.l.bf16 %v492_v59  ;;  %v841_v21 = vmul.f32 %v3964_v33, %v4189_v53 }
  0xc2   : > { %v842_v50 = vmul.f32 %v3966_v34, %v4191_v55  ;;  %v1949_v60 = vpack.c.bf16 %v1917_v57, %v1917_v57  ;;  %v677_v12 = vpack.c.bf16 %v645_v47, %v645_v47  ;;  %v1262_v62 = vmul.f32 %v3956_v29, %v4177_v13 }
  0xc3   : > { %v678_v61 = vpack.c.bf16 %v646_v40, %v646_v40  ;;  %v2046_v63 = vunpack.c.l.bf16 %v1948_v2  ;;  %v497_v7 = vmul.f32 %v3006_v4, %v496_v44  ;;  %v498_v19 = vmul.f32 %v3007_v5, %v496_v44 }
  0xc4   : > { %v873_v3 = vpack.c.bf16 %v841_v21, %v841_v21  ;;  %v2047_v20 = vunpack.c.l.bf16 %v1949_v60  ;;  %v741_v27 = vunpack.c.l.bf16 %v677_v12  ;;  %v874_v59 = vpack.c.bf16 %v842_v50, %v842_v50 }
  0xc5   : > { %v742_v41 = vunpack.c.l.bf16 %v678_v61  ;;  %v2110_v48 = vadd.f32 %v2078_v36, %v2046_v63  ;;  %v499_v45 = vpack.c.bf16 %v497_v7, %v497_v7  ;;  %v500_v39 = vpack.c.bf16 %v498_v19, %v498_v19 }
  0xc6   : > { %v4203_v49 = vunpack.c.l.bf16 %v873_v3  ;;  %v2111_v51 = vadd.f32 %v2079_v52, %v2047_v20  ;;  %v938_v57 = vunpack.c.l.bf16 %v874_v59  ;;  %v1263_v47 = vmul.f32 %v3958_v30, %v4179_v8 }
  0xc7   : > { %v1294_v40 = vpack.c.bf16 %v1262_v62, %v1262_v62  ;;  %v2142_v46 = vpack.c.bf16 %v2110_v48, %v2110_v48  ;;  %v543_v2 = vunpack.c.l.bf16 %v499_v45  ;;  %v544_v4 = vunpack.c.l.bf16 %v500_v39 }
  0xc8   : > { %v1456_v5 = vmul.f32 %v3968_v35, %v4189_v53  ;;  %v2143_v44 = vpack.c.bf16 %v2111_v51, %v2111_v51  ;;  %v1295_v21 = vpack.c.bf16 %v1263_v47, %v1263_v47  ;;  %v1457_v36 = vmul.f32 %v3971_v37, %v4191_v55 }
  0xc9   : > { %v1358_v50 = vunpack.c.l.bf16 %v1294_v40  ;;  %v2174_v60 = vunpack.c.l.bf16 %v2142_v46  ;;  %v577_v52 = vmul.f32 %v3925_v16, %v543_v2  ;;  %v578_v12 = vmul.f32 %v3927_v17, %v544_v4 }
  0xca   : > { %v1196_v61 = vmul.f32 %v3929_v18, %v543_v2  ;;  %v2175_v62 = vunpack.c.l.bf16 %v2143_v44  ;;  %v1197_v45 = vmul.f32 %v3940_v22, %v544_v4  ;;  %v1359_v39 = vunpack.c.l.bf16 %v1295_v21 }
  0xcb   : > { %v1488_v48 = vpack.c.bf16 %v1456_v5, %v1456_v5  ;;  %v2243_v63 = vrot.slane %v2174_v60, 1  ;;  %v609_v7 = vpack.c.bf16 %v577_v52, %v577_v52  ;;  %v610_v51 = vpack.c.bf16 %v578_v12, %v578_v12 }
  0xcc   : > { %v1228_v19 = vpack.c.bf16 %v1196_v61, %v1196_v61  ;;  %v2244_v3 = vrot.slane %v2175_v62, 1  ;;  %v1229_v20 = vpack.c.bf16 %v1197_v45, %v1197_v45  ;;  %v1489_v59 = vpack.c.bf16 %v1457_v36, %v1457_v36 }
  0xcd   : > { %v1552_v47 = vunpack.c.l.bf16 %v1488_v48  ;;  %v709_v46 = vunpack.c.l.bf16 %v609_v7  ;;  %v710_v40 = vunpack.c.l.bf16 %v610_v51  ;;  %v1714_v26 = vmul.f32 %v3942_v23, %v543_v2 }
  0xce   : > { %v1326_v43 = vunpack.c.l.bf16 %v1228_v19  ;;  %v2245_v1 = vsel %vm2230_vm1, %v2243_v63, %v2244_v3  ;;  %v2315_v44 = vsel %vm2230_vm1, %v2244_v3, 0.0  ;;  %v1327_v0 = vunpack.c.l.bf16 %v1229_v20 }
  0xcf   : > { %v1553_v21 = vunpack.c.l.bf16 %v1489_v59  ;;  %v2335_v5 = vadd.f32 %v2245_v1, %v4183_v56  ;;  %v2336_v60 = vadd.f32 %v2315_v44, %v4185_v14  ;;  %v773_v52 = vadd.f32 %v741_v27, %v709_v46 }
  0xd0   : > { %v774_v12 = vadd.f32 %v742_v41, %v710_v40  ;;  %v1390_v61 = vadd.f32 %v1358_v50, %v1326_v43  ;;  %v1391_v36 = vadd.f32 %v1359_v39, %v1327_v0  ;;  %v1715_v62 = vmul.f32 %v3954_v28, %v544_v4 }
  0xd1   : > { %v1746_v45 = vpack.c.bf16 %v1714_v26, %v1714_v26  ;;  %v2371_v48 = vadd.f32 %v4071_v6, %v2335_v5  ;;  %v2372_v2 = vadd.f32 %v4071_v6, %v2336_v60  ;;  %v805_v63 = vpack.c.bf16 %v773_v52, %v773_v52 }
  0xd2   : > { %v806_v7 = vpack.c.bf16 %v774_v12, %v774_v12  ;;  %v1422_v51 = vpack.c.bf16 %v1390_v61, %v1390_v61  ;;  %v1423_v19 = vpack.c.bf16 %v1391_v36, %v1391_v36  ;;  %v1747_v3 = vpack.c.bf16 %v1715_v62, %v1715_v62 }
  0xd3   : > { %v1780_v1 = vmul.f32 %v3960_v31, %v4177_v13  ;;  %v2403_v56 = vmax.f32 %v2371_v48, 0.0  ;;  %v2404_v14 = vmax.f32 %v2372_v2, 0.0  ;;  %v905_v27 = vunpack.c.l.bf16 %v805_v63 }
  0xd4   : > { %v906_v43 = vunpack.c.l.bf16 %v806_v7  ;;  %v1520_v0 = vunpack.c.l.bf16 %v1422_v51  ;;  %v1521_v41 = vunpack.c.l.bf16 %v1423_v19  ;;  %v1781_v26 = vmul.f32 %v3962_v32, %v4179_v8 }
  0xd5   : > { %v1812_v4 = vpack.c.bf16 %v1780_v1, %v1780_v1  ;;  %v2435_v50 = vmin.f32 %v2403_v56, 6.0  ;;  %v2436_v39 = vmin.f32 %v2404_v14, 6.0  ;;  %v969_v20 = vadd.f32 %v4203_v49, %v905_v27 }
  0xd6   : > { %v970_v59 = vadd.f32 %v938_v57, %v906_v43  ;;  %v1584_v46 = vadd.f32 %v1552_v47, %v1520_v0  ;;  %v1585_v40 = vadd.f32 %v1553_v21, %v1521_v41  ;;  %v1813_v44 = vpack.c.bf16 %v1781_v26, %v1781_v26  ;;  %v3137_v47 = vld [vmem:[%s3866_s18 + $0x50] sm:$0xff]  }
  0xd7   : > { %v1844_v5 = vunpack.c.l.bf16 %v1746_v45  ;;  %v2463_v60 = vpack.c.bf16 %v2436_v39, %v2435_v50  ;;  %v1001_v52 = vpack.c.bf16 %v969_v20, %v969_v20  ;;  %v1845_v61 = vunpack.c.l.bf16 %v1747_v3 }
  0xd8   : > { %v1002_v12 = vpack.c.bf16 %v970_v59, %v970_v59  ;;  %v1616_v36 = vpack.c.bf16 %v1584_v46, %v1584_v46  ;;  %v1617_v62 = vpack.c.bf16 %v1585_v40, %v1585_v40  ;;  %v1876_v48 = vunpack.c.l.bf16 %v1812_v4 }
  0xd9   : > { %v1877_v2 = vunpack.c.l.bf16 %v1813_v44  ;;  %2571 = vmatmul.bf16.vlgmr.msra.gmra.mxu1 %v2463_v60  ;;  %v1033_v63 = vunpack.c.l.bf16 %v1001_v52  ;;  %v1974_v49 = vmul.f32 %v3973_v38, %v4189_v53  ;;  %v1975_v57 = vmul.f32 %v3982_v42, %v4191_v55 }
  0xda   : > { %v1034_v7 = vunpack.c.l.bf16 %v1002_v12  ;;  %v1648_v21 = vunpack.c.l.bf16 %v1616_v36  ;;  %v1649_v45 = vunpack.c.l.bf16 %v1617_v62  ;;  %v1908_v51 = vadd.f32 %v1876_v48, %v1844_v5 }
  0xdb   : > { %v1909_v19 = vadd.f32 %v1877_v2, %v1845_v61  ;;  %v1098_v1 = vrot.slane %v1033_v63, 7  ;;  %v2006_v56 = vpack.c.bf16 %v1974_v49, %v1974_v49  ;;  %v2007_v14 = vpack.c.bf16 %v1975_v57, %v1975_v57 }
  0xdc   : > { %v1099_v3 = vrot.slane %v1034_v7, 7  ;;  %v1940_v27 = vpack.c.bf16 %v1908_v51, %v1908_v51  ;;  %v4233_v0 = vunpack.c.l.bf16 %v3137_v47  ;;  %v4235_v41 = vunpack.c.h.bf16 %v3137_v47 }
  0xdd   : > { %v1941_v43 = vpack.c.bf16 %v1909_v19, %v1909_v19  ;;  %v1178_v4 = vsel %vm1097_vm0, 0.0, %v1098_v1  ;;  %v2070_v50 = vunpack.c.l.bf16 %v2006_v56  ;;  %v2071_v39 = vunpack.c.l.bf16 %v2007_v14 }
  0xde   : > { %v1100_v26 = vsel %vm1097_vm0, %v1098_v1, %v1099_v3  ;;  %v1680_v20 = vadd.f32 %v1648_v21, %v1178_v4  ;;  %v2038_v46 = vunpack.c.l.bf16 %v1940_v27  ;;  %v595_v44 = vmul.f32 %v3925_v16, %v3908_v9 }
  0xdf   : > { %v1681_v59 = vadd.f32 %v1649_v45, %v1100_v26  ;;  %v2039_v40 = vunpack.c.l.bf16 %v1941_v43  ;;  %v596_v5 = vmul.f32 %v3927_v17, %v3910_v10  ;;  %v663_v60 = vmul.f32 %v3944_v24, %v3912_v11 }
  0xe0   : > { %v664_v52 = vmul.f32 %v3946_v25, %v3923_v15  ;;  %v2102_v12 = vadd.f32 %v2070_v50, %v2038_v46  ;;  %v859_v36 = vmul.f32 %v3964_v33, %v4233_v0  ;;  %v860_v62 = vmul.f32 %v3966_v34, %v4235_v41 }
  0xe1   : > { %v2103_v61 = vadd.f32 %v2071_v39, %v2039_v40  ;;  %v627_v48 = vpack.c.bf16 %v595_v44, %v595_v44  ;;  %v628_v2 = vpack.c.bf16 %v596_v5, %v596_v5  ;;  %v695_v63 = vpack.c.bf16 %v663_v60, %v663_v60 }
  0xe2   : > { %v696_v7 = vpack.c.bf16 %v664_v52, %v664_v52  ;;  %v2134_v49 = vpack.c.bf16 %v2102_v12, %v2102_v12  ;;  %v891_v47 = vpack.c.bf16 %v859_v36, %v859_v36  ;;  %v892_v21 = vpack.c.bf16 %v860_v62, %v860_v62 }
  0xe3   : > { %v2135_v57 = vpack.c.bf16 %v2103_v61, %v2103_v61  ;;  %v727_v45 = vunpack.c.l.bf16 %v627_v48  ;;  %v728_v51 = vunpack.c.l.bf16 %v628_v2  ;;  %v759_v19 = vunpack.c.l.bf16 %v695_v63 }
  0xe4   : > { %v760_v1 = vunpack.c.l.bf16 %v696_v7  ;;  %v2166_v3 = vunpack.c.l.bf16 %v2134_v49  ;;  %v955_v14 = vunpack.c.l.bf16 %v891_v47  ;;  %v956_v27 = vunpack.c.l.bf16 %v892_v21 }
  0xe5   : > { %v2167_v56 = vunpack.c.l.bf16 %v2135_v57  ;;  %v791_v43 = vadd.f32 %v759_v19, %v727_v45  ;;  %v1214_v4 = vmul.f32 %v3929_v18, %v3908_v9  ;;  %v1215_v50 = vmul.f32 %v3940_v22, %v3910_v10 }
  0xe6   : > { %v792_v26 = vadd.f32 %v760_v1, %v728_v51  ;;  %v2231_v39 = vrot.slane %v2166_v3, 1  ;;  %v1280_v40 = vmul.f32 %v3956_v29, %v3912_v11  ;;  %v1281_v44 = vmul.f32 %v3958_v30, %v3923_v15 }
  0xe7   : > { %v2232_v46 = vrot.slane %v2167_v56, 1  ;;  %v823_v5 = vpack.c.bf16 %v791_v43, %v791_v43  ;;  %v1246_v52 = vpack.c.bf16 %v1214_v4, %v1214_v4  ;;  %v1247_v12 = vpack.c.bf16 %v1215_v50, %v1215_v50 }
  0xe8   : > { %v824_v60 = vpack.c.bf16 %v792_v26, %v792_v26  ;;  %v1312_v62 = vpack.c.bf16 %v1280_v40, %v1280_v40  ;;  %v1313_v48 = vpack.c.bf16 %v1281_v44, %v1281_v44  ;;  %v1474_v26 = vmul.f32 %v3968_v35, %v4233_v0 }
  0xe9   : > { %v2233_v61 = vsel %vm2230_vm1, %v2231_v39, %v2232_v46  ;;  %v2311_v36 = vsel %vm2230_vm1, %v2232_v46, 0.0  ;;  %v923_v7 = vunpack.c.l.bf16 %v823_v5  ;;  %v1344_v57 = vunpack.c.l.bf16 %v1246_v52 }
  0xea   : > { %v2327_v2 = vadd.f32 %v2233_v61, %v1680_v20  ;;  %v2328_v63 = vadd.f32 %v2311_v36, %v1681_v59  ;;  %v924_v49 = vunpack.c.l.bf16 %v824_v60  ;;  %v1345_v47 = vunpack.c.l.bf16 %v1247_v12 }
  0xeb   : > { %v1376_v21 = vunpack.c.l.bf16 %v1312_v62  ;;  %v1377_v45 = vunpack.c.l.bf16 %v1313_v48  ;;  %v987_v1 = vadd.f32 %v955_v14, %v923_v7  ;;  %v1475_v20 = vmul.f32 %v3971_v37, %v4235_v41 }
  0xec   : > { %v2363_v51 = vadd.f32 %v4071_v6, %v2327_v2  ;;  %v2364_v19 = vadd.f32 %v4071_v6, %v2328_v63  ;;  %v988_v3 = vadd.f32 %v956_v27, %v924_v49  ;;  %v1506_v44 = vpack.c.bf16 %v1474_v26, %v1474_v26  ;;  %v3141_v26 = vld [vmem:[%s3866_s18 + $0x70] sm:$0xff]  }
  0xed   : > { %v1408_v56 = vadd.f32 %v1376_v21, %v1344_v57  ;;  %v1409_v43 = vadd.f32 %v1377_v45, %v1345_v47  ;;  %v1019_v50 = vpack.c.bf16 %v987_v1, %v987_v1  ;;  %v1507_v5 = vpack.c.bf16 %v1475_v20, %v1475_v20 }
  0xee   : > { %v2395_v59 = vmax.f32 %v2363_v51, 0.0  ;;  %v2396_v4 = vmax.f32 %v2364_v19, 0.0  ;;  %v1020_v39 = vpack.c.bf16 %v988_v3, %v988_v3  ;;  %v1570_v61 = vunpack.c.l.bf16 %v1506_v44 }
  0xef   : > { %v1440_v46 = vpack.c.bf16 %v1408_v56, %v1408_v56  ;;  %v1441_v40 = vpack.c.bf16 %v1409_v43, %v1409_v43  ;;  %v1051_v14 = vunpack.c.l.bf16 %v1019_v50  ;;  %v1571_v36 = vunpack.c.l.bf16 %v1507_v5 }
  0xf0   : > { %v2427_v60 = vmin.f32 %v2395_v59, 6.0  ;;  %v2428_v6 = vmin.f32 %v2396_v4, 6.0  ;;  %v1052_v27 = vunpack.c.l.bf16 %v1020_v39  ;;  %v1732_v63 = vmul.f32 %v3942_v23, %v3908_v9 }
  0xf1   : > { %v1538_v52 = vunpack.c.l.bf16 %v1440_v46  ;;  %v1539_v12 = vunpack.c.l.bf16 %v1441_v40  ;;  %v1125_v48 = vrot.slane %v1051_v14, 7  ;;  %v1733_v57 = vmul.f32 %v3954_v28, %v3910_v10 }
  0xf2   : > { %v2459_v62 = vpack.c.bf16 %v2428_v6, %v2427_v60  ;;  %v1126_v2 = vrot.slane %v1052_v27, 7  ;;  %v1798_v47 = vmul.f32 %v3960_v31, %v3912_v11  ;;  %v1764_v51 = vpack.c.bf16 %v1732_v63, %v1732_v63 }
  0xf3   : > { %v1602_v7 = vadd.f32 %v1570_v61, %v1538_v52  ;;  %v1603_v49 = vadd.f32 %v1571_v36, %v1539_v12  ;;  %v1187_v45 = vsel %vm1097_vm0, 0.0, %v1125_v48  ;;  %v1799_v19 = vmul.f32 %v3962_v32, %v3923_v15 }
  0xf4   : > { %2551 = vmatmul.bf16.vlgmr.msra.gmra.mxu0 %v2459_v62  ;;  %v1127_v21 = vsel %vm1097_vm0, %v1125_v48, %v1126_v2  ;;  %v1765_v56 = vpack.c.bf16 %v1733_v57, %v1733_v57  ;;  %v1830_v43 = vpack.c.bf16 %v1798_v47, %v1798_v47  ;;  %v1862_v59 = vunpack.c.l.bf16 %v1764_v51  ;;  %v5119_v47 = vld [vmem:[#allocation35_spill] sm:$0xff] }
  0xf5   : > { %v1634_v1 = vpack.c.bf16 %v1602_v7, %v1602_v7  ;;  %v1635_v3 = vpack.c.bf16 %v1603_v49, %v1603_v49  ;;  %v1831_v20 = vpack.c.bf16 %v1799_v19, %v1799_v19  ;;  %v1992_v4 = vmul.f32 %v3973_v38, %v4233_v0  ;;  %v5118_v49 = vld [vmem:[#allocation34_spill] sm:$0xff] }
  0xf6   : > { %v1993_v50 = vmul.f32 %v3982_v42, %v4235_v41  ;;  %v1863_v40 = vunpack.c.l.bf16 %v1765_v56  ;;  %v1894_v44 = vunpack.c.l.bf16 %v1830_v43  ;;  %v4282_v14 = vunpack.c.l.bf16 %v3141_v26 }
  0xf7   : > { %v1666_v39 = vunpack.c.l.bf16 %v1634_v1  ;;  %v1667_v46 = vunpack.c.l.bf16 %v1635_v3  ;;  %v1895_v5 = vunpack.c.l.bf16 %v1831_v20  ;;  %v2024_v60 = vpack.c.bf16 %v1992_v4, %v1992_v4 }
  0xf8   : > { %v2025_v6 = vpack.c.bf16 %v1993_v50, %v1993_v50  ;;  %v1926_v12 = vadd.f32 %v1894_v44, %v1862_v59  ;;  %v4288_v61 = vunpack.c.h.bf16 %v3141_v26  ;;  %v603_v2 = vmul.f32 %v3925_v16, %v4025_v58 }
  0xf9   : > { %v4284_v27 = vadd.f32 %v1666_v39, %v1187_v45  ;;  %v4286_v52 = vadd.f32 %v1667_v46, %v1127_v21  ;;  %v1927_v36 = vadd.f32 %v1895_v5, %v1863_v40  ;;  %v2088_v62 = vunpack.c.l.bf16 %v2024_v60 }
  0xfa   : > { %5117 = vst [vmem:[#allocation42_spill] sm:$0xff] %v4288_v61  ;;  %v2089_v48 = vunpack.c.l.bf16 %v2025_v6  ;;  %v1958_v63 = vpack.c.bf16 %v1926_v12, %v1926_v12  ;;  %v604_v7 = vmul.f32 %v3927_v17, %v4042_v54  ;;  %v671_v57 = vmul.f32 %v3944_v24, %v5118_v49 }
  0xfb   : > { %v672_v21 = vmul.f32 %v3946_v25, %v5119_v47  ;;  %v1959_v45 = vpack.c.bf16 %v1927_v36, %v1927_v36  ;;  %v635_v51 = vpack.c.bf16 %v603_v2, %v603_v2  ;;  %v867_v19 = vmul.f32 %v3964_v33, %v4282_v14 }
  0xfc   : > { %v868_v1 = vmul.f32 %v3966_v34, %v4288_v61  ;;  %v2056_v3 = vunpack.c.l.bf16 %v1958_v63  ;;  %v636_v56 = vpack.c.bf16 %v604_v7, %v604_v7  ;;  %v703_v43 = vpack.c.bf16 %v671_v57, %v671_v57 }
  0xfd   : > { %v704_v26 = vpack.c.bf16 %v672_v21, %v672_v21  ;;  %v2057_v20 = vunpack.c.l.bf16 %v1959_v45  ;;  %v735_v59 = vunpack.c.l.bf16 %v635_v51  ;;  %v899_v4 = vpack.c.bf16 %v867_v19, %v867_v19 }
  0xfe   : > { %v900_v50 = vpack.c.bf16 %v868_v1, %v868_v1  ;;  %v2120_v39 = vadd.f32 %v2088_v62, %v2056_v3  ;;  %v736_v46 = vunpack.c.l.bf16 %v636_v56  ;;  %v767_v40 = vunpack.c.l.bf16 %v703_v43 }
  0xff   : > { %v768_v44 = vunpack.c.l.bf16 %v704_v26  ;;  %v2121_v5 = vadd.f32 %v2089_v48, %v2057_v20  ;;  %v963_v60 = vunpack.c.l.bf16 %v899_v4  ;;  %v1222_v12 = vmul.f32 %v3929_v18, %v4025_v58 }
 0x100   : > { %v964_v6 = vunpack.c.l.bf16 %v900_v50  ;;  %v2152_v36 = vpack.c.bf16 %v2120_v39, %v2120_v39  ;;  %v799_v2 = vadd.f32 %v767_v40, %v735_v59  ;;  %v1223_v7 = vmul.f32 %v3940_v22, %v4042_v54 }
 0x101   : > { %v800_v63 = vadd.f32 %v768_v44, %v736_v46  ;;  %v2153_v57 = vpack.c.bf16 %v2121_v5, %v2121_v5  ;;  %v1254_v21 = vpack.c.bf16 %v1222_v12, %v1222_v12  ;;  %v1288_v62 = vmul.f32 %v3956_v29, %v5118_v49 }
 0x102   : > { %v1289_v45 = vmul.f32 %v3958_v30, %v5119_v47  ;;  %v2184_v48 = vunpack.c.l.bf16 %v2152_v36  ;;  %v831_v51 = vpack.c.bf16 %v799_v2, %v799_v2  ;;  %v1255_v1 = vpack.c.bf16 %v1223_v7, %v1223_v7 }
 0x103   : > { %v832_v19 = vpack.c.bf16 %v800_v63, %v800_v63  ;;  %v2185_v3 = vunpack.c.l.bf16 %v2153_v57  ;;  %v1320_v56 = vpack.c.bf16 %v1288_v62, %v1288_v62  ;;  %v1352_v26 = vunpack.c.l.bf16 %v1254_v21 }
 0x104   : > { %v1321_v43 = vpack.c.bf16 %v1289_v45, %v1289_v45  ;;  %v2258_v20 = vrot.slane %v2184_v48, 1  ;;  %v931_v59 = vunpack.c.l.bf16 %v831_v51  ;;  %v1353_v50 = vunpack.c.l.bf16 %v1255_v1 }
 0x105   : > { %v932_v4 = vunpack.c.l.bf16 %v832_v19  ;;  %v2259_v39 = vrot.slane %v2185_v3, 1  ;;  %v1384_v46 = vunpack.c.l.bf16 %v1320_v56  ;;  %v1482_v44 = vmul.f32 %v3968_v35, %v4282_v14  ;;  %v4323_v3 = vld [vmem:[%s5109_s19] ss:$0 sm:$0xff] }
 0x106   : > { %v1385_v40 = vunpack.c.l.bf16 %v1321_v43  ;;  %v995_v5 = vadd.f32 %v963_v60, %v931_v59  ;;  %v1483_v36 = vmul.f32 %v3971_v37, %v4288_v61  ;;  %v1740_v2 = vmul.f32 %v3942_v23, %v4025_v58 }
 0x107   : > { %v996_v12 = vadd.f32 %v964_v6, %v932_v4  ;;  %v2260_v63 = vsel %vm2230_vm1, %v2258_v20, %v2259_v39  ;;  %v2320_v7 = vsel %vm2230_vm1, %v2259_v39, 0.0  ;;  %v1416_v57 = vadd.f32 %v1384_v46, %v1352_v26 }
 0x108   : > { %v1417_v21 = vadd.f32 %v1385_v40, %v1353_v50  ;;  %v2345_v62 = vadd.f32 %v2260_v63, %v4284_v27  ;;  %v2346_v45 = vadd.f32 %v2320_v7, %v4286_v52  ;;  %v1027_v48 = vpack.c.bf16 %v995_v5, %v995_v5 }
 0x109   : > { %v1028_v51 = vpack.c.bf16 %v996_v12, %v996_v12  ;;  %v1448_v60 = vpack.c.bf16 %v1416_v57, %v1416_v57  ;;  %v1514_v19 = vpack.c.bf16 %v1482_v44, %v1482_v44  ;;  %v1515_v1 = vpack.c.bf16 %v1483_v36, %v1483_v36 }
 0x10a   : > { %v1449_v6 = vpack.c.bf16 %v1417_v21, %v1417_v21  ;;  %v2381_v56 = vadd.f32 %v4323_v3, %v2345_v62  ;;  %v2382_v43 = vadd.f32 %v4323_v3, %v2346_v45  ;;  %v1059_v26 = vunpack.c.l.bf16 %v1027_v48 }
 0x10b   : > { %v1060_v20 = vunpack.c.l.bf16 %v1028_v51  ;;  %v1546_v27 = vunpack.c.l.bf16 %v1448_v60  ;;  %v1578_v52 = vunpack.c.l.bf16 %v1514_v19  ;;  %v1579_v4 = vunpack.c.l.bf16 %v1515_v1  ;;  %v3133_v60 = vld [vmem:[%s3866_s18 + $0x30] sm:$0xff]  }
 0x10c   : > { %v1547_v59 = vunpack.c.l.bf16 %v1449_v6  ;;  %v2413_v50 = vmax.f32 %v2381_v56, 0.0  ;;  %v2414_v39 = vmax.f32 %v2382_v43, 0.0  ;;  %v1137_v46 = vrot.slane %v1059_v26, 7 }
 0x10d   : > { %v1138_v40 = vrot.slane %v1060_v20, 7  ;;  %v1610_v44 = vadd.f32 %v1578_v52, %v1546_v27  ;;  %v1741_v12 = vmul.f32 %v3954_v28, %v4042_v54  ;;  %v1772_v36 = vpack.c.bf16 %v1740_v2, %v1740_v2 }
 0x10e   : > { %v1611_v5 = vadd.f32 %v1579_v4, %v1547_v59  ;;  %v2445_v63 = vmin.f32 %v2413_v50, 6.0  ;;  %v2446_v7 = vmin.f32 %v2414_v39, 6.0  ;;  %v1191_v21 = vsel %vm1097_vm0, 0.0, %v1137_v46 }
 0x10f   : > { %v1139_v57 = vsel %vm1097_vm0, %v1137_v46, %v1138_v40  ;;  %v1642_v62 = vpack.c.bf16 %v1610_v44, %v1610_v44  ;;  %v1773_v48 = vpack.c.bf16 %v1741_v12, %v1741_v12  ;;  %v1806_v51 = vmul.f32 %v3960_v31, %v5118_v49 }
 0x110   : > { %v1643_v45 = vpack.c.bf16 %v1611_v5, %v1611_v5  ;;  %v2468_v6 = vpack.c.bf16 %v2446_v7, %v2445_v63  ;;  %v1807_v19 = vmul.f32 %v3962_v32, %v5119_v47  ;;  %v1870_v1 = vunpack.c.l.bf16 %v1772_v36  ;;  %v5121_v36 = vld [vmem:[#allocation38_spill] sm:$0xff] }
 0x111   : > { %v2000_v2 = vmul.f32 %v3973_v38, %v4282_v14  ;;  %v1674_v56 = vunpack.c.l.bf16 %v1642_v62  ;;  %v1838_v26 = vpack.c.bf16 %v1806_v51, %v1806_v51  ;;  %v1871_v20 = vunpack.c.l.bf16 %v1773_v48  ;;  %v5122_v62 = vld [vmem:[#allocation39_spill] sm:$0xff]  ;;  %v5123_v48 = vld [vmem:[#allocation40_spill] sm:$0xff] }
 0x112   : > { %v1675_v43 = vunpack.c.l.bf16 %v1643_v45  ;;  %2596 = vmatmul.bf16.gmra.mxu2 %v2468_v6  ;;  %v1839_v27 = vpack.c.bf16 %v1807_v19, %v1807_v19  ;;  %v2001_v59 = vmul.f32 %v3982_v42, %v4288_v61  ;;  %v4340_v4 = vunpack.c.l.bf16 %v3133_v60 }
 0x113   : > { %v2032_v52 = vpack.c.bf16 %v2000_v2, %v2000_v2  ;;  %v4342_v50 = vadd.f32 %v1674_v56, %v1191_v21  ;;  %v1902_v46 = vunpack.c.l.bf16 %v1838_v26  ;;  %v4346_v40 = vunpack.c.h.bf16 %v3133_v60  ;;  %v5124_v21 = vld [vmem:[#allocation41_spill] sm:$0xff] }
 0x114   : > { %v4344_v39 = vadd.f32 %v1675_v43, %v1139_v57  ;;  %v1903_v44 = vunpack.c.l.bf16 %v1839_v27  ;;  %v2033_v5 = vpack.c.bf16 %v2001_v59, %v2001_v59  ;;  %v587_v63 = vmul.f32 %v3925_v16, %v5121_v36 }
 0x115   : > { %5120 = vst [vmem:[#allocation34_spill] sm:$0xff] %v4346_v40  ;;  %v2096_v12 = vunpack.c.l.bf16 %v2032_v52  ;;  %v1934_v7 = vadd.f32 %v1902_v46, %v1870_v1  ;;  %v588_v45 = vmul.f32 %v3927_v17, %v5122_v62  ;;  %v655_v51 = vmul.f32 %v3944_v24, %v5123_v48 }
 0x116   : > { %v656_v57 = vmul.f32 %v3946_v25, %v5124_v21  ;;  %v1935_v6 = vadd.f32 %v1903_v44, %v1871_v20  ;;  %v2097_v19 = vunpack.c.l.bf16 %v2033_v5  ;;  %v619_v60 = vpack.c.bf16 %v587_v63, %v587_v63 }
 0x117   : > { %v851_v2 = vmul.f32 %v3964_v33, %v4340_v4  ;;  %v1966_v56 = vpack.c.bf16 %v1934_v7, %v1934_v7  ;;  %v620_v43 = vpack.c.bf16 %v588_v45, %v588_v45  ;;  %v687_v26 = vpack.c.bf16 %v655_v51, %v655_v51 }
 0x118   : > { %v688_v27 = vpack.c.bf16 %v656_v57, %v656_v57  ;;  %v1967_v1 = vpack.c.bf16 %v1935_v6, %v1935_v6  ;;  %v719_v59 = vunpack.c.l.bf16 %v619_v60  ;;  %v852_v52 = vmul.f32 %v3966_v34, %v4346_v40 }
 0x119   : > { %v883_v46 = vpack.c.bf16 %v851_v2, %v851_v2  ;;  %v2064_v10 = vunpack.c.l.bf16 %v1966_v56  ;;  %v720_v9 = vunpack.c.l.bf16 %v620_v43  ;;  %v751_v54 = vunpack.c.l.bf16 %v687_v26 }
 0x11a   : > { %v752_v58 = vunpack.c.l.bf16 %v688_v27  ;;  %v2065_v20 = vunpack.c.l.bf16 %v1967_v1  ;;  %v884_v44 = vpack.c.bf16 %v852_v52, %v852_v52  ;;  %v1206_v63 = vmul.f32 %v3929_v18, %v5121_v36 }
 0x11b   : > { %v947_v5 = vunpack.c.l.bf16 %v883_v46  ;;  %v2128_v7 = vadd.f32 %v2096_v12, %v2064_v10  ;;  %v783_v45 = vadd.f32 %v751_v54, %v719_v59  ;;  %v1207_v57 = vmul.f32 %v3940_v22, %v5122_v62 }
 0x11c   : > { %v784_v51 = vadd.f32 %v752_v58, %v720_v9  ;;  %v2129_v6 = vadd.f32 %v2097_v19, %v2065_v20  ;;  %v948_v60 = vunpack.c.l.bf16 %v884_v44  ;;  %v1238_v61 = vpack.c.bf16 %v1206_v63, %v1206_v63 }
 0x11d   : > { %v1272_v2 = vmul.f32 %v3956_v29, %v5123_v48  ;;  %v2160_v56 = vpack.c.bf16 %v2128_v7, %v2128_v7  ;;  %v815_v43 = vpack.c.bf16 %v783_v45, %v783_v45  ;;  %v1239_v27 = vpack.c.bf16 %v1207_v57, %v1207_v57 }
 0x11e   : > { %v816_v26 = vpack.c.bf16 %v784_v51, %v784_v51  ;;  %v2161_v1 = vpack.c.bf16 %v2129_v6, %v2129_v6  ;;  %v1273_v52 = vmul.f32 %v3958_v30, %v5124_v21  ;;  %v1336_v54 = vunpack.c.l.bf16 %v1238_v61 }
 0x11f   : > { %v1304_v10 = vpack.c.bf16 %v1272_v2, %v1272_v2  ;;  %v2192_v9 = vunpack.c.l.bf16 %v2160_v56  ;;  %v915_v58 = vunpack.c.l.bf16 %v815_v43  ;;  %v1337_v59 = vunpack.c.l.bf16 %v1239_v27 }
 0x120   : > { %v916_v12 = vunpack.c.l.bf16 %v816_v26  ;;  %v2193_v19 = vunpack.c.l.bf16 %v2161_v1  ;;  %v1305_v46 = vpack.c.bf16 %v1273_v52, %v1273_v52  ;;  %v1466_v44 = vmul.f32 %v3968_v35, %v4340_v4 }
 0x121   : > { %v1368_v20 = vunpack.c.l.bf16 %v1304_v10  ;;  %v2270_v63 = vrot.slane %v2192_v9, 1  ;;  %v979_v7 = vadd.f32 %v947_v5, %v915_v58  ;;  %v1467_v51 = vmul.f32 %v3971_v37, %v4346_v40 }
 0x122   : > { %v980_v45 = vadd.f32 %v948_v60, %v916_v12  ;;  %v2271_v57 = vrot.slane %v2193_v19, 1  ;;  %v1369_v6 = vunpack.c.l.bf16 %v1305_v46  ;;  %v1498_v61 = vpack.c.bf16 %v1466_v44, %v1466_v44 }
 0x123   : > { %v1400_v2 = vadd.f32 %v1368_v20, %v1336_v54  ;;  %v1011_v56 = vpack.c.bf16 %v979_v7, %v979_v7  ;;  %v1499_v26 = vpack.c.bf16 %v1467_v51, %v1467_v51  ;;  %v1724_v27 = vmul.f32 %v3942_v23, %v5121_v36 }
 0x124   : > { %v1012_v43 = vpack.c.bf16 %v980_v45, %v980_v45  ;;  %v2272_v1 = vsel %vm2230_vm1, %v2270_v63, %v2271_v57  ;;  %v2324_v52 = vsel %vm2230_vm1, %v2271_v57, 0.0  ;;  %v1401_v10 = vadd.f32 %v1369_v6, %v1337_v59 }
 0x125   : > { %v1432_v5 = vpack.c.bf16 %v1400_v2, %v1400_v2  ;;  %v2353_v60 = vadd.f32 %v2272_v1, %v4342_v50  ;;  %v2354_v9 = vadd.f32 %v2324_v52, %v4344_v39  ;;  %v1043_v58 = vunpack.c.l.bf16 %v1011_v56 }
 0x126   : > { %v1044_v12 = vunpack.c.l.bf16 %v1012_v43  ;;  %v1433_v54 = vpack.c.bf16 %v1401_v10, %v1401_v10  ;;  %v1562_v46 = vunpack.c.l.bf16 %v1498_v61  ;;  %v1563_v20 = vunpack.c.l.bf16 %v1499_v26 }
 0x127   : > { %v1530_v19 = vunpack.c.l.bf16 %v1432_v5  ;;  %v2389_v44 = vadd.f32 %v4323_v3, %v2353_v60  ;;  %v2390_v7 = vadd.f32 %v4323_v3, %v2354_v9  ;;  %v1113_v45 = vrot.slane %v1043_v58, 7  ;;  %v3129_v9 = vld [vmem:[%s3866_s18 + $0x10] sm:$0xff]  }
 0x128   : > { %v1114_v63 = vrot.slane %v1044_v12, 7  ;;  %v1531_v51 = vunpack.c.l.bf16 %v1433_v54  ;;  %v1725_v50 = vmul.f32 %v3954_v28, %v5122_v62  ;;  %v1756_v57 = vpack.c.bf16 %v1724_v27, %v1724_v27 }
 0x129   : > { %v1594_v59 = vadd.f32 %v1562_v46, %v1530_v19  ;;  %v2421_v39 = vmax.f32 %v2389_v44, 0.0  ;;  %v2422_v6 = vmax.f32 %v2390_v7, 0.0  ;;  %v1183_v61 = vsel %vm1097_vm0, 0.0, %v1113_v45 }
 0x12a   : > { %v1115_v2 = vsel %vm1097_vm0, %v1113_v45, %v1114_v63  ;;  %v1595_v56 = vadd.f32 %v1563_v20, %v1531_v51  ;;  %v1757_v26 = vpack.c.bf16 %v1725_v50, %v1725_v50  ;;  %v1790_v1 = vmul.f32 %v3960_v31, %v5123_v48 }
 0x12b   : > { %v1626_v43 = vpack.c.bf16 %v1594_v59, %v1594_v59  ;;  %v2453_v52 = vmin.f32 %v2421_v39, 6.0  ;;  %v2454_v10 = vmin.f32 %v2422_v6, 6.0  ;;  %v1791_v5 = vmul.f32 %v3962_v32, %v5124_v21 }
 0x12c   : > { %v1854_v60 = vunpack.c.l.bf16 %v1756_v57  ;;  %v1627_v27 = vpack.c.bf16 %v1595_v56, %v1595_v56  ;;  %v1822_v12 = vpack.c.bf16 %v1790_v1, %v1790_v1  ;;  %v1855_v54 = vunpack.c.l.bf16 %v1757_v26 }
 0x12d   : > { %v1658_v58 = vunpack.c.l.bf16 %v1626_v43  ;;  %v2472_v19 = vpack.c.bf16 %v2454_v10, %v2453_v52  ;;  %v1823_v46 = vpack.c.bf16 %v1791_v5, %v1791_v5  ;;  %v1984_v20 = vmul.f32 %v3973_v38, %v4340_v4 }
 0x12e   : > { %v1985_v44 = vmul.f32 %v3982_v42, %v4346_v40  ;;  %v1659_v7 = vunpack.c.l.bf16 %v1627_v27  ;;  %v1886_v63 = vunpack.c.l.bf16 %v1822_v12  ;;  %v4395_v51 = vunpack.c.l.bf16 %v3129_v9 }
 0x12f   : > { %v4393_v45 = vadd.f32 %v1658_v58, %v1183_v61  ;;  %2616 = vmatmul.bf16.gmra.mxu3 %v2472_v19  ;;  %v1887_v59 = vunpack.c.l.bf16 %v1823_v46  ;;  %v2016_v50 = vpack.c.bf16 %v1984_v20, %v1984_v20  ;;  %v4397_v39 = vunpack.c.h.bf16 %v3129_v9 }
 0x130   : > { %v2017_v57 = vpack.c.bf16 %v1985_v44, %v1985_v44  ;;  %v4399_v6 = vadd.f32 %v1659_v7, %v1115_v2  ;;  %v1918_v56 = vadd.f32 %v1886_v63, %v1854_v60  ;;  %v579_v43 = vmul.f32 %v3925_v16, %v4177_v13 }
 0x131   : > { %5125 = vst [vmem:[#allocation35_spill] sm:$0xff] %v4397_v39  ;;  %v580_v26 = vmul.f32 %v3927_v17, %v4179_v8  ;;  %v1919_v61 = vadd.f32 %v1887_v59, %v1855_v54  ;;  %v2080_v1 = vunpack.c.l.bf16 %v2016_v50  ;;  %v647_v10 = vmul.f32 %v3944_v24, %v4189_v53 }
 0x132   : > { %v2081_v52 = vunpack.c.l.bf16 %v2017_v57  ;;  %v1950_v5 = vpack.c.bf16 %v1918_v56, %v1918_v56  ;;  %v611_v27 = vpack.c.bf16 %v579_v43, %v579_v43  ;;  %v648_v2 = vmul.f32 %v3946_v25, %v4191_v55 }
 0x133   : > { %v612_v58 = vpack.c.bf16 %v580_v26, %v580_v26  ;;  %v1951_v9 = vpack.c.bf16 %v1919_v61, %v1919_v61  ;;  %v679_v60 = vpack.c.bf16 %v647_v10, %v647_v10  ;;  %v843_v12 = vmul.f32 %v3964_v33, %v4395_v51 }
 0x134   : > { %v844_v19 = vmul.f32 %v3966_v34, %v4397_v39  ;;  %v2048_v54 = vunpack.c.l.bf16 %v1950_v5  ;;  %v680_v46 = vpack.c.bf16 %v648_v2, %v648_v2  ;;  %v711_v20 = vunpack.c.l.bf16 %v611_v27 }
 0x135   : > { %v712_v44 = vunpack.c.l.bf16 %v612_v58  ;;  %v2049_v7 = vunpack.c.l.bf16 %v1951_v9  ;;  %v743_v63 = vunpack.c.l.bf16 %v679_v60  ;;  %v875_v59 = vpack.c.bf16 %v843_v12, %v843_v12 }
 0x136   : > { %v876_v50 = vpack.c.bf16 %v844_v19, %v844_v19  ;;  %v2112_v57 = vadd.f32 %v2080_v1, %v2048_v54  ;;  %v744_v56 = vunpack.c.l.bf16 %v680_v46  ;;  %v1198_v43 = vmul.f32 %v3929_v18, %v4177_v13 }
 0x137   : > { %v1199_v26 = vmul.f32 %v3940_v22, %v4179_v8  ;;  %v2113_v61 = vadd.f32 %v2081_v52, %v2049_v7  ;;  %v775_v10 = vadd.f32 %v743_v63, %v711_v20  ;;  %v939_v62 = vunpack.c.l.bf16 %v875_v59 }
 0x138   : > { %v940_v36 = vunpack.c.l.bf16 %v876_v50  ;;  %v2144_v5 = vpack.c.bf16 %v2112_v57, %v2112_v57  ;;  %v776_v2 = vadd.f32 %v744_v56, %v712_v44  ;;  %v1230_v27 = vpack.c.bf16 %v1198_v43, %v1198_v43 }
 0x139   : > { %v1231_v58 = vpack.c.bf16 %v1199_v26, %v1199_v26  ;;  %v2145_v9 = vpack.c.bf16 %v2113_v61, %v2113_v61  ;;  %v807_v60 = vpack.c.bf16 %v775_v10, %v775_v10  ;;  %v1264_v1 = vmul.f32 %v3956_v29, %v4189_v53 }
 0x13a   : > { %v1265_v12 = vmul.f32 %v3958_v30, %v4191_v55  ;;  %v2176_v19 = vunpack.c.l.bf16 %v2144_v5  ;;  %v808_v54 = vpack.c.bf16 %v776_v2, %v776_v2  ;;  %v1328_v46 = vunpack.c.l.bf16 %v1230_v27 }
 0x13b   : > { %v1329_v40 = vunpack.c.l.bf16 %v1231_v58  ;;  %v2177_v52 = vunpack.c.l.bf16 %v2145_v9  ;;  %v907_v20 = vunpack.c.l.bf16 %v807_v60  ;;  %v1296_v7 = vpack.c.bf16 %v1264_v1, %v1264_v1 }
 0x13c   : > { %v1297_v63 = vpack.c.bf16 %v1265_v12, %v1265_v12  ;;  %v2246_v59 = vrot.slane %v2176_v19, 1  ;;  %v908_v44 = vunpack.c.l.bf16 %v808_v54  ;;  %v1458_v50 = vmul.f32 %v3968_v35, %v4395_v51 }
 0x13d   : > { %v1459_v57 = vmul.f32 %v3971_v37, %v4397_v39  ;;  %v2247_v56 = vrot.slane %v2177_v52, 1  ;;  %v971_v43 = vadd.f32 %v939_v62, %v907_v20  ;;  %v1360_v26 = vunpack.c.l.bf16 %v1296_v7 }
 0x13e   : > { %v1361_v61 = vunpack.c.l.bf16 %v1297_v63  ;;  %v972_v10 = vadd.f32 %v940_v36, %v908_v44  ;;  %v1490_v5 = vpack.c.bf16 %v1458_v50, %v1458_v50  ;;  %v1716_v27 = vmul.f32 %v3942_v23, %v4177_v13 }
 0x13f   : > { %v1491_v2 = vpack.c.bf16 %v1459_v57, %v1459_v57  ;;  %v2248_v58 = vsel %vm2230_vm1, %v2246_v59, %v2247_v56  ;;  %v2316_v9 = vsel %vm2230_vm1, %v2247_v56, 0.0  ;;  %v1003_v60 = vpack.c.bf16 %v971_v43, %v971_v43 }
 0x140   : > { %v1392_v1 = vadd.f32 %v1360_v26, %v1328_v46  ;;  %v2337_v12 = vadd.f32 %v2248_v58, %v4393_v45  ;;  %v2338_v19 = vadd.f32 %v2316_v9, %v4399_v6  ;;  %v1004_v54 = vpack.c.bf16 %v972_v10, %v972_v10 }
 0x141   : > { %v1393_v62 = vadd.f32 %v1361_v61, %v1329_v40  ;;  %v1035_v52 = vunpack.c.l.bf16 %v1003_v60  ;;  %v1554_v36 = vunpack.c.l.bf16 %v1490_v5  ;;  %v1555_v7 = vunpack.c.l.bf16 %v1491_v2 }
 0x142   : > { %v1424_v20 = vpack.c.bf16 %v1392_v1, %v1392_v1  ;;  %v2373_v63 = vadd.f32 %v4323_v3, %v2337_v12  ;;  %v2374_v13 = vadd.f32 %v4323_v3, %v2338_v19  ;;  %v1036_v44 = vunpack.c.l.bf16 %v1004_v54 }
 0x143   : > { %v1425_v59 = vpack.c.bf16 %v1393_v62, %v1393_v62  ;;  %v1101_v50 = vrot.slane %v1035_v52, 7  ;;  %v1717_v46 = vmul.f32 %v3954_v28, %v4179_v8  ;;  %v1748_v45 = vpack.c.bf16 %v1716_v27, %v1716_v27 }
 0x144   : > { %v1522_v57 = vunpack.c.l.bf16 %v1424_v20  ;;  %v2405_v56 = vmax.f32 %v2373_v63, 0.0  ;;  %v2406_v6 = vmax.f32 %v2374_v13, 0.0  ;;  %v1102_v43 = vrot.slane %v1036_v44, 7 }
 0x145   : > { %v1523_v40 = vunpack.c.l.bf16 %v1425_v59  ;;  %v1179_v26 = vsel %vm1097_vm0, 0.0, %v1101_v50  ;;  %v1749_v10 = vpack.c.bf16 %v1717_v46, %v1717_v46  ;;  %v1782_v5 = vmul.f32 %v3960_v31, %v4189_v53 }
 0x146   : > { %v1586_v61 = vadd.f32 %v1554_v36, %v1522_v57  ;;  %v2437_v2 = vmin.f32 %v2405_v56, 6.0  ;;  %v2438_v58 = vmin.f32 %v2406_v6, 6.0  ;;  %v1103_v9 = vsel %vm1097_vm0, %v1101_v50, %v1102_v43 }
 0x147   : > { %v1587_v60 = vadd.f32 %v1555_v7, %v1523_v40  ;;  %v1783_v8 = vmul.f32 %v3962_v32, %v4191_v55  ;;  %v1814_v27 = vpack.c.bf16 %v1782_v5, %v1782_v5  ;;  %v1846_v12 = vunpack.c.l.bf16 %v1748_v45 }
 0x148   : > { %v1618_v1 = vpack.c.bf16 %v1586_v61, %v1586_v61  ;;  %v2464_v19 = vpack.c.bf16 %v2438_v58, %v2437_v2  ;;  %v1847_v62 = vunpack.c.l.bf16 %v1749_v10  ;;  %v1976_v52 = vmul.f32 %v3973_v38, %v4395_v51 }
 0x149   : > { %v1619_v54 = vpack.c.bf16 %v1587_v60, %v1587_v60  ;;  %v1815_v36 = vpack.c.bf16 %v1783_v8, %v1783_v8  ;;  %v1878_v63 = vunpack.c.l.bf16 %v1814_v27  ;;  %v1977_v13 = vmul.f32 %v3982_v42, %v4397_v39  ;;  %v5126_v8 = vld [vmem:[#allocation30_spill] sm:$0xff] }
 0x14a   : > { %v1650_v20 = vunpack.c.l.bf16 %v1618_v1  ;;  %2576 = vmatmul.bf16.gmra.mxu1 %v2464_v19  ;;  %v2008_v44 = vpack.c.bf16 %v1976_v52, %v1976_v52  ;;  %v597_v59 = vmul.f32 %v3925_v16, %v3912_v11  ;;  %v598_v50 = vmul.f32 %v3927_v17, %v3923_v15 }
 0x14b   : > { %v1651_v7 = vunpack.c.l.bf16 %v1619_v54  ;;  %v1879_v46 = vunpack.c.l.bf16 %v1815_v36  ;;  %v1910_v45 = vadd.f32 %v1878_v63, %v1846_v12  ;;  %v2009_v56 = vpack.c.bf16 %v1977_v13, %v1977_v13  ;;  %v5127_v54 = vld [vmem:[#allocation31_spill] sm:$0xff] }
 0x14c   : > { %v4449_v57 = vadd.f32 %v1650_v20, %v1179_v26  ;;  %v2072_v43 = vunpack.c.l.bf16 %v2008_v44  ;;  %v629_v40 = vpack.c.bf16 %v597_v59, %v597_v59  ;;  %v630_v61 = vpack.c.bf16 %v598_v50, %v598_v50 }
 0x14d   : > { %v4451_v6 = vadd.f32 %v1651_v7, %v1103_v9  ;;  %v1911_v10 = vadd.f32 %v1879_v46, %v1847_v62  ;;  %v1942_v5 = vpack.c.bf16 %v1910_v45, %v1910_v45  ;;  %v2073_v2 = vunpack.c.l.bf16 %v2009_v56 }
 0x14e   : > { %v665_v58 = vmul.f32 %v3944_v24, %v4233_v0  ;;  %v666_v60 = vmul.f32 %v3946_v25, %v4235_v41  ;;  %v729_v1 = vunpack.c.l.bf16 %v629_v40  ;;  %v730_v26 = vunpack.c.l.bf16 %v630_v61 }
 0x14f   : > { %v861_v27 = vmul.f32 %v3964_v33, %v5126_v8  ;;  %v1943_v12 = vpack.c.bf16 %v1911_v10, %v1911_v10  ;;  %v2040_v9 = vunpack.c.l.bf16 %v1942_v5  ;;  %v862_v52 = vmul.f32 %v3966_v34, %v5127_v54 }
 0x150   : > { %v697_v19 = vpack.c.bf16 %v665_v58, %v665_v58  ;;  %v698_v62 = vpack.c.bf16 %v666_v60, %v666_v60  ;;  %v1216_v36 = vmul.f32 %v3929_v18, %v3912_v11  ;;  %v1217_v63 = vmul.f32 %v3940_v22, %v3923_v15 }
 0x151   : > { %v893_v20 = vpack.c.bf16 %v861_v27, %v861_v27  ;;  %v2041_v13 = vunpack.c.l.bf16 %v1943_v12  ;;  %v2104_v7 = vadd.f32 %v2072_v43, %v2040_v9  ;;  %v894_v59 = vpack.c.bf16 %v862_v52, %v862_v52 }
 0x152   : > { %v761_v44 = vunpack.c.l.bf16 %v697_v19  ;;  %v762_v50 = vunpack.c.l.bf16 %v698_v62  ;;  %v1248_v45 = vpack.c.bf16 %v1216_v36, %v1216_v36  ;;  %v1249_v56 = vpack.c.bf16 %v1217_v63, %v1217_v63 }
 0x153   : > { %v957_v46 = vunpack.c.l.bf16 %v893_v20  ;;  %v2105_v40 = vadd.f32 %v2073_v2, %v2041_v13  ;;  %v2136_v61 = vpack.c.bf16 %v2104_v7, %v2104_v7  ;;  %v958_v5 = vunpack.c.l.bf16 %v894_v59 }
 0x154   : > { %v793_v10 = vadd.f32 %v761_v44, %v729_v1  ;;  %v794_v58 = vadd.f32 %v762_v50, %v730_v26  ;;  %v1282_v60 = vmul.f32 %v3956_v29, %v4233_v0  ;;  %v1283_v27 = vmul.f32 %v3958_v30, %v4235_v41 }
 0x155   : > { %v1346_v39 = vunpack.c.l.bf16 %v1248_v45  ;;  %v2137_v12 = vpack.c.bf16 %v2105_v40, %v2105_v40  ;;  %v2168_v43 = vunpack.c.l.bf16 %v2136_v61  ;;  %v1347_v19 = vunpack.c.l.bf16 %v1249_v56 }
 0x156   : > { %v825_v9 = vpack.c.bf16 %v793_v10, %v793_v10  ;;  %v826_v52 = vpack.c.bf16 %v794_v58, %v794_v58  ;;  %v1314_v62 = vpack.c.bf16 %v1282_v60, %v1282_v60  ;;  %v1315_v20 = vpack.c.bf16 %v1283_v27, %v1283_v27 }
 0x157   : > { %v1476_v2 = vmul.f32 %v3968_v35, %v5126_v8  ;;  %v2169_v1 = vunpack.c.l.bf16 %v2137_v12  ;;  %v2234_v36 = vrot.slane %v2168_v43, 1  ;;  %v1477_v63 = vmul.f32 %v3971_v37, %v5127_v54 }
 0x158   : > { %v925_v26 = vunpack.c.l.bf16 %v825_v9  ;;  %v926_v13 = vunpack.c.l.bf16 %v826_v52  ;;  %v1378_v7 = vunpack.c.l.bf16 %v1314_v62  ;;  %v1379_v44 = vunpack.c.l.bf16 %v1315_v20 }
 0x159   : > { %v1508_v59 = vpack.c.bf16 %v1476_v2, %v1476_v2  ;;  %v2235_v50 = vrot.slane %v2169_v1, 1  ;;  %v1509_v40 = vpack.c.bf16 %v1477_v63, %v1477_v63  ;;  %v1734_v56 = vmul.f32 %v3942_v23, %v3912_v11 }
 0x15a   : > { %v989_v45 = vadd.f32 %v957_v46, %v925_v26  ;;  %v990_v61 = vadd.f32 %v958_v5, %v926_v13  ;;  %v1410_v10 = vadd.f32 %v1378_v7, %v1346_v39  ;;  %v1411_v58 = vadd.f32 %v1379_v44, %v1347_v19 }
 0x15b   : > { %v1572_v60 = vunpack.c.l.bf16 %v1508_v59  ;;  %v2236_v27 = vsel %vm2230_vm1, %v2234_v36, %v2235_v50  ;;  %v2312_v12 = vsel %vm2230_vm1, %v2235_v50, 0.0  ;;  %v1573_v9 = vunpack.c.l.bf16 %v1509_v40 }
 0x15c   : > { %v1021_v43 = vpack.c.bf16 %v989_v45, %v989_v45  ;;  %v2329_v52 = vadd.f32 %v2236_v27, %v4449_v57  ;;  %v2330_v62 = vadd.f32 %v2312_v12, %v4451_v6  ;;  %v1022_v20 = vpack.c.bf16 %v990_v61, %v990_v61  ;;  %v3142_v12 = vld [vmem:[%s3866_s18 + $0x78] sm:$0xff]   ;;  %s4869_s18 = scalar_lea.vmem [#allocation8], %s2881_s16  ;;  %s5145_s16 = sld [smem:[#allocation17_spill]] }
 0x15d   : > { %v1442_v46 = vpack.c.bf16 %v1410_v10, %v1410_v10  ;;  %v1443_v1 = vpack.c.bf16 %v1411_v58, %v1411_v58  ;;  %v1735_v11 = vmul.f32 %v3954_v28, %v3923_v15  ;;  %v1766_v39 = vpack.c.bf16 %v1734_v56, %v1734_v56  ;;  %s2712_s20 = sshll.u32 %s4869_s18, 4  ;;  %s2713_s20 = int_to_ptr.vmem [resolvable:$true] %s2712_s20 }
 0x15e   : > { %v1053_v2 = vunpack.c.l.bf16 %v1021_v43  ;;  %v2365_v5 = vadd.f32 %v4323_v3, %v2329_v52  ;;  %v2366_v19 = vadd.f32 %v4323_v3, %v2330_v62  ;;  %v1054_v36 = vunpack.c.l.bf16 %v1022_v20 }
 0x15f   : > { %v1540_v26 = vunpack.c.l.bf16 %v1442_v46  ;;  %v1541_v13 = vunpack.c.l.bf16 %v1443_v1  ;;  %v1767_v57 = vpack.c.bf16 %v1735_v11, %v1735_v11  ;;  %v1800_v6 = vmul.f32 %v3960_v31, %v4233_v0 }
 0x160   : > { %v1128_v63 = vrot.slane %v1053_v2, 7  ;;  %v2397_v7 = vmax.f32 %v2365_v5, 0.0  ;;  %v2398_v44 = vmax.f32 %v2366_v19, 0.0  ;;  %v1129_v59 = vrot.slane %v1054_v36, 7 }
 0x161   : > { %v1604_v50 = vadd.f32 %v1572_v60, %v1540_v26  ;;  %v1605_v45 = vadd.f32 %v1573_v9, %v1541_v13  ;;  %v1801_v40 = vmul.f32 %v3962_v32, %v4235_v41  ;;  %v1832_v56 = vpack.c.bf16 %v1800_v6, %v1800_v6 }
 0x162   : > { %v1188_v15 = vsel %vm1097_vm0, 0.0, %v1128_v63  ;;  %v2429_v61 = vmin.f32 %v2397_v7, 6.0  ;;  %v2430_v10 = vmin.f32 %v2398_v44, 6.0  ;;  %v1130_v58 = vsel %vm1097_vm0, %v1128_v63, %v1129_v59  ;;  %s2920_s30 = sshll.u32 %s5145_s16, 6 }
 0x163   : > { %v1636_v27 = vpack.c.bf16 %v1604_v50, %v1604_v50  ;;  %v1637_v43 = vpack.c.bf16 %v1605_v45, %v1605_v45  ;;  %v1833_v52 = vpack.c.bf16 %v1801_v40, %v1801_v40  ;;  %v1864_v62 = vunpack.c.l.bf16 %v1766_v39  ;;  %s2709_s13 = sadd.s32 %s2939_s0, %s2920_s30 }
 0x164   : > { %v1865_v20 = vunpack.c.l.bf16 %v1767_v57  ;;  %v2460_v46 = vpack.c.bf16 %v2430_v10, %v2429_v61  ;;  %v1896_v60 = vunpack.c.l.bf16 %v1832_v56  ;;  %v1994_v9 = vmul.f32 %v3973_v38, %v5126_v8  ;;  %v5128_v61 = vld [vmem:[#allocation42_spill] sm:$0xff]  ;;  %s2921_s15 = sshll.u32 %s2709_s13, 2 }
 0x165   : > { %v1668_v2 = vunpack.c.l.bf16 %v1636_v27  ;;  %v1669_v1 = vunpack.c.l.bf16 %v1637_v43  ;;  %v1897_v11 = vunpack.c.l.bf16 %v1833_v52  ;;  %v1995_v5 = vmul.f32 %v3982_v42, %v5127_v54  ;;  %s2711_s9 = scalar_lea.hbm %s5146_s27, %s2921_s15 }
 0x166   : > { %v4494_v19 = vunpack.c.l.bf16 %v3142_v12  ;;  %2556 = vmatmul.bf16.gmra.mxu0 %v2460_v46  ;;  %v1928_v26 = vadd.f32 %v1896_v60, %v1864_v62  ;;  %v2026_v63 = vpack.c.bf16 %v1994_v9, %v1994_v9  ;;  %v4498_v39 = vunpack.c.h.bf16 %v3142_v12 }
 0x167   : > { %v4496_v36 = vadd.f32 %v1668_v2, %v1188_v15  ;;  %v1701_v13 = vadd.f32 %v1669_v1, %v1130_v58  ;;  %v1929_v57 = vadd.f32 %v1897_v11, %v1865_v20  ;;  %v2027_v6 = vpack.c.bf16 %v1995_v5, %v1995_v5 }
 0x168   : > { %v605_v7 = vmul.f32 %v3925_v16, %v5118_v49  ;;  %v1960_v44 = vpack.c.bf16 %v1928_v26, %v1928_v26  ;;  %v2090_v59 = vunpack.c.l.bf16 %v2026_v63  ;;  %v606_v50 = vmul.f32 %v3927_v17, %v5119_v47 }
 0x169   : > { %v673_v45 = vmul.f32 %v3944_v24, %v4282_v14  ;;  %v1961_v15 = vpack.c.bf16 %v1929_v57, %v1929_v57  ;;  %v2091_v40 = vunpack.c.l.bf16 %v2027_v6  ;;  %v674_v10 = vmul.f32 %v3946_v25, %v5128_v61 }
 0x16a   : > { %v637_v56 = vpack.c.bf16 %v605_v7, %v605_v7  ;;  %v2058_v58 = vunpack.c.l.bf16 %v1960_v44  ;;  %v638_v27 = vpack.c.bf16 %v606_v50, %v606_v50  ;;  %v869_v43 = vmul.f32 %v3964_v33, %v4494_v19 }
 0x16b   : > { %v705_v12 = vpack.c.bf16 %v673_v45, %v673_v45  ;;  %v2059_v52 = vunpack.c.l.bf16 %v1961_v15  ;;  %v706_v62 = vpack.c.bf16 %v674_v10, %v674_v10  ;;  %v870_v46 = vmul.f32 %v3966_v34, %v4498_v39 }
 0x16c   : > { %v737_v20 = vunpack.c.l.bf16 %v637_v56  ;;  %v2122_v2 = vadd.f32 %v2090_v59, %v2058_v58  ;;  %v738_v60 = vunpack.c.l.bf16 %v638_v27  ;;  %v901_v1 = vpack.c.bf16 %v869_v43, %v869_v43 }
 0x16d   : > { %v769_v9 = vunpack.c.l.bf16 %v705_v12  ;;  %v2123_v11 = vadd.f32 %v2091_v40, %v2059_v52  ;;  %v770_v5 = vunpack.c.l.bf16 %v706_v62  ;;  %v902_v26 = vpack.c.bf16 %v870_v46, %v870_v46 }
 0x16e   : > { %v1224_v63 = vmul.f32 %v3929_v18, %v5118_v49  ;;  %v2154_v57 = vpack.c.bf16 %v2122_v2, %v2122_v2  ;;  %v965_v7 = vunpack.c.l.bf16 %v901_v1  ;;  %v1225_v44 = vmul.f32 %v3940_v22, %v5119_v47 }
 0x16f   : > { %v801_v6 = vadd.f32 %v769_v9, %v737_v20  ;;  %v2155_v50 = vpack.c.bf16 %v2123_v11, %v2123_v11  ;;  %v802_v45 = vadd.f32 %v770_v5, %v738_v60  ;;  %v966_v15 = vunpack.c.l.bf16 %v902_v26 }
 0x170   : > { %v1256_v56 = vpack.c.bf16 %v1224_v63, %v1224_v63  ;;  %v2186_v59 = vunpack.c.l.bf16 %v2154_v57  ;;  %v1257_v58 = vpack.c.bf16 %v1225_v44, %v1225_v44  ;;  %v1290_v40 = vmul.f32 %v3956_v29, %v4282_v14 }
 0x171   : > { %v833_v10 = vpack.c.bf16 %v801_v6, %v801_v6  ;;  %v2187_v27 = vunpack.c.l.bf16 %v2155_v50  ;;  %v834_v12 = vpack.c.bf16 %v802_v45, %v802_v45  ;;  %v1291_v43 = vmul.f32 %v3958_v30, %v5128_v61 }
 0x172   : > { %v1354_v52 = vunpack.c.l.bf16 %v1256_v56  ;;  %v2261_v62 = vrot.slane %v2186_v59, 1  ;;  %v1322_v46 = vpack.c.bf16 %v1290_v40, %v1290_v40  ;;  %v1355_v2 = vunpack.c.l.bf16 %v1257_v58 }
 0x173   : > { %v933_v20 = vunpack.c.l.bf16 %v833_v10  ;;  %v2262_v9 = vrot.slane %v2187_v27, 1  ;;  %v934_v60 = vunpack.c.l.bf16 %v834_v12  ;;  %v1323_v1 = vpack.c.bf16 %v1291_v43, %v1291_v43 }
 0x174   : > { %v1484_v11 = vmul.f32 %v3968_v35, %v4494_v19  ;;  %v1386_v26 = vunpack.c.l.bf16 %v1322_v46  ;;  %v1485_v63 = vmul.f32 %v3971_v37, %v4498_v39  ;;  %v1742_v57 = vmul.f32 %v3942_v23, %v5118_v49 }
 0x175   : > { %v997_v5 = vadd.f32 %v965_v7, %v933_v20  ;;  %v2263_v6 = vsel %vm2230_vm1, %v2261_v62, %v2262_v9  ;;  %v2321_v44 = vsel %vm2230_vm1, %v2262_v9, 0.0  ;;  %v998_v50 = vadd.f32 %v966_v15, %v934_v60 }
 0x176   : > { %v1387_v45 = vunpack.c.l.bf16 %v1323_v1  ;;  %v2347_v56 = vadd.f32 %v2263_v6, %v4496_v36  ;;  %v2348_v59 = vadd.f32 %v2321_v44, %v1701_v13  ;;  %v1418_v58 = vadd.f32 %v1386_v26, %v1354_v52 }
 0x177   : > { %v1029_v10 = vpack.c.bf16 %v997_v5, %v997_v5  ;;  %v1030_v40 = vpack.c.bf16 %v998_v50, %v998_v50  ;;  %v1516_v27 = vpack.c.bf16 %v1484_v11, %v1484_v11  ;;  %v1517_v12 = vpack.c.bf16 %v1485_v63, %v1485_v63 }
 0x178   : > { %v1419_v7 = vadd.f32 %v1387_v45, %v1355_v2  ;;  %v2383_v43 = vadd.f32 %v4323_v3, %v2347_v56  ;;  %v2384_v20 = vadd.f32 %v4323_v3, %v2348_v59  ;;  %v1450_v46 = vpack.c.bf16 %v1418_v58, %v1418_v58 }
 0x179   : > { %v1061_v49 = vunpack.c.l.bf16 %v1029_v10  ;;  %v1062_v62 = vunpack.c.l.bf16 %v1030_v40  ;;  %v1580_v9 = vunpack.c.l.bf16 %v1516_v27  ;;  %v1581_v15 = vunpack.c.l.bf16 %v1517_v12 }
 0x17a   : > { %v1451_v54 = vpack.c.bf16 %v1419_v7, %v1419_v7  ;;  %v2415_v60 = vmax.f32 %v2383_v43, 0.0  ;;  %v2416_v1 = vmax.f32 %v2384_v20, 0.0  ;;  %v1548_v13 = vunpack.c.l.bf16 %v1450_v46 }
 0x17b   : > { %v1140_v36 = vrot.slane %v1061_v49, 7  ;;  %v1141_v5 = vrot.slane %v1062_v62, 7  ;;  %v1743_v2 = vmul.f32 %v3954_v28, %v5119_v47  ;;  %v1774_v11 = vpack.c.bf16 %v1742_v57, %v1742_v57 }
 0x17c   : > { %v1549_v52 = vunpack.c.l.bf16 %v1451_v54  ;;  %v2447_v26 = vmin.f32 %v2415_v60, 6.0  ;;  %v2448_v63 = vmin.f32 %v2416_v1, 6.0  ;;  %v1612_v6 = vadd.f32 %v1580_v9, %v1548_v13 }
 0x17d   : > { %v1192_v3 = vsel %vm1097_vm0, 0.0, %v1140_v36  ;;  %v1142_v44 = vsel %vm1097_vm0, %v1140_v36, %v1141_v5  ;;  %v1775_v45 = vpack.c.bf16 %v1743_v2, %v1743_v2  ;;  %v1808_v56 = vmul.f32 %v3960_v31, %v4282_v14 }
 0x17e   : > { %v1613_v50 = vadd.f32 %v1581_v15, %v1549_v52  ;;  %v2469_v59 = vpack.c.bf16 %v2448_v63, %v2447_v26  ;;  %v1644_v10 = vpack.c.bf16 %v1612_v6, %v1612_v6  ;;  %v1809_v54 = vmul.f32 %v3962_v32, %v5128_v61  ;;  %v5129_v6 = vld [vmem:[#allocation34_spill] sm:$0xff] }
 0x17f   : > { %v1872_v58 = vunpack.c.l.bf16 %v1774_v11  ;;  %v1840_v57 = vpack.c.bf16 %v1808_v56, %v1808_v56  ;;  %v1873_v40 = vunpack.c.l.bf16 %v1775_v45  ;;  %v2002_v7 = vmul.f32 %v3973_v38, %v4494_v19 }
 0x180   : > { %v1645_v47 = vpack.c.bf16 %v1613_v50, %v1613_v50  ;;  %2601 = vmatmul.bf16.gmra.mxu2 %v2469_v59  ;;  %v1676_v27 = vunpack.c.l.bf16 %v1644_v10  ;;  %v1841_v12 = vpack.c.bf16 %v1809_v54, %v1809_v54  ;;  %v2003_v43 = vmul.f32 %v3982_v42, %v4498_v39  ;;  %v5130_v59 = vld [vmem:[#allocation26_spill] sm:$0xff] }
 0x181   : > { %v589_v20 = vmul.f32 %v3925_v16, %v5123_v48  ;;  %v1904_v46 = vunpack.c.l.bf16 %v1840_v57  ;;  %v2034_v62 = vpack.c.bf16 %v2002_v7, %v2002_v7  ;;  %v590_v9 = vmul.f32 %v3927_v17, %v5124_v21 }
 0x182   : > { %v1677_v49 = vunpack.c.l.bf16 %v1645_v47  ;;  %v4547_v15 = vadd.f32 %v1676_v27, %v1192_v3  ;;  %v1905_v60 = vunpack.c.l.bf16 %v1841_v12  ;;  %v2035_v1 = vpack.c.bf16 %v2003_v43, %v2003_v43 }
 0x183   : > { %v621_v36 = vpack.c.bf16 %v589_v20, %v589_v20  ;;  %v1936_v5 = vadd.f32 %v1904_v46, %v1872_v58  ;;  %v2098_v52 = vunpack.c.l.bf16 %v2034_v62  ;;  %v622_v2 = vpack.c.bf16 %v590_v9, %v590_v9  ;;  %v5131_v58 = vld [vmem:[#allocation27_spill] sm:$0xff] }
 0x184   : > { %v4549_v13 = vadd.f32 %v1677_v49, %v1142_v44  ;;  %v1937_v11 = vadd.f32 %v1905_v60, %v1873_v40  ;;  %v2099_v26 = vunpack.c.l.bf16 %v2035_v1  ;;  %v657_v63 = vmul.f32 %v3944_v24, %v4340_v4 }
 0x185   : > { %v658_v50 = vmul.f32 %v3946_v25, %v5129_v6  ;;  %v1968_v45 = vpack.c.bf16 %v1936_v5, %v1936_v5  ;;  %v721_v56 = vunpack.c.l.bf16 %v621_v36  ;;  %v722_v3 = vunpack.c.l.bf16 %v622_v2 }
 0x186   : > { %v853_v10 = vmul.f32 %v3964_v33, %v5130_v59  ;;  %v1969_v54 = vpack.c.bf16 %v1937_v11, %v1937_v11  ;;  %v689_v44 = vpack.c.bf16 %v657_v63, %v657_v63  ;;  %v854_v57 = vmul.f32 %v3966_v34, %v5131_v58 }
 0x187   : > { %v690_v47 = vpack.c.bf16 %v658_v50, %v658_v50  ;;  %v2066_v40 = vunpack.c.l.bf16 %v1968_v45  ;;  %v1208_v27 = vmul.f32 %v3929_v18, %v5123_v48  ;;  %v1209_v12 = vmul.f32 %v3940_v22, %v5124_v21 }
 0x188   : > { %v885_v7 = vpack.c.bf16 %v853_v10, %v853_v10  ;;  %v2067_v43 = vunpack.c.l.bf16 %v1969_v54  ;;  %v753_v20 = vunpack.c.l.bf16 %v689_v44  ;;  %v886_v46 = vpack.c.bf16 %v854_v57, %v854_v57 }
 0x189   : > { %v754_v49 = vunpack.c.l.bf16 %v690_v47  ;;  %v2130_v62 = vadd.f32 %v2098_v52, %v2066_v40  ;;  %v1240_v60 = vpack.c.bf16 %v1208_v27, %v1208_v27  ;;  %v1241_v1 = vpack.c.bf16 %v1209_v12, %v1209_v12 }
 0x18a   : > { %v949_v9 = vunpack.c.l.bf16 %v885_v7  ;;  %v2131_v36 = vadd.f32 %v2099_v26, %v2067_v43  ;;  %v785_v5 = vadd.f32 %v753_v20, %v721_v56  ;;  %v950_v11 = vunpack.c.l.bf16 %v886_v46 }
 0x18b   : > { %v786_v2 = vadd.f32 %v754_v49, %v722_v3  ;;  %v2162_v63 = vpack.c.bf16 %v2130_v62, %v2130_v62  ;;  %v1274_v50 = vmul.f32 %v3956_v29, %v4340_v4  ;;  %v1275_v45 = vmul.f32 %v3958_v30, %v5129_v6 }
 0x18c   : > { %v1338_v10 = vunpack.c.l.bf16 %v1240_v60  ;;  %v2163_v54 = vpack.c.bf16 %v2131_v36, %v2131_v36  ;;  %v817_v44 = vpack.c.bf16 %v785_v5, %v785_v5  ;;  %v1339_v57 = vunpack.c.l.bf16 %v1241_v1 }
 0x18d   : > { %v818_v47 = vpack.c.bf16 %v786_v2, %v786_v2  ;;  %v2194_v52 = vunpack.c.l.bf16 %v2162_v63  ;;  %v1306_v40 = vpack.c.bf16 %v1274_v50, %v1274_v50  ;;  %v1307_v7 = vpack.c.bf16 %v1275_v45, %v1275_v45 }
 0x18e   : > { %v1468_v26 = vmul.f32 %v3968_v35, %v5130_v59  ;;  %v2195_v56 = vunpack.c.l.bf16 %v2163_v54  ;;  %v917_v3 = vunpack.c.l.bf16 %v817_v44  ;;  %v1469_v12 = vmul.f32 %v3971_v37, %v5131_v58 }
 0x18f   : > { %v918_v27 = vunpack.c.l.bf16 %v818_v47  ;;  %v2273_v43 = vrot.slane %v2194_v52, 1  ;;  %v1370_v20 = vunpack.c.l.bf16 %v1306_v40  ;;  %v1371_v49 = vunpack.c.l.bf16 %v1307_v7 }
 0x190   : > { %v1500_v46 = vpack.c.bf16 %v1468_v26, %v1468_v26  ;;  %v2274_v62 = vrot.slane %v2195_v56, 1  ;;  %v981_v60 = vadd.f32 %v949_v9, %v917_v3  ;;  %v1501_v1 = vpack.c.bf16 %v1469_v12, %v1469_v12 }
 0x191   : > { %v982_v36 = vadd.f32 %v950_v11, %v918_v27  ;;  %v1402_v5 = vadd.f32 %v1370_v20, %v1338_v10  ;;  %v1403_v2 = vadd.f32 %v1371_v49, %v1339_v57  ;;  %v1726_v50 = vmul.f32 %v3942_v23, %v5123_v48  ;;  %v4582_v48 = vld [vmem:[%s5109_s19] ss:$0 sm:$0xff] }
 0x192   : > { %v1564_v63 = vunpack.c.l.bf16 %v1500_v46  ;;  %v2275_v45 = vsel %vm2230_vm1, %v2273_v43, %v2274_v62  ;;  %v2325_v54 = vsel %vm2230_vm1, %v2274_v62, 0.0  ;;  %v1013_v44 = vpack.c.bf16 %v981_v60, %v981_v60 }
 0x193   : > { %v1014_v47 = vpack.c.bf16 %v982_v36, %v982_v36  ;;  %v2355_v52 = vadd.f32 %v2275_v45, %v4547_v15  ;;  %v2356_v40 = vadd.f32 %v2325_v54, %v4549_v13  ;;  %v1434_v7 = vpack.c.bf16 %v1402_v5, %v1402_v5 }
 0x194   : > { %v1435_v9 = vpack.c.bf16 %v1403_v2, %v1403_v2  ;;  %v1045_v11 = vunpack.c.l.bf16 %v1013_v44  ;;  %v1565_v10 = vunpack.c.l.bf16 %v1501_v1  ;;  %v1727_v57 = vmul.f32 %v3954_v28, %v5124_v21 }
 0x195   : > { %v1046_v26 = vunpack.c.l.bf16 %v1014_v47  ;;  %v2391_v56 = vadd.f32 %v4582_v48, %v2355_v52  ;;  %v2392_v3 = vadd.f32 %v4582_v48, %v2356_v40  ;;  %v1532_v15 = vunpack.c.l.bf16 %v1434_v7 }
 0x196   : > { %v1533_v27 = vunpack.c.l.bf16 %v1435_v9  ;;  %v1116_v13 = vrot.slane %v1045_v11, 7  ;;  %v1758_v43 = vpack.c.bf16 %v1726_v50, %v1726_v50  ;;  %v1759_v20 = vpack.c.bf16 %v1727_v57, %v1727_v57 }
 0x197   : > { %v1117_v12 = vrot.slane %v1046_v26, 7  ;;  %v2423_v49 = vmax.f32 %v2391_v56, 0.0  ;;  %v2424_v46 = vmax.f32 %v2392_v3, 0.0  ;;  %v1596_v62 = vadd.f32 %v1564_v63, %v1532_v15 }
 0x198   : > { %v1597_v60 = vadd.f32 %v1565_v10, %v1533_v27  ;;  %v1184_v36 = vsel %vm1097_vm0, 0.0, %v1116_v13  ;;  %v1792_v1 = vmul.f32 %v3960_v31, %v4340_v4  ;;  %v1793_v5 = vmul.f32 %v3962_v32, %v5129_v6 }
 0x199   : > { %v1118_v21 = vsel %vm1097_vm0, %v1116_v13, %v1117_v12  ;;  %v2455_v2 = vmin.f32 %v2423_v49, 6.0  ;;  %v2456_v45 = vmin.f32 %v2424_v46, 6.0  ;;  %v1628_v54 = vpack.c.bf16 %v1596_v62, %v1596_v62 }
 0x19a   : > { %v1629_v44 = vpack.c.bf16 %v1597_v60, %v1597_v60  ;;  %v1824_v50 = vpack.c.bf16 %v1792_v1, %v1792_v1  ;;  %v1825_v47 = vpack.c.bf16 %v1793_v5, %v1793_v5  ;;  %v1856_v52 = vunpack.c.l.bf16 %v1758_v43  ;;  %v5132_v1 = vld [vmem:[#allocation35_spill] sm:$0xff] }
 0x19b   : > { %v1857_v40 = vunpack.c.l.bf16 %v1759_v20  ;;  %v2473_v63 = vpack.c.bf16 %v2456_v45, %v2455_v2  ;;  %v1660_v7 = vunpack.c.l.bf16 %v1628_v54  ;;  %v1986_v11 = vmul.f32 %v3973_v38, %v5130_v59 }
 0x19c   : > { %v1661_v9 = vunpack.c.l.bf16 %v1629_v44  ;;  %v1888_v26 = vunpack.c.l.bf16 %v1824_v50  ;;  %v1889_v10 = vunpack.c.l.bf16 %v1825_v47  ;;  %v1987_v57 = vmul.f32 %v3982_v42, %v5131_v58  ;;  %v5133_v47 = vld [vmem:[#allocation36_spill] sm:$0xff] }
 0x19d   : > { %v581_v56 = vmul.f32 %v3925_v16, %v4189_v53  ;;  %2621 = vmatmul.bf16.gmra.mxu3 %v2473_v63  ;;  %v4598_v3 = vadd.f32 %v1660_v7, %v1184_v36  ;;  %v2018_v27 = vpack.c.bf16 %v1986_v11, %v1986_v11  ;;  %v582_v13 = vmul.f32 %v3927_v17, %v4191_v55  ;;  %v5134_v7 = vld [vmem:[#allocation37_spill] sm:$0xff] }
 0x19e   : > { %v4600_v15 = vadd.f32 %v1661_v9, %v1118_v21  ;;  %v1920_v12 = vadd.f32 %v1888_v26, %v1856_v52  ;;  %v1921_v43 = vadd.f32 %v1889_v10, %v1857_v40  ;;  %v2019_v20 = vpack.c.bf16 %v1987_v57, %v1987_v57 }
 0x19f   : > { %v613_v49 = vpack.c.bf16 %v581_v56, %v581_v56  ;;  %v2082_v46 = vunpack.c.l.bf16 %v2018_v27  ;;  %v614_v62 = vpack.c.bf16 %v582_v13, %v582_v13  ;;  %v649_v60 = vmul.f32 %v3944_v24, %v4395_v51 }
 0x1a0   : > { %v650_v5 = vmul.f32 %v3946_v25, %v5132_v1  ;;  %v1952_v36 = vpack.c.bf16 %v1920_v12, %v1920_v12  ;;  %v1953_v2 = vpack.c.bf16 %v1921_v43, %v1921_v43  ;;  %v2083_v21 = vunpack.c.l.bf16 %v2019_v20 }
 0x1a1   : > { %v713_v45 = vunpack.c.l.bf16 %v613_v49  ;;  %v681_v54 = vpack.c.bf16 %v649_v60, %v649_v60  ;;  %v714_v50 = vunpack.c.l.bf16 %v614_v62  ;;  %v845_v52 = vmul.f32 %v3964_v33, %v5133_v47 }
 0x1a2   : > { %v682_v44 = vpack.c.bf16 %v650_v5, %v650_v5  ;;  %v2050_v40 = vunpack.c.l.bf16 %v1952_v36  ;;  %v2051_v63 = vunpack.c.l.bf16 %v1953_v2  ;;  %v846_v9 = vmul.f32 %v3966_v34, %v5134_v7 }
 0x1a3   : > { %v1200_v11 = vmul.f32 %v3929_v18, %v4189_v53  ;;  %v745_v26 = vunpack.c.l.bf16 %v681_v54  ;;  %v877_v57 = vpack.c.bf16 %v845_v52, %v845_v52  ;;  %v1201_v56 = vmul.f32 %v3940_v22, %v4191_v55 }
 0x1a4   : > { %v746_v10 = vunpack.c.l.bf16 %v682_v44  ;;  %v2114_v27 = vadd.f32 %v2082_v46, %v2050_v40  ;;  %v2115_v13 = vadd.f32 %v2083_v21, %v2051_v63  ;;  %v878_v12 = vpack.c.bf16 %v846_v9, %v846_v9 }
 0x1a5   : > { %v1232_v43 = vpack.c.bf16 %v1200_v11, %v1200_v11  ;;  %v777_v20 = vadd.f32 %v745_v26, %v713_v45  ;;  %v941_v62 = vunpack.c.l.bf16 %v877_v57  ;;  %v1233_v60 = vpack.c.bf16 %v1201_v56, %v1201_v56 }
 0x1a6   : > { %v778_v49 = vadd.f32 %v746_v10, %v714_v50  ;;  %v2146_v5 = vpack.c.bf16 %v2114_v27, %v2114_v27  ;;  %v2147_v36 = vpack.c.bf16 %v2115_v13, %v2115_v13  ;;  %v942_v2 = vunpack.c.l.bf16 %v878_v12 }
 0x1a7   : > { %v1266_v58 = vmul.f32 %v3956_v29, %v4395_v51  ;;  %v809_v54 = vpack.c.bf16 %v777_v20, %v777_v20  ;;  %v1267_v52 = vmul.f32 %v3958_v30, %v5132_v1  ;;  %v1330_v59 = vunpack.c.l.bf16 %v1232_v43 }
 0x1a8   : > { %v810_v44 = vpack.c.bf16 %v778_v49, %v778_v49  ;;  %v2178_v46 = vunpack.c.l.bf16 %v2146_v5  ;;  %v2179_v21 = vunpack.c.l.bf16 %v2147_v36  ;;  %v1331_v63 = vunpack.c.l.bf16 %v1233_v60 }
 0x1a9   : > { %v1298_v40 = vpack.c.bf16 %v1266_v58, %v1266_v58  ;;  %v909_v45 = vunpack.c.l.bf16 %v809_v54  ;;  %v1299_v9 = vpack.c.bf16 %v1267_v52, %v1267_v52  ;;  %v1460_v11 = vmul.f32 %v3968_v35, %v5133_v47 }
 0x1aa   : > { %v910_v50 = vunpack.c.l.bf16 %v810_v44  ;;  %v2249_v26 = vrot.slane %v2178_v46, 1  ;;  %v2250_v10 = vrot.slane %v2179_v21, 1  ;;  %v1461_v56 = vmul.f32 %v3971_v37, %v5134_v7 }
 0x1ab   : > { %v1362_v57 = vunpack.c.l.bf16 %v1298_v40  ;;  %v973_v27 = vadd.f32 %v941_v62, %v909_v45  ;;  %v1363_v12 = vunpack.c.l.bf16 %v1299_v9  ;;  %v1492_v43 = vpack.c.bf16 %v1460_v11, %v1460_v11 }
 0x1ac   : > { %v974_v13 = vadd.f32 %v942_v2, %v910_v50  ;;  %v2251_v58 = vsel %vm2230_vm1, %v2249_v26, %v2250_v10  ;;  %v2317_v20 = vsel %vm2230_vm1, %v2250_v10, 0.0  ;;  %v1493_v60 = vpack.c.bf16 %v1461_v56, %v1461_v56 }
 0x1ad   : > { %v1394_v49 = vadd.f32 %v1362_v57, %v1330_v59  ;;  %v2339_v5 = vadd.f32 %v2251_v58, %v4598_v3  ;;  %v2340_v36 = vadd.f32 %v2317_v20, %v4600_v15  ;;  %v1005_v54 = vpack.c.bf16 %v973_v27, %v973_v27 }
 0x1ae   : > { %v1006_v44 = vpack.c.bf16 %v974_v13, %v974_v13  ;;  %v1395_v52 = vadd.f32 %v1363_v12, %v1331_v63  ;;  %v1556_v62 = vunpack.c.l.bf16 %v1492_v43  ;;  %v1557_v2 = vunpack.c.l.bf16 %v1493_v60 }
 0x1af   : > { %v1426_v46 = vpack.c.bf16 %v1394_v49, %v1394_v49  ;;  %v2375_v21 = vadd.f32 %v4582_v48, %v2339_v5  ;;  %v2376_v40 = vadd.f32 %v4582_v48, %v2340_v36  ;;  %v1037_v45 = vunpack.c.l.bf16 %v1005_v54 }
 0x1b0   : > { %v1038_v50 = vunpack.c.l.bf16 %v1006_v44  ;;  %v1427_v59 = vpack.c.bf16 %v1395_v52, %v1395_v52  ;;  %v1718_v3 = vmul.f32 %v3942_v23, %v4189_v53  ;;  %v1719_v15 = vmul.f32 %v3954_v28, %v4191_v55 }
 0x1b1   : > { %v1524_v9 = vunpack.c.l.bf16 %v1426_v46  ;;  %v2407_v11 = vmax.f32 %v2375_v21, 0.0  ;;  %v2408_v63 = vmax.f32 %v2376_v40, 0.0  ;;  %v1104_v26 = vrot.slane %v1037_v45, 7 }
 0x1b2   : > { %v1105_v10 = vrot.slane %v1038_v50, 7  ;;  %v1525_v57 = vunpack.c.l.bf16 %v1427_v59  ;;  %v1750_v27 = vpack.c.bf16 %v1718_v3, %v1718_v3  ;;  %v1751_v13 = vpack.c.bf16 %v1719_v15, %v1719_v15 }
 0x1b3   : > { %v1588_v56 = vadd.f32 %v1556_v62, %v1524_v9  ;;  %v2439_v12 = vmin.f32 %v2407_v11, 6.0  ;;  %v2440_v43 = vmin.f32 %v2408_v63, 6.0  ;;  %v1180_v20 = vsel %vm1097_vm0, 0.0, %v1104_v26 }
 0x1b4   : > { %v1106_v58 = vsel %vm1097_vm0, %v1104_v26, %v1105_v10  ;;  %v1589_v53 = vadd.f32 %v1557_v2, %v1525_v57  ;;  %v1784_v55 = vmul.f32 %v3960_v31, %v4395_v51  ;;  %v1785_v60 = vmul.f32 %v3962_v32, %v5132_v1 }
 0x1b5   : > { %v1620_v49 = vpack.c.bf16 %v1588_v56, %v1588_v56  ;;  %v2465_v5 = vpack.c.bf16 %v2440_v43, %v2439_v12  ;;  %v1848_v36 = vunpack.c.l.bf16 %v1750_v27  ;;  %v1849_v54 = vunpack.c.l.bf16 %v1751_v13  ;;  %v5135_v43 = vld [vmem:[#allocation31_spill] sm:$0xff] }
 0x1b6   : > { %v1978_v44 = vmul.f32 %v3973_v38, %v5133_v47  ;;  %v1621_v52 = vpack.c.bf16 %v1589_v53, %v1589_v53  ;;  %v1816_v62 = vpack.c.bf16 %v1784_v55, %v1784_v55  ;;  %v1817_v2 = vpack.c.bf16 %v1785_v60, %v1785_v60 }
 0x1b7   : > { %v1652_v46 = vunpack.c.l.bf16 %v1620_v49  ;;  %2581 = vmatmul.bf16.gmra.mxu1 %v2465_v5  ;;  %v1979_v21 = vmul.f32 %v3982_v42, %v5134_v7  ;;  %v599_v45 = vmul.f32 %v3925_v16, %v4233_v0  ;;  %v600_v50 = vmul.f32 %v3927_v17, %v4235_v41 }
 0x1b8   : > { %v2010_v40 = vpack.c.bf16 %v1978_v44, %v1978_v44  ;;  %v1653_v59 = vunpack.c.l.bf16 %v1621_v52  ;;  %v1880_v3 = vunpack.c.l.bf16 %v1816_v62  ;;  %v1881_v15 = vunpack.c.l.bf16 %v1817_v2  ;;  %v5136_v44 = vld [vmem:[#allocation32_spill] sm:$0xff] }
 0x1b9   : > { %v4653_v9 = vadd.f32 %v1652_v46, %v1180_v20  ;;  %v2011_v11 = vpack.c.bf16 %v1979_v21, %v1979_v21  ;;  %v631_v26 = vpack.c.bf16 %v599_v45, %v599_v45  ;;  %v632_v10 = vpack.c.bf16 %v600_v50, %v600_v50  ;;  %v5137_v46 = vld [vmem:[#allocation33_spill] sm:$0xff] }
 0x1ba   : > { %v2074_v63 = vunpack.c.l.bf16 %v2010_v40  ;;  %v4656_v57 = vadd.f32 %v1653_v59, %v1106_v58  ;;  %v1912_v56 = vadd.f32 %v1880_v3, %v1848_v36  ;;  %v1913_v27 = vadd.f32 %v1881_v15, %v1849_v54 }
 0x1bb   : > { %v667_v13 = vmul.f32 %v3944_v24, %v5126_v8  ;;  %v2075_v12 = vunpack.c.l.bf16 %v2011_v11  ;;  %v668_v53 = vmul.f32 %v3946_v25, %v5135_v43  ;;  %v731_v20 = vunpack.c.l.bf16 %v631_v26 }
 0x1bc   : > { %v732_v49 = vunpack.c.l.bf16 %v632_v10  ;;  %v1944_v55 = vpack.c.bf16 %v1912_v56, %v1912_v56  ;;  %v1945_v60 = vpack.c.bf16 %v1913_v27, %v1913_v27  ;;  %v863_v52 = vmul.f32 %v3964_v33, %v5136_v44 }
 0x1bd   : > { %v699_v5 = vpack.c.bf16 %v667_v13, %v667_v13  ;;  %v700_v58 = vpack.c.bf16 %v668_v53, %v668_v53  ;;  %v864_v36 = vmul.f32 %v3966_v34, %v5137_v46  ;;  %v1218_v54 = vmul.f32 %v3929_v18, %v4233_v0 }
 0x1be   : > { %v1219_v62 = vmul.f32 %v3940_v22, %v4235_v41  ;;  %v2042_v2 = vunpack.c.l.bf16 %v1944_v55  ;;  %v2043_v21 = vunpack.c.l.bf16 %v1945_v60  ;;  %v895_v45 = vpack.c.bf16 %v863_v52, %v863_v52 }
 0x1bf   : > { %v763_v40 = vunpack.c.l.bf16 %v699_v5  ;;  %v764_v50 = vunpack.c.l.bf16 %v700_v58  ;;  %v896_v59 = vpack.c.bf16 %v864_v36, %v864_v36  ;;  %v1250_v3 = vpack.c.bf16 %v1218_v54, %v1218_v54 }
 0x1c0   : > { %v1251_v15 = vpack.c.bf16 %v1219_v62, %v1219_v62  ;;  %v2106_v11 = vadd.f32 %v2074_v63, %v2042_v2  ;;  %v2107_v26 = vadd.f32 %v2075_v12, %v2043_v21  ;;  %v959_v56 = vunpack.c.l.bf16 %v895_v45 }
 0x1c1   : > { %v795_v10 = vadd.f32 %v763_v40, %v731_v20  ;;  %v796_v27 = vadd.f32 %v764_v50, %v732_v49  ;;  %v960_v13 = vunpack.c.l.bf16 %v896_v59  ;;  %v1284_v53 = vmul.f32 %v3956_v29, %v5126_v8 }
 0x1c2   : > { %v1285_v55 = vmul.f32 %v3958_v30, %v5135_v43  ;;  %v2138_v60 = vpack.c.bf16 %v2106_v11, %v2106_v11  ;;  %v2139_v5 = vpack.c.bf16 %v2107_v26, %v2107_v26  ;;  %v1348_v58 = vunpack.c.l.bf16 %v1250_v3 }
 0x1c3   : > { %v827_v52 = vpack.c.bf16 %v795_v10, %v795_v10  ;;  %v828_v36 = vpack.c.bf16 %v796_v27, %v796_v27  ;;  %v1316_v54 = vpack.c.bf16 %v1284_v53, %v1284_v53  ;;  %v1349_v12 = vunpack.c.l.bf16 %v1251_v15 }
 0x1c4   : > { %v1317_v63 = vpack.c.bf16 %v1285_v55, %v1285_v55  ;;  %v2170_v20 = vunpack.c.l.bf16 %v2138_v60  ;;  %v2171_v62 = vunpack.c.l.bf16 %v2139_v5  ;;  %v1478_v2 = vmul.f32 %v3968_v35, %v5136_v44 }
 0x1c5   : > { %v927_v49 = vunpack.c.l.bf16 %v827_v52  ;;  %v928_v21 = vunpack.c.l.bf16 %v828_v36  ;;  %v1380_v40 = vunpack.c.l.bf16 %v1316_v54  ;;  %v1479_v50 = vmul.f32 %v3971_v37, %v5137_v46 }
 0x1c6   : > { %v1381_v45 = vunpack.c.l.bf16 %v1317_v63  ;;  %v2237_v59 = vrot.slane %v2170_v20, 1  ;;  %v2238_v3 = vrot.slane %v2171_v62, 1  ;;  %v1510_v11 = vpack.c.bf16 %v1478_v2, %v1478_v2 }
 0x1c7   : > { %v991_v15 = vadd.f32 %v959_v56, %v927_v49  ;;  %v992_v26 = vadd.f32 %v960_v13, %v928_v21  ;;  %v1412_v10 = vadd.f32 %v1380_v40, %v1348_v58  ;;  %v1511_v53 = vpack.c.bf16 %v1479_v50, %v1479_v50 }
 0x1c8   : > { %v1413_v27 = vadd.f32 %v1381_v45, %v1349_v12  ;;  %v2239_v55 = vsel %vm2230_vm1, %v2237_v59, %v2238_v3  ;;  %v2313_v60 = vsel %vm2230_vm1, %v2238_v3, 0.0  ;;  %v1574_v52 = vunpack.c.l.bf16 %v1510_v11 }
 0x1c9   : > { %v1023_v5 = vpack.c.bf16 %v991_v15, %v991_v15  ;;  %v2331_v36 = vadd.f32 %v2239_v55, %v4653_v9  ;;  %v2332_v54 = vadd.f32 %v2313_v60, %v4656_v57  ;;  %v1024_v56 = vpack.c.bf16 %v992_v26, %v992_v26 }
 0x1ca   : > { %v1444_v63 = vpack.c.bf16 %v1412_v10, %v1412_v10  ;;  %v1445_v58 = vpack.c.bf16 %v1413_v27, %v1413_v27  ;;  %v1575_v12 = vunpack.c.l.bf16 %v1511_v53  ;;  %v1736_v20 = vmul.f32 %v3942_v23, %v4233_v0 }
 0x1cb   : > { %v1055_v13 = vunpack.c.l.bf16 %v1023_v5  ;;  %v2367_v62 = vadd.f32 %v4582_v48, %v2331_v36  ;;  %v2368_v49 = vadd.f32 %v4582_v48, %v2332_v54  ;;  %v1056_v2 = vunpack.c.l.bf16 %v1024_v56 }
 0x1cc   : > { %v1542_v21 = vunpack.c.l.bf16 %v1444_v63  ;;  %v1543_v45 = vunpack.c.l.bf16 %v1445_v58  ;;  %v1737_v9 = vmul.f32 %v3954_v28, %v4235_v41  ;;  %v1768_v57 = vpack.c.bf16 %v1736_v20, %v1736_v20 }
 0x1cd   : > { %v1131_v40 = vrot.slane %v1055_v13, 7  ;;  %v2399_v50 = vmax.f32 %v2367_v62, 0.0  ;;  %v2400_v59 = vmax.f32 %v2368_v49, 0.0  ;;  %v1132_v3 = vrot.slane %v1056_v2, 7 }
 0x1ce   : > { %v1606_v15 = vadd.f32 %v1574_v52, %v1542_v21  ;;  %v1607_v11 = vadd.f32 %v1575_v12, %v1543_v45  ;;  %v1769_v26 = vpack.c.bf16 %v1737_v9, %v1737_v9  ;;  %v1802_v10 = vmul.f32 %v3960_v31, %v5126_v8  ;;  %v3009_v52 = vld [vmem:[%s389_s10] sm:$0xff]  }
 0x1cf   : > { %v1189_v0 = vsel %vm1097_vm0, 0.0, %v1131_v40  ;;  %v2431_v27 = vmin.f32 %v2399_v50, 6.0  ;;  %v2432_v53 = vmin.f32 %v2400_v59, 6.0  ;;  %v1133_v55 = vsel %vm1097_vm0, %v1131_v40, %v1132_v3 }
 0x1d0   : > { %v1638_v60 = vpack.c.bf16 %v1606_v15, %v1606_v15  ;;  %v1639_v41 = vpack.c.bf16 %v1607_v11, %v1607_v11  ;;  %v1803_v5 = vmul.f32 %v3962_v32, %v5135_v43  ;;  %v1834_v36 = vpack.c.bf16 %v1802_v10, %v1802_v10 }
 0x1d1   : > { %v1866_v54 = vunpack.c.l.bf16 %v1768_v57  ;;  %v2461_v56 = vpack.c.bf16 %v2432_v53, %v2431_v27  ;;  %v1867_v13 = vunpack.c.l.bf16 %v1769_v26  ;;  %v1996_v8 = vmul.f32 %v3973_v38, %v5136_v44 }
 0x1d2   : > { %v1670_v63 = vunpack.c.l.bf16 %v1638_v60  ;;  %v1671_v58 = vunpack.c.l.bf16 %v1639_v41  ;;  %v1835_v12 = vpack.c.bf16 %v1803_v5, %v1803_v5  ;;  %v1898_v20 = vunpack.c.l.bf16 %v1834_v36 }
 0x1d3   : > { %v1997_v62 = vmul.f32 %v3982_v42, %v5137_v46  ;;  %2561 = vmatmul.bf16.gmra.mxu0 %v2461_v56  ;;  %v2028_v43 = vpack.c.bf16 %v1996_v8, %v1996_v8  ;;  %v3010_v2 = vunpack.c.l.bf16 %v3009_v52  ;;  %v3011_v21 = vunpack.c.h.bf16 %v3009_v52 }
 0x1d4   : > { %v4709_v49 = vadd.f32 %v1670_v63, %v1189_v0  ;;  %v4711_v40 = vadd.f32 %v1671_v58, %v1133_v55  ;;  %v1899_v45 = vunpack.c.l.bf16 %v1835_v12  ;;  %v1930_v9 = vadd.f32 %v1898_v20, %v1866_v54 }
 0x1d5   : > { %v2029_v57 = vpack.c.bf16 %v1997_v62, %v1997_v62  ;;  %v2092_v50 = vunpack.c.l.bf16 %v2028_v43  ;;  %v516_v44 = vstv %s515_s11  ;;  %v607_v59 = vmul.f32 %v3925_v16, %v4282_v14  ;;  %s2714_s11 = sshll.u32 %s2711_s9, 4  ;;  %s2715_s11 = int_to_ptr.hbm [resolvable:$true] %s2714_s11 }
 0x1d6   : > { %v608_v46 = vmul.f32 %v3927_v17, %v5128_v61  ;;  %v1931_v3 = vadd.f32 %v1899_v45, %v1867_v13  ;;  %v1962_v15 = vpack.c.bf16 %v1930_v9, %v1930_v9  ;;  %v520_v11 = vunpack.c.l.bf16 %v516_v44  ;;  %s3439_s6 = sshra.s32 %s2715_s11, 4  ;;  %s3440_s6 = int_to_ptr.hbm [resolvable:$true] %s3439_s6 }
 0x1d7   : > { %v2093_v0 = vunpack.c.l.bf16 %v2029_v57  ;;  %v639_v26 = vpack.c.bf16 %v607_v59, %v607_v59  ;;  %v675_v27 = vmul.f32 %v3944_v24, %v4494_v19  ;;  %v676_v53 = vmul.f32 %v3946_v25, %v4498_v39  ;;  %s3441_s10 = scalar_lea.hbm %s3440_s6, 128  ;;  %p3446_p10 = scmp.lt.s32.totalorder %s3440_s6, %s5147_s3 }
 0x1d8   : > { %v640_v10 = vpack.c.bf16 %v608_v46, %v608_v46  ;;  %v1963_v55 = vpack.c.bf16 %v1931_v3, %v1931_v3  ;;  %v2060_v60 = vunpack.c.l.bf16 %v1962_v15  ;;  %v521_v41 = vmul.f32 %v3010_v2, %v520_v11  ;;  %p3442_p5 = scmp.ne.s32.totalorder %s3440_s6, %s3441_s10 }
 0x1d9   : > { %v522_v5 = vmul.f32 %v3011_v21, %v520_v11  ;;  %v707_v36 = vpack.c.bf16 %v675_v27, %v675_v27  ;;  %v708_v54 = vpack.c.bf16 %v676_v53, %v676_v53  ;;  %v739_v52 = vunpack.c.l.bf16 %v639_v26 }
 0x1da   : > { %v740_v56 = vunpack.c.l.bf16 %v640_v10  ;;  %v2061_v63 = vunpack.c.l.bf16 %v1963_v55  ;;  %v2124_v13 = vadd.f32 %v2092_v50, %v2060_v60  ;;  %v523_v8 = vpack.c.bf16 %v521_v41, %v521_v41  ;;  %p3443_p8 = pnand %p3442_p5, %p3796_p4 }
 0x1db   : > { %v524_v58 = vpack.c.bf16 %v522_v5, %v522_v5  ;;  %v771_v12 = vunpack.c.l.bf16 %v707_v36  ;;  %v772_v20 = vunpack.c.l.bf16 %v708_v54  ;;  %v1226_v62 = vmul.f32 %v3929_v18, %v4282_v14 }
 0x1dc   : > { %v1227_v43 = vmul.f32 %v3940_v22, %v5128_v61  ;;  %v2125_v45 = vadd.f32 %v2093_v0, %v2061_v63  ;;  %v2156_v9 = vpack.c.bf16 %v2124_v13, %v2124_v13  ;;  %v4725_v2 = vunpack.c.l.bf16 %v523_v8  ;;  %p3444_p9 = pneg %p3443_p8 }
 0x1dd   : > { %v4727_v21 = vunpack.c.l.bf16 %v524_v58  ;;  %v803_v57 = vadd.f32 %v771_v12, %v739_v52  ;;  %v804_v44 = vadd.f32 %v772_v20, %v740_v56  ;;  %v1258_v59 = vpack.c.bf16 %v1226_v62, %v1226_v62 }
 0x1de   : > { %v1259_v50 = vpack.c.bf16 %v1227_v43, %v1227_v43  ;;  %v2157_v46 = vpack.c.bf16 %v2125_v45, %v2125_v45  ;;  %v2188_v3 = vunpack.c.l.bf16 %v2156_v9  ;;  %v871_v15 = vmul.f32 %v3964_v33, %v4725_v2 }
 0x1df   : > { %v872_v11 = vmul.f32 %v3966_v34, %v4727_v21  ;;  %v835_v26 = vpack.c.bf16 %v803_v57, %v803_v57  ;;  %v836_v10 = vpack.c.bf16 %v804_v44, %v804_v44  ;;  %v1292_v0 = vmul.f32 %v3956_v29, %v4494_v19 }
 0x1e0   : > { %v1293_v27 = vmul.f32 %v3958_v30, %v4498_v39  ;;  %v2189_v53 = vunpack.c.l.bf16 %v2157_v46  ;;  %v2264_v55 = vrot.slane %v2188_v3, 1  ;;  %v903_v60 = vpack.c.bf16 %v871_v15, %v871_v15 }
 0x1e1   : > { %v904_v41 = vpack.c.bf16 %v872_v11, %v872_v11  ;;  %v935_v5 = vunpack.c.l.bf16 %v835_v26  ;;  %v936_v36 = vunpack.c.l.bf16 %v836_v10  ;;  %v1324_v54 = vpack.c.bf16 %v1292_v0, %v1292_v0 }
 0x1e2   : > { %v1325_v52 = vpack.c.bf16 %v1293_v27, %v1293_v27  ;;  %v2265_v56 = vrot.slane %v2189_v53, 1  ;;  %v967_v63 = vunpack.c.l.bf16 %v903_v60  ;;  %v1356_v8 = vunpack.c.l.bf16 %v1258_v59 }
 0x1e3   : > { %v968_v13 = vunpack.c.l.bf16 %v904_v41  ;;  %v1357_v58 = vunpack.c.l.bf16 %v1259_v50  ;;  %v1388_v12 = vunpack.c.l.bf16 %v1324_v54  ;;  %v1486_v62 = vmul.f32 %v3968_v35, %v4725_v2 }
 0x1e4   : > { %v1389_v20 = vunpack.c.l.bf16 %v1325_v52  ;;  %v2266_v43 = vsel %vm2230_vm1, %v2264_v55, %v2265_v56  ;;  %v2322_v45 = vsel %vm2230_vm1, %v2265_v56, 0.0  ;;  %v999_v9 = vadd.f32 %v967_v63, %v935_v5 }
 0x1e5   : > { %v1000_v57 = vadd.f32 %v968_v13, %v936_v36  ;;  %v2349_v44 = vadd.f32 %v2266_v43, %v4709_v49  ;;  %v2350_v46 = vadd.f32 %v2322_v45, %v4711_v40  ;;  %v1420_v3 = vadd.f32 %v1388_v12, %v1356_v8 }
 0x1e6   : > { %v1421_v15 = vadd.f32 %v1389_v20, %v1357_v58  ;;  %v1031_v11 = vpack.c.bf16 %v999_v9, %v999_v9  ;;  %v1487_v50 = vmul.f32 %v3971_v37, %v4727_v21  ;;  %v1518_v26 = vpack.c.bf16 %v1486_v62, %v1486_v62 }
 0x1e7   : > { %v1032_v59 = vpack.c.bf16 %v1000_v57, %v1000_v57  ;;  %v2385_v10 = vadd.f32 %v4582_v48, %v2349_v44  ;;  %v2386_v0 = vadd.f32 %v4582_v48, %v2350_v46  ;;  %v1452_v27 = vpack.c.bf16 %v1420_v3, %v1420_v3 }
 0x1e8   : > { %v1453_v53 = vpack.c.bf16 %v1421_v15, %v1421_v15  ;;  %v1063_v55 = vunpack.c.l.bf16 %v1031_v11  ;;  %v1519_v41 = vpack.c.bf16 %v1487_v50, %v1487_v50  ;;  %v1582_v49 = vunpack.c.l.bf16 %v1518_v26 }
 0x1e9   : > { %v1064_v60 = vunpack.c.l.bf16 %v1032_v59  ;;  %v2417_v5 = vmax.f32 %v2385_v10, 0.0  ;;  %v2418_v40 = vmax.f32 %v2386_v0, 0.0  ;;  %v1550_v36 = vunpack.c.l.bf16 %v1452_v27 }
 0x1ea   : > { %v1551_v54 = vunpack.c.l.bf16 %v1453_v53  ;;  %v1143_v52 = vrot.slane %v1063_v55, 7  ;;  %v1583_v63 = vunpack.c.l.bf16 %v1519_v41  ;;  %v1744_v13 = vmul.f32 %v3942_v23, %v4282_v14 }
 0x1eb   : > { %v1144_v56 = vrot.slane %v1064_v60, 7  ;;  %v2449_v8 = vmin.f32 %v2417_v5, 6.0  ;;  %v2450_v58 = vmin.f32 %v2418_v40, 6.0  ;;  %v1614_v12 = vadd.f32 %v1582_v49, %v1550_v36 }
 0x1ec   : > { %v1745_v20 = vmul.f32 %v3954_v28, %v5128_v61  ;;  %v1193_v43 = vsel %vm1097_vm0, 0.0, %v1143_v52  ;;  %v1615_v45 = vadd.f32 %v1583_v63, %v1551_v54  ;;  %v1776_v9 = vpack.c.bf16 %v1744_v13, %v1744_v13  ;;  %v5139_v13 = vld [vmem:[#allocation27_spill] sm:$0xff] }
 0x1ed   : > { %v1145_v62 = vsel %vm1097_vm0, %v1143_v52, %v1144_v56  ;;  %v2470_v57 = vpack.c.bf16 %v2450_v58, %v2449_v8  ;;  %v1646_v44 = vpack.c.bf16 %v1614_v12, %v1614_v12  ;;  %v1810_v3 = vmul.f32 %v3960_v31, %v4494_v19  ;;  %v5138_v52 = vld [vmem:[#allocation26_spill] sm:$0xff]  ;;  %v5140_v12 = vld [vmem:[#allocation28_spill] sm:$0xff] }
 0x1ee   : > { %v1777_v46 = vpack.c.bf16 %v1745_v20, %v1745_v20  ;;  %v1647_v15 = vpack.c.bf16 %v1615_v45, %v1615_v45  ;;  %v1811_v14 = vmul.f32 %v3962_v32, %v4498_v39  ;;  %v1874_v11 = vunpack.c.l.bf16 %v1776_v9  ;;  %v5141_v9 = vld [vmem:[#allocation29_spill] sm:$0xff] }
 0x1ef   : > { %v2004_v61 = vmul.f32 %v3973_v38, %v4725_v2  ;;  %2606 = vmatmul.bf16.gmra.mxu2 %v2470_v57  ;;  %v1678_v59 = vunpack.c.l.bf16 %v1646_v44  ;;  %v1842_v50 = vpack.c.bf16 %v1810_v3, %v1810_v3  ;;  %v2005_v10 = vmul.f32 %v3982_v42, %v4727_v21 }
 0x1f0   : > { %v1875_v26 = vunpack.c.l.bf16 %v1777_v46  ;;  %v1679_v0 = vunpack.c.l.bf16 %v1647_v15  ;;  %v1843_v27 = vpack.c.bf16 %v1811_v14, %v1811_v14  ;;  %v591_v19 = vmul.f32 %v3925_v16, %v4340_v4 }
 0x1f1   : > { %v2036_v53 = vpack.c.bf16 %v2004_v61, %v2004_v61  ;;  %v4763_v55 = vadd.f32 %v1678_v59, %v1193_v43  ;;  %v1906_v39 = vunpack.c.l.bf16 %v1842_v50  ;;  %v2037_v60 = vpack.c.bf16 %v2005_v10, %v2005_v10 }
 0x1f2   : > { %v592_v2 = vmul.f32 %v3927_v17, %v5129_v6  ;;  %v4767_v41 = vadd.f32 %v1679_v0, %v1145_v62  ;;  %v1907_v49 = vunpack.c.l.bf16 %v1843_v27  ;;  %v623_v40 = vpack.c.bf16 %v591_v19, %v591_v19 }
 0x1f3   : > { %v2100_v5 = vunpack.c.l.bf16 %v2036_v53  ;;  %v1938_v36 = vadd.f32 %v1906_v39, %v1874_v11  ;;  %v2101_v21 = vunpack.c.l.bf16 %v2037_v60  ;;  %v659_v56 = vmul.f32 %v3944_v24, %v5138_v52 }
 0x1f4   : > { %v624_v54 = vpack.c.bf16 %v592_v2, %v592_v2  ;;  %v1939_v63 = vadd.f32 %v1907_v49, %v1875_v26  ;;  %v660_v8 = vmul.f32 %v3946_v25, %v5139_v13  ;;  %v723_v58 = vunpack.c.l.bf16 %v623_v40 }
 0x1f5   : > { %v855_v20 = vmul.f32 %v3964_v33, %v5140_v12  ;;  %v1970_v43 = vpack.c.bf16 %v1938_v36, %v1938_v36  ;;  %v691_v62 = vpack.c.bf16 %v659_v56, %v659_v56  ;;  %v856_v57 = vmul.f32 %v3966_v34, %v5141_v9 }
 0x1f6   : > { %v724_v45 = vunpack.c.l.bf16 %v624_v54  ;;  %v1971_v44 = vpack.c.bf16 %v1939_v63, %v1939_v63  ;;  %v692_v46 = vpack.c.bf16 %v660_v8, %v660_v8  ;;  %v1210_v15 = vmul.f32 %v3929_v18, %v4340_v4 }
 0x1f7   : > { %v887_v3 = vpack.c.bf16 %v855_v20, %v855_v20  ;;  %v2068_v14 = vunpack.c.l.bf16 %v1970_v43  ;;  %v755_v11 = vunpack.c.l.bf16 %v691_v62  ;;  %v888_v61 = vpack.c.bf16 %v856_v57, %v856_v57 }
 0x1f8   : > { %v1211_v59 = vmul.f32 %v3940_v22, %v5129_v6  ;;  %v2069_v50 = vunpack.c.l.bf16 %v1971_v44  ;;  %v756_v26 = vunpack.c.l.bf16 %v692_v46  ;;  %v1242_v0 = vpack.c.bf16 %v1210_v15, %v1210_v15 }
 0x1f9   : > { %v951_v10 = vunpack.c.l.bf16 %v887_v3  ;;  %v2132_v27 = vadd.f32 %v2100_v5, %v2068_v14  ;;  %v787_v53 = vadd.f32 %v755_v11, %v723_v58  ;;  %v952_v19 = vunpack.c.l.bf16 %v888_v61 }
 0x1fa   : > { %v1243_v39 = vpack.c.bf16 %v1211_v59, %v1211_v59  ;;  %v2133_v60 = vadd.f32 %v2101_v21, %v2069_v50  ;;  %v788_v2 = vadd.f32 %v756_v26, %v724_v45  ;;  %v1276_v49 = vmul.f32 %v3956_v29, %v5138_v52 }
 0x1fb   : > { %v1277_v40 = vmul.f32 %v3958_v30, %v5139_v13  ;;  %v2164_v36 = vpack.c.bf16 %v2132_v27, %v2132_v27  ;;  %v819_v54 = vpack.c.bf16 %v787_v53, %v787_v53  ;;  %v1340_v56 = vunpack.c.l.bf16 %v1242_v0 }
 0x1fc   : > { %v1341_v63 = vunpack.c.l.bf16 %v1243_v39  ;;  %v2165_v8 = vpack.c.bf16 %v2133_v60, %v2133_v60  ;;  %v820_v20 = vpack.c.bf16 %v788_v2, %v788_v2  ;;  %v1308_v43 = vpack.c.bf16 %v1276_v49, %v1276_v49 }
 0x1fd   : > { %v1309_v62 = vpack.c.bf16 %v1277_v40, %v1277_v40  ;;  %v2196_v5 = vunpack.c.l.bf16 %v2164_v36  ;;  %v919_v58 = vunpack.c.l.bf16 %v819_v54  ;;  %v1470_v21 = vmul.f32 %v3968_v35, %v5140_v12 }
 0x1fe   : > { %v1471_v45 = vmul.f32 %v3971_v37, %v5141_v9  ;;  %v2197_v57 = vunpack.c.l.bf16 %v2165_v8  ;;  %v920_v44 = vunpack.c.l.bf16 %v820_v20  ;;  %v1372_v46 = vunpack.c.l.bf16 %v1308_v43 }
 0x1ff   : > { %v1373_v3 = vunpack.c.l.bf16 %v1309_v62  ;;  %v2276_v15 = vrot.slane %v2196_v5, 1  ;;  %v983_v14 = vadd.f32 %v951_v10, %v919_v58  ;;  %v1502_v11 = vpack.c.bf16 %v1470_v21, %v1470_v21 }
 0x200   : > { %v1503_v61 = vpack.c.bf16 %v1471_v45, %v1471_v45  ;;  %v2277_v59 = vrot.slane %v2197_v57, 1  ;;  %v984_v50 = vadd.f32 %v952_v19, %v920_v44  ;;  %v1404_v26 = vadd.f32 %v1372_v46, %v1340_v56 }
 0x201   : > { %v1405_v0 = vadd.f32 %v1373_v3, %v1341_v63  ;;  %v1015_v27 = vpack.c.bf16 %v983_v14, %v983_v14  ;;  %v1566_v53 = vunpack.c.l.bf16 %v1502_v11  ;;  %v1728_v39 = vmul.f32 %v3942_v23, %v4340_v4 }
 0x202   : > { %v2278_v60 = vsel %vm2230_vm1, %v2276_v15, %v2277_v59  ;;  %v2326_v2 = vsel %vm2230_vm1, %v2277_v59, 0.0  ;;  %v1016_v49 = vpack.c.bf16 %v984_v50, %v984_v50  ;;  %v1436_v40 = vpack.c.bf16 %v1404_v26, %v1404_v26 }
 0x203   : > { %v2357_v36 = vadd.f32 %v2278_v60, %v4763_v55  ;;  %v2358_v10 = vadd.f32 %v2326_v2, %v4767_v41  ;;  %v1047_v54 = vunpack.c.l.bf16 %v1015_v27  ;;  %v1437_v8 = vpack.c.bf16 %v1405_v0, %v1405_v0 }
 0x204   : > { %v1048_v19 = vunpack.c.l.bf16 %v1016_v49  ;;  %v1534_v56 = vunpack.c.l.bf16 %v1436_v40  ;;  %v1567_v63 = vunpack.c.l.bf16 %v1503_v61  ;;  %v1729_v20 = vmul.f32 %v3954_v28, %v5129_v6 }
 0x205   : > { %v2393_v4 = vadd.f32 %v4582_v48, %v2357_v36  ;;  %v2394_v43 = vadd.f32 %v4582_v48, %v2358_v10  ;;  %v1535_v62 = vunpack.c.l.bf16 %v1437_v8  ;;  %v1760_v5 = vpack.c.bf16 %v1728_v39, %v1728_v39 }
 0x206   : > { %v1119_v58 = vrot.slane %v1047_v54, 7  ;;  %v1761_v21 = vpack.c.bf16 %v1729_v20, %v1729_v20  ;;  %v1794_v55 = vmul.f32 %v3960_v31, %v5138_v52  ;;  %v1120_v57 = vrot.slane %v1048_v19, 7 }
 0x207   : > { %v2425_v41 = vmax.f32 %v2393_v4, 0.0  ;;  %v2426_v45 = vmax.f32 %v2394_v43, 0.0  ;;  %v1598_v44 = vadd.f32 %v1566_v53, %v1534_v56  ;;  %v1795_v46 = vmul.f32 %v3962_v32, %v5139_v13 }
 0x208   : > { %v1826_v3 = vpack.c.bf16 %v1794_v55, %v1794_v55  ;;  %v1599_v14 = vadd.f32 %v1567_v63, %v1535_v62  ;;  %v1858_v11 = vunpack.c.l.bf16 %v1760_v5  ;;  %v1185_v48 = vsel %vm1097_vm0, 0.0, %v1119_v58 }
 0x209   : > { %v2457_v6 = vmin.f32 %v2425_v41, 6.0  ;;  %v2458_v15 = vmin.f32 %v2426_v45, 6.0  ;;  %v1827_v61 = vpack.c.bf16 %v1795_v46, %v1795_v46  ;;  %v1859_v59 = vunpack.c.l.bf16 %v1761_v21  ;;  %v5143_v21 = vld [vmem:[#allocation39_spill] sm:$0xff] }
 0x20a   : > { %v1890_v50 = vunpack.c.l.bf16 %v1826_v3  ;;  %v1121_v52 = vsel %vm1097_vm0, %v1119_v58, %v1120_v57  ;;  %v1988_v0 = vmul.f32 %v3973_v38, %v5140_v12  ;;  %v1989_v27 = vmul.f32 %v3982_v42, %v5141_v9  ;;  %v5142_v58 = vld [vmem:[#allocation38_spill] sm:$0xff] }
 0x20b   : > { %v2474_v26 = vpack.c.bf16 %v2458_v15, %v2457_v6  ;;  %v1630_v13 = vpack.c.bf16 %v1598_v44, %v1598_v44  ;;  %v1891_v53 = vunpack.c.l.bf16 %v1827_v61  ;;  %v583_v60 = vmul.f32 %v3925_v16, %v4395_v51 }
 0x20c   : > { %v1922_v39 = vadd.f32 %v1890_v50, %v1858_v11  ;;  %v1631_v2 = vpack.c.bf16 %v1599_v14, %v1599_v14  ;;  %v2020_v49 = vpack.c.bf16 %v1988_v0, %v1988_v0  ;;  %v2021_v40 = vpack.c.bf16 %v1989_v27, %v1989_v27 }
 0x20d   : > { %2626 = vmatmul.bf16.gmra.mxu3 %v2474_v26  ;;  %v584_v36 = vmul.f32 %v3927_v17, %v5132_v1  ;;  %v1923_v10 = vadd.f32 %v1891_v53, %v1859_v59  ;;  %v615_v8 = vpack.c.bf16 %v583_v60, %v583_v60  ;;  %v651_v12 = vmul.f32 %v3944_v24, %v5133_v47 }
 0x20e   : > { %v1954_v54 = vpack.c.bf16 %v1922_v39, %v1922_v39  ;;  %v2084_v9 = vunpack.c.l.bf16 %v2020_v49  ;;  %v2085_v19 = vunpack.c.l.bf16 %v2021_v40  ;;  %v652_v63 = vmul.f32 %v3946_v25, %v5134_v7 }
 0x20f   : > { %v616_v56 = vpack.c.bf16 %v584_v36, %v584_v36  ;;  %v1955_v16 = vpack.c.bf16 %v1923_v10, %v1923_v10  ;;  %v683_v4 = vpack.c.bf16 %v651_v12, %v651_v12  ;;  %v715_v43 = vunpack.c.l.bf16 %v615_v8 }
 0x210   : > { %v2052_v20 = vunpack.c.l.bf16 %v1954_v54  ;;  %v684_v62 = vpack.c.bf16 %v652_v63, %v652_v63  ;;  %v847_v17 = vmul.f32 %v3964_v33, %v5142_v58  ;;  %v848_v55 = vmul.f32 %v3966_v34, %v5143_v21 }
 0x211   : > { %v716_v5 = vunpack.c.l.bf16 %v616_v56  ;;  %v2053_v41 = vunpack.c.l.bf16 %v1955_v16  ;;  %v747_v45 = vunpack.c.l.bf16 %v683_v4  ;;  %v1202_v57 = vmul.f32 %v3929_v18, %v4395_v51 }
 0x212   : > { %v2116_v24 = vadd.f32 %v2084_v9, %v2052_v20  ;;  %v1662_v44 = vunpack.c.l.bf16 %v1630_v13  ;;  %v748_v25 = vunpack.c.l.bf16 %v684_v62  ;;  %v879_v46 = vpack.c.bf16 %v847_v17, %v847_v17  ;;  %v4840_v17 = vld [vmem:[%s5109_s19] ss:$0 sm:$0xff] }
 0x213   : > { %v1203_v3 = vmul.f32 %v3940_v22, %v5132_v1  ;;  %v2117_v6 = vadd.f32 %v2085_v19, %v2053_v41  ;;  %v779_v14 = vadd.f32 %v747_v45, %v715_v43  ;;  %v1234_v11 = vpack.c.bf16 %v1202_v57, %v1202_v57 }
 0x214   : > { %v2148_v15 = vpack.c.bf16 %v2116_v24, %v2116_v24  ;;  %v1663_v33 = vunpack.c.l.bf16 %v1631_v2  ;;  %v780_v61 = vadd.f32 %v748_v25, %v716_v5  ;;  %v880_v59 = vpack.c.bf16 %v848_v55, %v848_v55 }
 0x215   : > { %v1235_v34 = vpack.c.bf16 %v1203_v3, %v1203_v3  ;;  %v2149_v50 = vpack.c.bf16 %v2117_v6, %v2117_v6  ;;  %v811_v0 = vpack.c.bf16 %v779_v14, %v779_v14  ;;  %v1268_v18 = vmul.f32 %v3956_v29, %v5133_v47 }
 0x216   : > { %v2180_v26 = vunpack.c.l.bf16 %v2148_v15  ;;  %v812_v27 = vpack.c.bf16 %v780_v61, %v780_v61  ;;  %v943_v13 = vunpack.c.l.bf16 %v879_v46  ;;  %v1269_v53 = vmul.f32 %v3958_v30, %v5134_v7  ;;  %v2572_v61 = vpop.f32.mrf.mxu1 }
 0x217   : > { %v1332_v22 = vunpack.c.l.bf16 %v1234_v11  ;;  %v2181_v39 = vunpack.c.l.bf16 %v2149_v50  ;;  %v911_v49 = vunpack.c.l.bf16 %v811_v0  ;;  %v1300_v40 = vpack.c.bf16 %v1268_v18, %v1268_v18  ;;  %v2552_v0 = vpop.f32.mrf.mxu0 }
 0x218   : > { %v2252_v60 = vrot.slane %v2180_v26, 1  ;;  %v1694_v2 = vadd.f32 %v1662_v44, %v1185_v48  ;;  %v1695_v36 = vadd.f32 %v1663_v33, %v1121_v52  ;;  %v1301_v10 = vpack.c.bf16 %v1269_v53, %v1269_v53  ;;  %v2612_v26 = vpop.f32.mrf.mxu3 }
 0x219   : > { %v1333_v54 = vunpack.c.l.bf16 %v1235_v34  ;;  %v2253_v8 = vrot.slane %v2181_v39, 1  ;;  %v912_v12 = vunpack.c.l.bf16 %v812_v27  ;;  %v944_v9 = vunpack.c.l.bf16 %v880_v59  ;;  %v2592_v59 = vpop.f32.mrf.mxu2 }
 0x21a   : > { %v1364_v19 = vunpack.c.l.bf16 %v1300_v40  ;;  %v975_v56 = vadd.f32 %v943_v13, %v911_v49  ;;  %v1365_v29 = vunpack.c.l.bf16 %v1301_v10  ;;  %v1462_v63 = vmul.f32 %v3968_v35, %v5142_v58 }
 0x21b   : > { %v2254_v30 = vsel %vm2230_vm1, %v2252_v60, %v2253_v8  ;;  %v2318_v16 = vsel %vm2230_vm1, %v2253_v8, 0.0  ;;  %v1720_v48 = vmul.f32 %v3942_v23, %v4395_v51  ;;  %v1463_v62 = vmul.f32 %v3971_v37, %v5143_v21 }
 0x21c   : > { %v1396_v20 = vadd.f32 %v1364_v19, %v1332_v22  ;;  %v2341_v52 = vadd.f32 %v2254_v30, %v1694_v2  ;;  %v2342_v4 = vadd.f32 %v2318_v16, %v1695_v36  ;;  %v1397_v43 = vadd.f32 %v1365_v29, %v1333_v54 }
 0x21d   : > { %v976_v5 = vadd.f32 %v944_v9, %v912_v12  ;;  %v1494_v24 = vpack.c.bf16 %v1462_v63, %v1462_v63  ;;  %v1007_v45 = vpack.c.bf16 %v975_v56, %v975_v56  ;;  %v1721_v23 = vmul.f32 %v3954_v28, %v5132_v1 }
 0x21e   : > { %v2377_v35 = vadd.f32 %v4840_v17, %v2341_v52  ;;  %v2378_v55 = vadd.f32 %v4840_v17, %v2342_v4  ;;  %v1428_v41 = vpack.c.bf16 %v1396_v20, %v1396_v20  ;;  %v1752_v51 = vpack.c.bf16 %v1720_v48, %v1720_v48 }
 0x21f   : > { %v1429_v37 = vpack.c.bf16 %v1397_v43, %v1397_v43  ;;  %v1495_v25 = vpack.c.bf16 %v1463_v62, %v1463_v62  ;;  %v1008_v46 = vpack.c.bf16 %v976_v5, %v976_v5  ;;  %v1753_v3 = vpack.c.bf16 %v1721_v23, %v1721_v23  ;;  %v2554_v4 = vpop.f32.mrf.mxu0 }
 0x220   : > { %v2409_v57 = vmax.f32 %v2377_v35, 0.0  ;;  %v2410_v44 = vmax.f32 %v2378_v55, 0.0  ;;  %v1786_v6 = vmul.f32 %v3960_v31, %v5133_v47  ;;  %v1526_v11 = vunpack.c.l.bf16 %v1428_v41  ;;  %v4855_v47 = vld [vmem:[%s5144_s29] ss:$0 sm:$0xff]  ;;  %v2614_v52 = vpop.f32.mrf.mxu3  ;;  %s3445_s29 = scalar_lea.hbm %s5147_s3, 512 }
 0x221   : > { %v1558_v33 = vunpack.c.l.bf16 %v1494_v24  ;;  %v1039_v34 = vunpack.c.l.bf16 %v1007_v45  ;;  %v1787_v28 = vmul.f32 %v3962_v32, %v5134_v7  ;;  %v1850_v50 = vunpack.c.l.bf16 %v1752_v51  ;;  %v2594_v63 = vpop.f32.mrf.mxu2  ;;  %p3447_p12 = scmp.lt.s32.totalorder %s3445_s29, %s3441_s10 }
 0x222   : > { %v2441_v15 = vmin.f32 %v2409_v57, 6.0  ;;  %v2442_v14 = vmin.f32 %v2410_v44, 6.0  ;;  %v1818_v1 = vpack.c.bf16 %v1786_v6, %v1786_v6  ;;  %v1527_v27 = vunpack.c.l.bf16 %v1429_v37 }
 0x223   : > { %v1559_v13 = vunpack.c.l.bf16 %v1495_v25  ;;  %v1980_v31 = vmul.f32 %v3973_v38, %v5142_v58  ;;  %v1819_v53 = vpack.c.bf16 %v1787_v28, %v1787_v28  ;;  %v1851_v22 = vunpack.c.l.bf16 %v1753_v3  ;;  %p3448_p13 = por %p3447_p12, %p3446_p10 }
 0x224   : > { %v2466_v18 = vpack.c.bf16 %v2442_v14, %v2441_v15  ;;  %v1882_v39 = vunpack.c.l.bf16 %v1818_v1  ;;  %v1981_v32 = vmul.f32 %v3982_v42, %v5143_v21  ;;  %v1040_v7 = vunpack.c.l.bf16 %v1008_v46  ;;  %v2574_v21 = vpop.f32.mrf.mxu1 }
 0x225   : > { %v1590_v60 = vadd.f32 %v1558_v33, %v1526_v11  ;;  %v2012_v49 = vpack.c.bf16 %v1980_v31, %v1980_v31  ;;  %v1883_v40 = vunpack.c.l.bf16 %v1819_v53  ;;  %v1107_v10 = vrot.slane %v1039_v34, 7  ;;  %p3449_p1 = pnand %p3448_p13, %p3444_p9 }
 0x226   : > { %2586 = vmatmul.bf16.gmra.mxu1 %v2466_v18  ;;  %v1914_v2 = vadd.f32 %v1882_v39, %v1850_v50  ;;  %v2013_v36 = vpack.c.bf16 %v1981_v32, %v1981_v32  ;;  %v1591_v38 = vadd.f32 %v1559_v13, %v1527_v27  ;;  %v2573_v58 = vadd.f32 %v4855_v47, %v2572_v61 }
 0x227   : > { %v1915_v54 = vadd.f32 %v1883_v40, %v1851_v22  ;;  %v2076_v12 = vunpack.c.l.bf16 %v2012_v49  ;;  %v2593_v9 = vadd.f32 %v4855_v47, %v2592_v59  ;;  %v1108_v19 = vrot.slane %v1040_v7, 7  ;;  %v2557_v34 = vpop.f32.mrf.mxu0 }
 0x228   : > { %v1946_v8 = vpack.c.bf16 %v1914_v2, %v1914_v2  ;;  %v1622_v56 = vpack.c.bf16 %v1590_v60, %v1590_v60  ;;  %v2077_v29 = vunpack.c.l.bf16 %v2013_v36  ;;  %v2613_v42 = vadd.f32 %v4855_v47, %v2612_v26  ;;  %v2617_v59 = vpop.f32.mrf.mxu3 }
 0x229   : > { %v1947_v30 = vpack.c.bf16 %v1915_v54, %v1915_v54  ;;  %v2575_v20 = vadd.f32 %v4855_v47, %v2574_v21  ;;  %v2595_v48 = vadd.f32 %v4855_v47, %v2594_v63  ;;  %v1623_v43 = vpack.c.bf16 %v1591_v38, %v1591_v38  ;;  %v2597_v11 = vpop.f32.mrf.mxu2 }
 0x22a   : > { %v2044_v16 = vunpack.c.l.bf16 %v1946_v8  ;;  %v2553_v62 = vadd.f32 %v4855_v47, %v2552_v0  ;;  %v2615_v5 = vadd.f32 %v4855_v47, %v2614_v52  ;;  %v2555_v35 = vadd.f32 %v4855_v47, %v2554_v4 }
 0x22b   : > { %v2045_v55 = vunpack.c.l.bf16 %v1947_v30  ;;  %v3071_v24 = vpack.c.bf16 %v2575_v20, %v2573_v58  ;;  %v3091_v45 = vpack.c.bf16 %v2595_v48, %v2593_v9  ;;  %v1654_v37 = vunpack.c.l.bf16 %v1622_v56 }
 0x22c   : > { %v2108_v41 = vadd.f32 %v2076_v12, %v2044_v16  ;;  %v3111_v23 = vpack.c.bf16 %v2615_v5, %v2613_v42  ;;  %v3051_v51 = vpack.c.bf16 %v2555_v35, %v2553_v62  ;;  %v1655_v25 = vunpack.c.l.bf16 %v1623_v43  ;;  %v2577_v14 = vpop.f32.mrf.mxu1 }
 0x22d   : > { %v2109_v57 = vadd.f32 %v2077_v29, %v2045_v55  ;;  %3154 = vst [vmem:[%s4869_s18 + $0x20] sm:$0xff] %v3071_v24   ;;  %v1109_v46 = vsel %vm1097_vm0, %v1107_v10, %v1108_v19  ;;  %v1181_v3 = vsel %vm1097_vm0, 0.0, %v1107_v10  ;;  %v2578_v13 = vadd.f32 %v4855_v47, %v2577_v14 }
 0x22e   : > { %v2140_v44 = vpack.c.bf16 %v2108_v41, %v2108_v41  ;;  %3158 = vst [vmem:[%s4869_s18 + $0x40] sm:$0xff] %v3091_v45   ;;  %v1686_v28 = vadd.f32 %v1654_v37, %v1181_v3  ;;  %v1687_v1 = vadd.f32 %v1655_v25, %v1109_v46  ;;  %v2598_v31 = vadd.f32 %v4855_v47, %v2597_v11 }
 0x22f   : > { %v2141_v6 = vpack.c.bf16 %v2109_v57, %v2109_v57  ;;  %3162 = vst [vmem:[%s4869_s18 + $0x60] sm:$0xff] %v3111_v23   ;;  %v2618_v39 = vadd.f32 %v4855_v47, %v2617_v59  ;;  %v2558_v60 = vadd.f32 %v4855_v47, %v2557_v34  ;;  %v2559_v36 = vpop.f32.mrf.mxu0 }
 0x230   : > { %v2172_v15 = vunpack.c.l.bf16 %v2140_v44  ;;  %3052 = vst [vmem:[%s4869_s18] sm:$0xff] %v3051_v51   ;;  %v2619_v2 = vpop.f32.mrf.mxu3  ;;  %v2560_v58 = vadd.f32 %v4855_v47, %v2559_v36 }
 0x231   : > { %v2173_v33 = vunpack.c.l.bf16 %v2141_v6  ;;  %v2599_v7 = vpop.f32.mrf.mxu2 }
 0x232   : > { %v2240_v61 = vrot.slane %v2172_v15, 1  ;;  %v2600_v40 = vadd.f32 %v4855_v47, %v2599_v7  ;;  %v3056_v56 = vpack.c.bf16 %v2560_v58, %v2558_v60 }
 0x233   : > { %v2241_v50 = vrot.slane %v2173_v33, 1 }
 0x234   : > { %v2579_v32 = vpop.f32.mrf.mxu1  ;;  %v3096_v8 = vpack.c.bf16 %v2600_v40, %v2598_v31  ;;  %3151 = vst [vmem:[%s4869_s18 + $0x8] sm:$0xff] %v3056_v56  }
 0x235   : > { %v2242_v26 = vsel %vm2230_vm1, %v2240_v61, %v2241_v50  ;;  %v2314_v0 = vsel %vm2230_vm1, %v2241_v50, 0.0  ;;  %v2580_v49 = vadd.f32 %v4855_v47, %v2579_v32 }
 0x236   : > { %v2333_v18 = vadd.f32 %v2242_v26, %v1686_v28  ;;  %v2334_v27 = vadd.f32 %v2314_v0, %v1687_v1  ;;  %3159 = vst [vmem:[%s4869_s18 + $0x48] sm:$0xff] %v3096_v8  }
 0x237   : > { %v3076_v54 = vpack.c.bf16 %v2580_v49, %v2578_v13 }
 0x238   : > { %v2369_v53 = vadd.f32 %v4840_v17, %v2333_v18  ;;  %v2370_v22 = vadd.f32 %v4840_v17, %v2334_v27  ;;  %v2620_v17 = vadd.f32 %v4855_v47, %v2619_v2  ;;  %v2622_v63 = vpop.f32.mrf.mxu3 }
 0x239   : > { %3155 = vst [vmem:[%s4869_s18 + $0x28] sm:$0xff] %v3076_v54   ;;  %v2602_v21 = vpop.f32.mrf.mxu2  ;;  %v2623_v20 = vadd.f32 %v4855_v47, %v2622_v63 }
 0x23a   : > { %v2401_v10 = vmax.f32 %v2369_v53, 0.0  ;;  %v2402_v38 = vmax.f32 %v2370_v22, 0.0  ;;  %v3116_v19 = vpack.c.bf16 %v2620_v17, %v2618_v39  ;;  %v2603_v16 = vadd.f32 %v4855_v47, %v2602_v21 }
 0x23c   : > { %v2433_v12 = vmin.f32 %v2401_v10, 6.0  ;;  %v2434_v9 = vmin.f32 %v2402_v38, 6.0  ;;  %3163 = vst [vmem:[%s4869_s18 + $0x68] sm:$0xff] %v3116_v19   ;;  %v2582_v42 = vpop.f32.mrf.mxu1 }
 0x23d   : > { %v2583_v30 = vadd.f32 %v4855_v47, %v2582_v42 }
 0x23e   : > { %v2462_v29 = vpack.c.bf16 %v2434_v9, %v2433_v12 }
 0x240   : > { %2566 = vmatmul.bf16.gmra.mxu0 %v2462_v29  ;;  %v2624_v62 = vpop.f32.mrf.mxu3 }
 0x241   : > { %v2604_v52 = vpop.f32.mrf.mxu2  ;;  %v2625_v5 = vadd.f32 %v4855_v47, %v2624_v62 }
 0x242   : > { %v2605_v43 = vadd.f32 %v4855_v47, %v2604_v52 }
 0x243   : > { %v3121_v41 = vpack.c.bf16 %v2625_v5, %v2623_v20 }
 0x244   : > { %v2584_v48 = vpop.f32.mrf.mxu1  ;;  %v3101_v55 = vpack.c.bf16 %v2605_v43, %v2603_v16 }
 0x245   : > { %v2585_v4 = vadd.f32 %v4855_v47, %v2584_v48  ;;  %3164 = vst [vmem:[%s4869_s18 + $0x70] sm:$0xff] %v3121_v41  }
 0x246   : > { %3160 = vst [vmem:[%s4869_s18 + $0x50] sm:$0xff] %v3101_v55  }
 0x247   : > { %v3081_v35 = vpack.c.bf16 %v2585_v4, %v2583_v30 }
 0x249   : > { %3156 = vst [vmem:[%s4869_s18 + $0x30] sm:$0xff] %v3081_v35  }
 0x250   : > { %v2562_v24 = vpop.f32.mrf.mxu0 }
 0x251   : > { %v2563_v23 = vadd.f32 %v4855_v47, %v2562_v24 }
 0x258   : > { %v2564_v45 = vpop.f32.mrf.mxu0 }
 0x259   : > { %v2565_v51 = vadd.f32 %v4855_v47, %v2564_v45 }
 0x25b   : > { %v3061_v57 = vpack.c.bf16 %v2565_v51, %v2563_v23 }
 0x25d   : > { %3152 = vst [vmem:[%s4869_s18 + $0x10] sm:$0xff] %v3061_v57  }
 0x272   : > { %v2607_v44 = vpop.f32.mrf.mxu2 }
 0x273   : > { %v2608_v25 = vadd.f32 %v4855_v47, %v2607_v44 }
 0x27a   : > { %v2609_v3 = vpop.f32.mrf.mxu2 }
 0x27b   : > { %v2610_v15 = vadd.f32 %v4855_v47, %v2609_v3 }
 0x27d   : > { %v3106_v11 = vpack.c.bf16 %v2610_v15, %v2608_v25 }
 0x27f   : > { %3161 = vst [vmem:[%s4869_s18 + $0x58] sm:$0xff] %v3106_v11  }
 0x290   : > { %v2627_v37 = vpop.f32.mrf.mxu3 }
 0x291   : > { %v2628_v46 = vadd.f32 %v4855_v47, %v2627_v37 }
 0x298   : > { %v2629_v6 = vpop.f32.mrf.mxu3 }
 0x299   : > { %v2630_v14 = vadd.f32 %v4855_v47, %v2629_v6 }
 0x29b   : > { %v3126_v33 = vpack.c.bf16 %v2630_v14, %v2628_v46 }
 0x29d   : > { %3165 = vst [vmem:[%s4869_s18 + $0x78] sm:$0xff] %v3126_v33  }
 0x2a3   : > { %v2587_v61 = vpop.f32.mrf.mxu1 }
 0x2a4   : > { %v2588_v59 = vadd.f32 %v4855_v47, %v2587_v61 }
 0x2ab   : > { %v2589_v34 = vpop.f32.mrf.mxu1 }
 0x2ac   : > { %v2590_v28 = vadd.f32 %v4855_v47, %v2589_v34 }
 0x2ae   : > { %v3086_v1 = vpack.c.bf16 %v2590_v28, %v2588_v59 }
 0x2b0   : > { %3157 = vst [vmem:[%s4869_s18 + $0x38] sm:$0xff] %v3086_v1  }
 0x2bd   : > { %v2567_v50 = vpop.f32.mrf.mxu0 }
 0x2be   : > { %v2568_v0 = vadd.f32 %v4855_v47, %v2567_v50 }
 0x2c5   : > { %v2569_v26 = vpop.f32.mrf.mxu0 }
 0x2c6   : > { %v2570_v18 = vadd.f32 %v4855_v47, %v2569_v26 }
 0x2c8   : > { %v3066_v27 = vpack.c.bf16 %v2570_v18, %v2568_v0 }
 0x2ca   : > { %3153 = vst [vmem:[%s4869_s18 + $0x18] sm:$0xff] %v3066_v27  }
 0x2cb   : > { %3452 = shalt.err (!%p3449_p1)
}
 0x2cc   : > { %s3583_s17 = smov 64   ;;  %s3584_s18 = smov 4  }
 0x2cd   : > { %3196 = dma.vmem_to_hbm [thread:$0]  (%p3796_p4), %s2713_s20, 2048, %s2715_s11, %s2697_s12, %s3583_s17, %s3583_s17, %s3584_s18  }
 0x2ce PF: > { %s5148_s30 = sld [smem:[#allocation14_spill]]  ;;  %p3213_p2 = scmp.ge.s32.totalorder %s3579_s14, 2 }
 0x2d0   : > { %p3209_p11 = pnand %p3213_p2, %p3800_p6 }
 0x2d2   : > { %p3210_p0 = pneg %p3209_p11 }
 0x2d4   : > { %s2729_s15 = sand.u32 1, %s5148_s30  }
 0x2d5   : > { %s2730_s23 = scalar_lea.sflag [#allocation4], %s2729_s15 }
 0x2d6   : > { %3522 = dma.done.wait (%p3210_p0), %s2730_s23, 2048  }
 0x2d7   : > { %3524 = vsyncadd (%p3210_p0), %s2730_s23, 4294965248  ;;  %s26_s14 = sadd.s32 1, %s3579_s14   ;;  %s5151_s7 = sld [smem:[#allocation13_spill]] }
 0x2d8   : > { %p4939_p7 = scmp.ge.s32.totalorder %s26_s14, 6   ;;  %s5152_s29 = sld [smem:[#allocation23_spill]] }
 0x2d9   : > { %s5153_s9 = sld [smem:[#allocation15_spill]]  ;;  %s5160_s24 = smov %s3531_s25 }
 0x2da   : > { %s5154_s20 = sld [smem:[#allocation24_spill]]  ;;  %s5161_s25 = smov %s3535_s26 }
 0x2db   : > { %s5155_s10 = sld [smem:[#allocation18_spill]]  ;;  %s5162_s26 = smov %s3843_s21 }
 0x2dc   : > { %s5156_s11 = sld [smem:[#allocation19_spill]]  ;;  %s5163_s27 = smov %s3543_s28 }
 0x2dd   : > { %s5157_s12 = sld [smem:[#allocation20_spill]]  ;;  %s5164_s28 = smov %s5151_s7 }
 0x2de   : > { %s5158_s13 = sld [smem:[#allocation21_spill]]  ;;  %s5165_s30 = smov %s3555_s8 }
 0x2df   : > { %s5166_s8 = smov %s5153_s9  ;;  %25 = sbr.rel (!%p4939_p7) target bundleno = 20 (0x14), region = 117 }
 0x2e0   : > { %s5167_s9 = smov %s5154_s20 }
 0x2e4   :  { %2736 = vsyncpa [#allocation3], 1 }
 0x2e5   :  { %2738 = vsyncpa [#allocation3 + $0x1], 1 }
 0x2e6   :  { %2739 = vsyncpa [#allocation6], 1 }
 0x2e7   :  { %2741 = vsyncpa [#allocation6 + $0x1], 1 }
 0x2e8   :  { %2742 = vsyncpa [#allocation4], 1 }
 0x2e9   :  { %2744 = vsyncpa [#allocation4 + $0x1], 1 }

</bundles_post_ra>
